<compile_context>
chip_gen: v7x
topology: tpu7x:2x2x1
jax: 0.10.0
libtpu: 0.0.40
codegen_flags: <defaults>
</compile_context>

<pallas_src>
import functools

import jax
import jax.numpy as jnp
from jax import lax
from jax.experimental import pallas as pl
from jax.experimental.pallas import tpu as pltpu


# --------------------------- Pallas kernels ---------------------------------

def _conv_rows_kernel(x_ref, w_ref, b_ref, o_ref, *, kh, kw, ho, wo):
    """Fused stride-1 VALID conv + bias + ReLU on one NHWC image.

    x_ref: (H, W, Cin)          VMEM-resident feature map (batch squeezed)
    w_ref: (kh*kw, Cin, Cout)   tap-major weights
    b_ref: (1, Cout)
    o_ref: (ho, wo, Cout)

    Implicit im2col: for each output row, accumulate kh*kw shifted
    (wo, Cin) @ (Cin, Cout) MXU matmuls.  Only 2-D ops, no in-kernel reshapes.
    """
    cout = o_ref.shape[-1]
    # Hoist loop-invariant VMEM loads (tap weights, bias) out of the row loop.
    w_taps = [w_ref[t] for t in range(kh * kw)]
    bias = b_ref[...]                                        # (1, Cout)

    def row_body(r, carry):
        acc = jnp.zeros((wo, cout), jnp.float32)
        for dy in range(kh):
            for dx in range(kw):
                seg = x_ref[r + dy, dx:dx + wo, :]           # (wo, Cin)
                acc = acc + jnp.dot(seg, w_taps[dy * kw + dx],
                                    preferred_element_type=jnp.float32)
        o_ref[r] = jnp.maximum(acc + bias, 0.0)
        return carry

    lax.fori_loop(0, ho, row_body, 0)


def conv2d_relu(x, w_taps, b, kh, kw):
    """NHWC stride-1 VALID conv + bias + ReLU via the tap-sum Pallas kernel."""
    B, H, W, Cin = x.shape
    T, Cin_t, Cout = w_taps.shape
    assert T == kh * kw and Cin_t == Cin
    Ho, Wo = H - kh + 1, W - kw + 1
    kernel = functools.partial(_conv_rows_kernel, kh=kh, kw=kw, ho=Ho, wo=Wo)
    return pl.pallas_call(
        kernel,
        out_shape=jax.ShapeDtypeStruct((B, Ho, Wo, Cout), jnp.float32),
        grid=(B,),
        in_specs=[
            pl.BlockSpec((None, H, W, Cin), lambda i: (i, 0, 0, 0)),
            pl.BlockSpec((T, Cin, Cout), lambda i: (0, 0, 0)),
            pl.BlockSpec((1, Cout), lambda i: (0, 0)),
        ],
        out_specs=pl.BlockSpec((None, Ho, Wo, Cout), lambda i: (i, 0, 0, 0)),
        compiler_params=pltpu.CompilerParams(
            dimension_semantics=("parallel",)),
    )(x, w_taps, b.reshape(1, Cout))


def _matmul_bias_relu_kernel(x_ref, w_ref, b_ref, o_ref, acc_ref):
    @pl.when(pl.program_id(1) == 0)
    def _():
        acc_ref[...] = jnp.zeros_like(acc_ref)

    acc_ref[...] += jnp.dot(x_ref[...], w_ref[...],
                            preferred_element_type=jnp.float32)

    @pl.when(pl.program_id(1) == pl.num_programs(1) - 1)
    def _():
        o_ref[...] = jnp.maximum(acc_ref[...] + b_ref[...],
                                 0.0).astype(o_ref.dtype)


def matmul_bias_relu(x, w, b, tn=256, tk=512):
    """(M,K) @ (K,N) + b with fused ReLU.  M kept whole (no M padding);
    K/N here are already 128-aligned so no pad copies are made."""
    M, K = x.shape
    Kw, N = w.shape
    assert K == Kw
    tn = min(tn, N)
    tk = min(tk, K)
    assert N % tn == 0 and K % tk == 0, (N, tn, K, tk)
    return pl.pallas_call(
        _matmul_bias_relu_kernel,
        out_shape=jax.ShapeDtypeStruct((M, N), jnp.float32),
        grid=(N // tn, K // tk),                       # reduction axis last
        in_specs=[
            pl.BlockSpec((M, tk), lambda j, kk: (0, kk)),
            pl.BlockSpec((tk, tn), lambda j, kk: (kk, j)),
            pl.BlockSpec((1, tn), lambda j, kk: (0, j)),
        ],
        out_specs=pl.BlockSpec((M, tn), lambda j, kk: (0, j)),
        scratch_shapes=[pltpu.VMEM((M, tn), jnp.float32)],
        compiler_params=pltpu.CompilerParams(
            dimension_semantics=("parallel", "arbitrary")),
    )(x, w, b.reshape(1, N))


# --------------------------- layout helpers (cheap XLA glue) -----------------

def space_to_depth_nhwc(x, s):
    """(B,H,W,C) -> (B,H/s,W/s,s*s*C), channel order (ry, rx, c)."""
    if s == 1:
        return x
    B, H, W, C = x.shape
    x = x.reshape(B, H // s, s, W // s, s, C).transpose(0, 1, 3, 2, 4, 5)
    return x.reshape(B, H // s, W // s, s * s * C)


def conv_weight_to_taps(w, s):
    """torch (Cout,Cin,k,k) -> (T, Cin', Cout) tap-major weights matching the
    space-to-depth-by-s activation layout (requires k == 2*s, or s == 1)."""
    cout, cin, k, k2 = w.shape
    assert k == k2
    wt = jnp.transpose(w, (2, 3, 1, 0))                    # (kh, kw, Cin, Cout)
    if s == 1:
        return wt.reshape(k * k, cin, cout)
    assert k == 2 * s
    wt = wt.reshape(2, s, 2, s, cin, cout)                 # (Dy, ry, Dx, rx, .)
    wt = wt.transpose(0, 2, 1, 3, 4, 5)                    # (Dy, Dx, ry, rx, .)
    return wt.reshape(4, s * s * cin, cout)


# --------------------------- model ------------------------------------------

def nature_cnn_forward(params, observations):
    """observations: NCHW (B, 3, 120, 160) float32 -> (B, 512)."""
    B, C, H, W = observations.shape
    assert (C, H, W) == (3, 120, 160)
    # conv1 (k8,s4): NCHW->NHWC fused with space-to-depth(4) -> 2x2 s1 conv.
    x = observations.reshape(B, 3, 30, 4, 40, 4).transpose(0, 2, 4, 3, 5, 1)
    x = x.reshape(B, 30, 40, 48)
    h = conv2d_relu(x, params["w1_taps"], params["b1"], 2, 2)      # (B,29,39,32)
    # conv2 (k4,s2): crop to the used region + space-to-depth(2) -> 2x2 s1.
    h = space_to_depth_nhwc(h[:, :28, :38, :], 2)                  # (B,14,19,128)
    h = conv2d_relu(h, params["w2_taps"], params["b2"], 2, 2)      # (B,13,18,64)
    # conv3 (k3,s1).
    h = conv2d_relu(h, params["w3_taps"], params["b3"], 3, 3)      # (B,11,16,64)
    # Flatten + Linear + ReLU.  The FC weight was pre-permuted to the NHWC
    # flatten order, so no activation transpose is needed here.
    flat = h.reshape(B, 11 * 16 * 64)
    return matmul_bias_relu(flat, params["w_fc_hwc"], params["b_fc"])


def init_torch_params(key):
    """Random parameters in the PyTorch module's native layouts."""
    ks = jax.random.split(key, 4)

    def conv_p(k, cout, cin, ksz):
        k1, k2 = jax.random.split(k)
        fan_in = cin * ksz * ksz
        w = jax.random.normal(k1, (cout, cin, ksz, ksz),
                              jnp.float32) / jnp.sqrt(fan_in)
        b = 0.01 * jax.random.normal(k2, (cout,), jnp.float32)
        return w, b

    w1, b1 = conv_p(ks[0], 32, 3, 8)
    w2, b2 = conv_p(ks[1], 64, 32, 4)
    w3, b3 = conv_p(ks[2], 64, 64, 3)
    n_flatten = 64 * 11 * 16
    k1, k2 = jax.random.split(ks[3])
    w_fc = jax.random.normal(k1, (512, n_flatten),
                             jnp.float32) / jnp.sqrt(n_flatten)
    b_fc = 0.01 * jax.random.normal(k2, (512,), jnp.float32)
    return {"w1": w1, "b1": b1, "w2": w2, "b2": b2, "w3": w3, "b3": b3,
            "w_fc": w_fc, "b_fc": b_fc}


def convert_params(tp):
    """One-time conversion of torch-layout params to kernel-friendly layouts."""
    n_flatten = 64 * 11 * 16
    # rows of w_fc consume (c,h,w)-flattened features; permute to (h,w,c).
    w_fc_hwc = (tp["w_fc"].reshape(512, 64, 11, 16)
                .transpose(0, 2, 3, 1).reshape(512, n_flatten).T)   # (11264,512)
    return {
        "w1_taps": conv_weight_to_taps(tp["w1"], 4), "b1": tp["b1"],
        "w2_taps": conv_weight_to_taps(tp["w2"], 2), "b2": tp["b2"],
        "w3_taps": conv_weight_to_taps(tp["w3"], 1), "b3": tp["b3"],
        "w_fc_hwc": w_fc_hwc, "b_fc": tp["b_fc"],
    }


# --------------------------- pure-JAX reference ------------------------------

def reference_forward(tp, obs):
    prec = lax.Precision.HIGHEST

    def conv(x, w, b, stride):
        y = lax.conv_general_dilated(
            x, w, window_strides=(stride, stride), padding="VALID",
            dimension_numbers=("NCHW", "OIHW", "NCHW"), precision=prec)
        return jax.nn.relu(y + b[None, :, None, None])

    h = conv(obs, tp["w1"], tp["b1"], 4)
    h = conv(h, tp["w2"], tp["b2"], 2)
    h = conv(h, tp["w3"], tp["b3"], 1)
    flat = h.reshape(h.shape[0], -1)              # PyTorch (C,H,W) flatten order
    return jax.nn.relu(jnp.dot(flat, tp["w_fc"].T, precision=prec) + tp["b_fc"])


if __name__ == "__main__":
    key = jax.random.PRNGKey(0)
    pkey, xkey = jax.random.split(key)
    torch_params = init_torch_params(pkey)
    params = convert_params(torch_params)
    # The module's n_flatten probe pins the input spatial size to 120x160.
    x = jax.random.normal(xkey, (2, 3, 120, 160), jnp.float32)

    fwd = jax.jit(nature_cnn_forward)
    out = jax.block_until_ready(fwd(params, x))
    assert out.shape == (2, 512), out.shape
    assert bool(jnp.all(jnp.isfinite(out)))

    ref = jax.block_until_ready(jax.jit(reference_forward)(torch_params, x))
    max_err = float(jnp.max(jnp.abs(out - ref)))
    assert max_err < 2e-3, max_err
    print("KERNEL_OK")
</pallas_src>

<mosaic_0001>
module attributes {stable_mosaic.version = 11 : i64} {
  func.func @_conv_rows_kernel(%arg0: i32, %arg1: memref<1x30x40x48xf32, #tpu.memory_space<vmem>>, %arg2: memref<4x48x32xf32, #tpu.memory_space<vmem>>, %arg3: memref<1x32xf32, #tpu.memory_space<vmem>>, %arg4: memref<1x29x39x32xf32, #tpu.memory_space<vmem>>) attributes {dimension_semantics = [#tpu.dimension_semantics<parallel>], iteration_bounds = array<i64: 2>, scalar_prefetch = 0 : i64, scratch_operands = 0 : i64, tpu.core_type = #tpu.core_type<tc>, window_params = [{transform_indices = @transform_0, window_bounds = array<i64: 1, 30, 40, 48>}, {pipeline_mode = #tpu.pipeline_mode<synchronous>, transform_indices = @transform_1, window_bounds = array<i64: 4, 48, 32>}, {pipeline_mode = #tpu.pipeline_mode<synchronous>, transform_indices = @transform_2, window_bounds = array<i64: 1, 32>}, {transform_indices = @transform_3, window_bounds = array<i64: 1, 29, 39, 32>}]} {
    %c0 = arith.constant 0 : index
    %c0_0 = arith.constant 0 : index
    %c0_1 = arith.constant 0 : index
    %0 = vector.load %arg2[%c0, %c0_0, %c0_1] : memref<4x48x32xf32, #tpu.memory_space<vmem>>, vector<1x48x32xf32>
    %1 = vector.shape_cast %0 : vector<1x48x32xf32> to vector<48x32xf32>
    %c1 = arith.constant 1 : index
    %c0_2 = arith.constant 0 : index
    %c0_3 = arith.constant 0 : index
    %2 = vector.load %arg2[%c1, %c0_2, %c0_3] : memref<4x48x32xf32, #tpu.memory_space<vmem>>, vector<1x48x32xf32>
    %3 = vector.shape_cast %2 : vector<1x48x32xf32> to vector<48x32xf32>
    %c2 = arith.constant 2 : index
    %c0_4 = arith.constant 0 : index
    %c0_5 = arith.constant 0 : index
    %4 = vector.load %arg2[%c2, %c0_4, %c0_5] : memref<4x48x32xf32, #tpu.memory_space<vmem>>, vector<1x48x32xf32>
    %5 = vector.shape_cast %4 : vector<1x48x32xf32> to vector<48x32xf32>
    %c3 = arith.constant 3 : index
    %c0_6 = arith.constant 0 : index
    %c0_7 = arith.constant 0 : index
    %6 = vector.load %arg2[%c3, %c0_6, %c0_7] : memref<4x48x32xf32, #tpu.memory_space<vmem>>, vector<1x48x32xf32>
    %7 = vector.shape_cast %6 : vector<1x48x32xf32> to vector<48x32xf32>
    %c0_8 = arith.constant 0 : index
    %c0_9 = arith.constant 0 : index
    %8 = vector.load %arg3[%c0_8, %c0_9] : memref<1x32xf32, #tpu.memory_space<vmem>>, vector<1x32xf32>
    %c0_i32 = arith.constant 0 : i32
    %c29_i32 = arith.constant 29 : i32
    %9 = arith.addi %c0_i32, %c29_i32 : i32
    %c1_i32 = arith.constant 1 : i32
    scf.for %arg5 = %c0_i32 to %9 step %c1_i32  : i32 {
      %cst = arith.constant 0.000000e+00 : f32
      %10 = vector.broadcast %cst : f32 to vector<39x32xf32>
      %c0_i32_11 = arith.constant 0 : i32
      %11 = arith.addi %arg5, %c0_i32_11 : i32
      %c0_12 = arith.constant 0 : index
      %12 = arith.index_cast %11 : i32 to index
      %c0_13 = arith.constant 0 : index
      %c0_14 = arith.constant 0 : index
      %13 = vector.load %arg1[%c0_12, %12, %c0_13, %c0_14] : memref<1x30x40x48xf32, #tpu.memory_space<vmem>>, vector<1x1x39x48xf32>
      %14 = vector.shape_cast %13 : vector<1x1x39x48xf32> to vector<39x48xf32>
      %cst_15 = arith.constant dense<0.000000e+00> : vector<39x32xf32>
      %15 = tpu.matmul %14, %1, %cst_15 {dimension_numbers = #tpu.dot_dimension_numbers<[1], [0], [0], [1], [0, 0, 1, 1], [], []>} : vector<39x48xf32>, vector<48x32xf32>, vector<39x32xf32> -> vector<39x32xf32>
      %16 = arith.addf %10, %15 : vector<39x32xf32>
      %c0_i32_16 = arith.constant 0 : i32
      %17 = arith.addi %arg5, %c0_i32_16 : i32
      %c0_17 = arith.constant 0 : index
      %18 = arith.index_cast %17 : i32 to index
      %c1_18 = arith.constant 1 : index
      %c0_19 = arith.constant 0 : index
      %19 = vector.load %arg1[%c0_17, %18, %c1_18, %c0_19] : memref<1x30x40x48xf32, #tpu.memory_space<vmem>>, vector<1x1x39x48xf32>
      %20 = vector.shape_cast %19 : vector<1x1x39x48xf32> to vector<39x48xf32>
      %cst_20 = arith.constant dense<0.000000e+00> : vector<39x32xf32>
      %21 = tpu.matmul %20, %3, %cst_20 {dimension_numbers = #tpu.dot_dimension_numbers<[1], [0], [0], [1], [0, 0, 1, 1], [], []>} : vector<39x48xf32>, vector<48x32xf32>, vector<39x32xf32> -> vector<39x32xf32>
      %22 = arith.addf %16, %21 : vector<39x32xf32>
      %c1_i32_21 = arith.constant 1 : i32
      %23 = arith.addi %arg5, %c1_i32_21 : i32
      %c0_22 = arith.constant 0 : index
      %24 = arith.index_cast %23 : i32 to index
      %c0_23 = arith.constant 0 : index
      %c0_24 = arith.constant 0 : index
      %25 = vector.load %arg1[%c0_22, %24, %c0_23, %c0_24] : memref<1x30x40x48xf32, #tpu.memory_space<vmem>>, vector<1x1x39x48xf32>
      %26 = vector.shape_cast %25 : vector<1x1x39x48xf32> to vector<39x48xf32>
      %cst_25 = arith.constant dense<0.000000e+00> : vector<39x32xf32>
      %27 = tpu.matmul %26, %5, %cst_25 {dimension_numbers = #tpu.dot_dimension_numbers<[1], [0], [0], [1], [0, 0, 1, 1], [], []>} : vector<39x48xf32>, vector<48x32xf32>, vector<39x32xf32> -> vector<39x32xf32>
      %28 = arith.addf %22, %27 : vector<39x32xf32>
      %c1_i32_26 = arith.constant 1 : i32
      %29 = arith.addi %arg5, %c1_i32_26 : i32
      %c0_27 = arith.constant 0 : index
      %30 = arith.index_cast %29 : i32 to index
      %c1_28 = arith.constant 1 : index
      %c0_29 = arith.constant 0 : index
      %31 = vector.load %arg1[%c0_27, %30, %c1_28, %c0_29] : memref<1x30x40x48xf32, #tpu.memory_space<vmem>>, vector<1x1x39x48xf32>
      %32 = vector.shape_cast %31 : vector<1x1x39x48xf32> to vector<39x48xf32>
      %cst_30 = arith.constant dense<0.000000e+00> : vector<39x32xf32>
      %33 = tpu.matmul %32, %7, %cst_30 {dimension_numbers = #tpu.dot_dimension_numbers<[1], [0], [0], [1], [0, 0, 1, 1], [], []>} : vector<39x48xf32>, vector<48x32xf32>, vector<39x32xf32> -> vector<39x32xf32>
      %34 = arith.addf %28, %33 : vector<39x32xf32>
      %35 = vector.broadcast %8 : vector<1x32xf32> to vector<39x32xf32>
      %36 = arith.addf %34, %35 : vector<39x32xf32>
      %cst_31 = arith.constant 0.000000e+00 : f32
      %37 = vector.broadcast %cst_31 : f32 to vector<39x32xf32>
      %38 = arith.maximumf %36, %37 : vector<39x32xf32>
      %c0_32 = arith.constant 0 : index
      %39 = arith.index_cast %arg5 : i32 to index
      %c0_33 = arith.constant 0 : index
      %c0_34 = arith.constant 0 : index
      %40 = vector.load %arg4[%c0_32, %39, %c0_33, %c0_34] : memref<1x29x39x32xf32, #tpu.memory_space<vmem>>, vector<1x1x39x32xf32>
      %41 = vector.shape_cast %40 : vector<1x1x39x32xf32> to vector<39x32xf32>
      %42 = vector.shape_cast %38 : vector<39x32xf32> to vector<1x1x39x32xf32>
      tpu.vector_store %arg4[%c0_32, %39, %c0_33, %c0_34], %42 {strides = array<i32>} : memref<1x29x39x32xf32, #tpu.memory_space<vmem>>, vector<1x1x39x32xf32>,
    }
    %c29_i32_10 = arith.constant 29 : i32
    return
  }
  func.func @transform_0(%arg0: i32) -> (i32, i32, i32, i32) {
    %c0_i32 = arith.constant 0 : i32
    %c0_i32_0 = arith.constant 0 : i32
    %c0_i32_1 = arith.constant 0 : i32
    %c0_i32_2 = arith.constant 0 : i32
    return %arg0, %c0_i32, %c0_i32_0, %c0_i32_1 : i32, i32, i32, i32
  }
  func.func @transform_1(%arg0: i32) -> (i32, i32, i32) {
    %c0_i32 = arith.constant 0 : i32
    %c0_i32_0 = arith.constant 0 : i32
    %c0_i32_1 = arith.constant 0 : i32
    %c0_i32_2 = arith.constant 0 : i32
    return %c0_i32, %c0_i32_0, %c0_i32_1 : i32, i32, i32
  }
  func.func @transform_2(%arg0: i32) -> (i32, i32) {
    %c0_i32 = arith.constant 0 : i32
    %c0_i32_0 = arith.constant 0 : i32
    %c0_i32_1 = arith.constant 0 : i32
    return %c0_i32, %c0_i32_0 : i32, i32
  }
  func.func @transform_3(%arg0: i32) -> (i32, i32, i32, i32) {
    %c0_i32 = arith.constant 0 : i32
    %c0_i32_0 = arith.constant 0 : i32
    %c0_i32_1 = arith.constant 0 : i32
    %c0_i32_2 = arith.constant 0 : i32
    return %arg0, %c0_i32, %c0_i32_0, %c0_i32_1 : i32, i32, i32, i32
  }
}

module attributes {stable_mosaic.version = 11 : i64} {
  func.func @_conv_rows_kernel(%arg0: i32, %arg1: memref<1x14x19x128xf32, #tpu.memory_space<vmem>>, %arg2: memref<4x128x64xf32, #tpu.memory_space<vmem>>, %arg3: memref<1x64xf32, #tpu.memory_space<vmem>>, %arg4: memref<1x13x18x64xf32, #tpu.memory_space<vmem>>) attributes {dimension_semantics = [#tpu.dimension_semantics<parallel>], iteration_bounds = array<i64: 2>, scalar_prefetch = 0 : i64, scratch_operands = 0 : i64, tpu.core_type = #tpu.core_type<tc>, window_params = [{transform_indices = @transform_0, window_bounds = array<i64: 1, 14, 19, 128>}, {pipeline_mode = #tpu.pipeline_mode<synchronous>, transform_indices = @transform_1, window_bounds = array<i64: 4, 128, 64>}, {pipeline_mode = #tpu.pipeline_mode<synchronous>, transform_indices = @transform_2, window_bounds = array<i64: 1, 64>}, {transform_indices = @transform_3, window_bounds = array<i64: 1, 13, 18, 64>}]} {
    %c0 = arith.constant 0 : index
    %c0_0 = arith.constant 0 : index
    %c0_1 = arith.constant 0 : index
    %0 = vector.load %arg2[%c0, %c0_0, %c0_1] : memref<4x128x64xf32, #tpu.memory_space<vmem>>, vector<1x128x64xf32>
    %1 = vector.shape_cast %0 : vector<1x128x64xf32> to vector<128x64xf32>
    %c1 = arith.constant 1 : index
    %c0_2 = arith.constant 0 : index
    %c0_3 = arith.constant 0 : index
    %2 = vector.load %arg2[%c1, %c0_2, %c0_3] : memref<4x128x64xf32, #tpu.memory_space<vmem>>, vector<1x128x64xf32>
    %3 = vector.shape_cast %2 : vector<1x128x64xf32> to vector<128x64xf32>
    %c2 = arith.constant 2 : index
    %c0_4 = arith.constant 0 : index
    %c0_5 = arith.constant 0 : index
    %4 = vector.load %arg2[%c2, %c0_4, %c0_5] : memref<4x128x64xf32, #tpu.memory_space<vmem>>, vector<1x128x64xf32>
    %5 = vector.shape_cast %4 : vector<1x128x64xf32> to vector<128x64xf32>
    %c3 = arith.constant 3 : index
    %c0_6 = arith.constant 0 : index
    %c0_7 = arith.constant 0 : index
    %6 = vector.load %arg2[%c3, %c0_6, %c0_7] : memref<4x128x64xf32, #tpu.memory_space<vmem>>, vector<1x128x64xf32>
    %7 = vector.shape_cast %6 : vector<1x128x64xf32> to vector<128x64xf32>
    %c0_8 = arith.constant 0 : index
    %c0_9 = arith.constant 0 : index
    %8 = vector.load %arg3[%c0_8, %c0_9] : memref<1x64xf32, #tpu.memory_space<vmem>>, vector<1x64xf32>
    %c0_i32 = arith.constant 0 : i32
    %c13_i32 = arith.constant 13 : i32
    %9 = arith.addi %c0_i32, %c13_i32 : i32
    %c1_i32 = arith.constant 1 : i32
    scf.for %arg5 = %c0_i32 to %9 step %c1_i32  : i32 {
      %cst = arith.constant 0.000000e+00 : f32
      %10 = vector.broadcast %cst : f32 to vector<18x64xf32>
      %c0_i32_11 = arith.constant 0 : i32
      %11 = arith.addi %arg5, %c0_i32_11 : i32
      %c0_12 = arith.constant 0 : index
      %12 = arith.index_cast %11 : i32 to index
      %c0_13 = arith.constant 0 : index
      %c0_14 = arith.constant 0 : index
      %13 = vector.load %arg1[%c0_12, %12, %c0_13, %c0_14] : memref<1x14x19x128xf32, #tpu.memory_space<vmem>>, vector<1x1x18x128xf32>
      %14 = vector.shape_cast %13 : vector<1x1x18x128xf32> to vector<18x128xf32>
      %cst_15 = arith.constant dense<0.000000e+00> : vector<18x64xf32>
      %15 = tpu.matmul %14, %1, %cst_15 {dimension_numbers = #tpu.dot_dimension_numbers<[1], [0], [0], [1], [0, 0, 1, 1], [], []>} : vector<18x128xf32>, vector<128x64xf32>, vector<18x64xf32> -> vector<18x64xf32>
      %16 = arith.addf %10, %15 : vector<18x64xf32>
      %c0_i32_16 = arith.constant 0 : i32
      %17 = arith.addi %arg5, %c0_i32_16 : i32
      %c0_17 = arith.constant 0 : index
      %18 = arith.index_cast %17 : i32 to index
      %c1_18 = arith.constant 1 : index
      %c0_19 = arith.constant 0 : index
      %19 = vector.load %arg1[%c0_17, %18, %c1_18, %c0_19] : memref<1x14x19x128xf32, #tpu.memory_space<vmem>>, vector<1x1x18x128xf32>
      %20 = vector.shape_cast %19 : vector<1x1x18x128xf32> to vector<18x128xf32>
      %cst_20 = arith.constant dense<0.000000e+00> : vector<18x64xf32>
      %21 = tpu.matmul %20, %3, %cst_20 {dimension_numbers = #tpu.dot_dimension_numbers<[1], [0], [0], [1], [0, 0, 1, 1], [], []>} : vector<18x128xf32>, vector<128x64xf32>, vector<18x64xf32> -> vector<18x64xf32>
      %22 = arith.addf %16, %21 : vector<18x64xf32>
      %c1_i32_21 = arith.constant 1 : i32
      %23 = arith.addi %arg5, %c1_i32_21 : i32
      %c0_22 = arith.constant 0 : index
      %24 = arith.index_cast %23 : i32 to index
      %c0_23 = arith.constant 0 : index
      %c0_24 = arith.constant 0 : index
      %25 = vector.load %arg1[%c0_22, %24, %c0_23, %c0_24] : memref<1x14x19x128xf32, #tpu.memory_space<vmem>>, vector<1x1x18x128xf32>
      %26 = vector.shape_cast %25 : vector<1x1x18x128xf32> to vector<18x128xf32>
      %cst_25 = arith.constant dense<0.000000e+00> : vector<18x64xf32>
      %27 = tpu.matmul %26, %5, %cst_25 {dimension_numbers = #tpu.dot_dimension_numbers<[1], [0], [0], [1], [0, 0, 1, 1], [], []>} : vector<18x128xf32>, vector<128x64xf32>, vector<18x64xf32> -> vector<18x64xf32>
      %28 = arith.addf %22, %27 : vector<18x64xf32>
      %c1_i32_26 = arith.constant 1 : i32
      %29 = arith.addi %arg5, %c1_i32_26 : i32
      %c0_27 = arith.constant 0 : index
      %30 = arith.index_cast %29 : i32 to index
      %c1_28 = arith.constant 1 : index
      %c0_29 = arith.constant 0 : index
      %31 = vector.load %arg1[%c0_27, %30, %c1_28, %c0_29] : memref<1x14x19x128xf32, #tpu.memory_space<vmem>>, vector<1x1x18x128xf32>
      %32 = vector.shape_cast %31 : vector<1x1x18x128xf32> to vector<18x128xf32>
      %cst_30 = arith.constant dense<0.000000e+00> : vector<18x64xf32>
      %33 = tpu.matmul %32, %7, %cst_30 {dimension_numbers = #tpu.dot_dimension_numbers<[1], [0], [0], [1], [0, 0, 1, 1], [], []>} : vector<18x128xf32>, vector<128x64xf32>, vector<18x64xf32> -> vector<18x64xf32>
      %34 = arith.addf %28, %33 : vector<18x64xf32>
      %35 = vector.broadcast %8 : vector<1x64xf32> to vector<18x64xf32>
      %36 = arith.addf %34, %35 : vector<18x64xf32>
      %cst_31 = arith.constant 0.000000e+00 : f32
      %37 = vector.broadcast %cst_31 : f32 to vector<18x64xf32>
      %38 = arith.maximumf %36, %37 : vector<18x64xf32>
      %c0_32 = arith.constant 0 : index
      %39 = arith.index_cast %arg5 : i32 to index
      %c0_33 = arith.constant 0 : index
      %c0_34 = arith.constant 0 : index
      %40 = vector.load %arg4[%c0_32, %39, %c0_33, %c0_34] : memref<1x13x18x64xf32, #tpu.memory_space<vmem>>, vector<1x1x18x64xf32>
      %41 = vector.shape_cast %40 : vector<1x1x18x64xf32> to vector<18x64xf32>
      %42 = vector.shape_cast %38 : vector<18x64xf32> to vector<1x1x18x64xf32>
      tpu.vector_store %arg4[%c0_32, %39, %c0_33, %c0_34], %42 {strides = array<i32>} : memref<1x13x18x64xf32, #tpu.memory_space<vmem>>, vector<1x1x18x64xf32>,
    }
    %c13_i32_10 = arith.constant 13 : i32
    return
  }
  func.func @transform_0(%arg0: i32) -> (i32, i32, i32, i32) {
    %c0_i32 = arith.constant 0 : i32
    %c0_i32_0 = arith.constant 0 : i32
    %c0_i32_1 = arith.constant 0 : i32
    %c0_i32_2 = arith.constant 0 : i32
    return %arg0, %c0_i32, %c0_i32_0, %c0_i32_1 : i32, i32, i32, i32
  }
  func.func @transform_1(%arg0: i32) -> (i32, i32, i32) {
    %c0_i32 = arith.constant 0 : i32
    %c0_i32_0 = arith.constant 0 : i32
    %c0_i32_1 = arith.constant 0 : i32
    %c0_i32_2 = arith.constant 0 : i32
    return %c0_i32, %c0_i32_0, %c0_i32_1 : i32, i32, i32
  }
  func.func @transform_2(%arg0: i32) -> (i32, i32) {
    %c0_i32 = arith.constant 0 : i32
    %c0_i32_0 = arith.constant 0 : i32
    %c0_i32_1 = arith.constant 0 : i32
    return %c0_i32, %c0_i32_0 : i32, i32
  }
  func.func @transform_3(%arg0: i32) -> (i32, i32, i32, i32) {
    %c0_i32 = arith.constant 0 : i32
    %c0_i32_0 = arith.constant 0 : i32
    %c0_i32_1 = arith.constant 0 : i32
    %c0_i32_2 = arith.constant 0 : i32
    return %arg0, %c0_i32, %c0_i32_0, %c0_i32_1 : i32, i32, i32, i32
  }
}

module attributes {stable_mosaic.version = 11 : i64} {
  func.func @_conv_rows_kernel(%arg0: i32, %arg1: memref<1x13x18x64xf32, #tpu.memory_space<vmem>>, %arg2: memref<9x64x64xf32, #tpu.memory_space<vmem>>, %arg3: memref<1x64xf32, #tpu.memory_space<vmem>>, %arg4: memref<1x11x16x64xf32, #tpu.memory_space<vmem>>) attributes {dimension_semantics = [#tpu.dimension_semantics<parallel>], iteration_bounds = array<i64: 2>, scalar_prefetch = 0 : i64, scratch_operands = 0 : i64, tpu.core_type = #tpu.core_type<tc>, window_params = [{transform_indices = @transform_0, window_bounds = array<i64: 1, 13, 18, 64>}, {pipeline_mode = #tpu.pipeline_mode<synchronous>, transform_indices = @transform_1, window_bounds = array<i64: 9, 64, 64>}, {pipeline_mode = #tpu.pipeline_mode<synchronous>, transform_indices = @transform_2, window_bounds = array<i64: 1, 64>}, {transform_indices = @transform_3, window_bounds = array<i64: 1, 11, 16, 64>}]} {
    %c0 = arith.constant 0 : index
    %c0_0 = arith.constant 0 : index
    %c0_1 = arith.constant 0 : index
    %0 = vector.load %arg2[%c0, %c0_0, %c0_1] : memref<9x64x64xf32, #tpu.memory_space<vmem>>, vector<1x64x64xf32>
    %1 = vector.shape_cast %0 : vector<1x64x64xf32> to vector<64x64xf32>
    %c1 = arith.constant 1 : index
    %c0_2 = arith.constant 0 : index
    %c0_3 = arith.constant 0 : index
    %2 = vector.load %arg2[%c1, %c0_2, %c0_3] : memref<9x64x64xf32, #tpu.memory_space<vmem>>, vector<1x64x64xf32>
    %3 = vector.shape_cast %2 : vector<1x64x64xf32> to vector<64x64xf32>
    %c2 = arith.constant 2 : index
    %c0_4 = arith.constant 0 : index
    %c0_5 = arith.constant 0 : index
    %4 = vector.load %arg2[%c2, %c0_4, %c0_5] : memref<9x64x64xf32, #tpu.memory_space<vmem>>, vector<1x64x64xf32>
    %5 = vector.shape_cast %4 : vector<1x64x64xf32> to vector<64x64xf32>
    %c3 = arith.constant 3 : index
    %c0_6 = arith.constant 0 : index
    %c0_7 = arith.constant 0 : index
    %6 = vector.load %arg2[%c3, %c0_6, %c0_7] : memref<9x64x64xf32, #tpu.memory_space<vmem>>, vector<1x64x64xf32>
    %7 = vector.shape_cast %6 : vector<1x64x64xf32> to vector<64x64xf32>
    %c4 = arith.constant 4 : index
    %c0_8 = arith.constant 0 : index
    %c0_9 = arith.constant 0 : index
    %8 = vector.load %arg2[%c4, %c0_8, %c0_9] : memref<9x64x64xf32, #tpu.memory_space<vmem>>, vector<1x64x64xf32>
    %9 = vector.shape_cast %8 : vector<1x64x64xf32> to vector<64x64xf32>
    %c5 = arith.constant 5 : index
    %c0_10 = arith.constant 0 : index
    %c0_11 = arith.constant 0 : index
    %10 = vector.load %arg2[%c5, %c0_10, %c0_11] : memref<9x64x64xf32, #tpu.memory_space<vmem>>, vector<1x64x64xf32>
    %11 = vector.shape_cast %10 : vector<1x64x64xf32> to vector<64x64xf32>
    %c6 = arith.constant 6 : index
    %c0_12 = arith.constant 0 : index
    %c0_13 = arith.constant 0 : index
    %12 = vector.load %arg2[%c6, %c0_12, %c0_13] : memref<9x64x64xf32, #tpu.memory_space<vmem>>, vector<1x64x64xf32>
    %13 = vector.shape_cast %12 : vector<1x64x64xf32> to vector<64x64xf32>
    %c7 = arith.constant 7 : index
    %c0_14 = arith.constant 0 : index
    %c0_15 = arith.constant 0 : index
    %14 = vector.load %arg2[%c7, %c0_14, %c0_15] : memref<9x64x64xf32, #tpu.memory_space<vmem>>, vector<1x64x64xf32>
    %15 = vector.shape_cast %14 : vector<1x64x64xf32> to vector<64x64xf32>
    %c8 = arith.constant 8 : index
    %c0_16 = arith.constant 0 : index
    %c0_17 = arith.constant 0 : index
    %16 = vector.load %arg2[%c8, %c0_16, %c0_17] : memref<9x64x64xf32, #tpu.memory_space<vmem>>, vector<1x64x64xf32>
    %17 = vector.shape_cast %16 : vector<1x64x64xf32> to vector<64x64xf32>
    %c0_18 = arith.constant 0 : index
    %c0_19 = arith.constant 0 : index
    %18 = vector.load %arg3[%c0_18, %c0_19] : memref<1x64xf32, #tpu.memory_space<vmem>>, vector<1x64xf32>
    %c0_i32 = arith.constant 0 : i32
    %c11_i32 = arith.constant 11 : i32
    %19 = arith.addi %c0_i32, %c11_i32 : i32
    %c1_i32 = arith.constant 1 : i32
    scf.for %arg5 = %c0_i32 to %19 step %c1_i32  : i32 {
      %cst = arith.constant 0.000000e+00 : f32
      %20 = vector.broadcast %cst : f32 to vector<16x64xf32>
      %c0_i32_21 = arith.constant 0 : i32
      %21 = arith.addi %arg5, %c0_i32_21 : i32
      %c0_22 = arith.constant 0 : index
      %22 = arith.index_cast %21 : i32 to index
      %c0_23 = arith.constant 0 : index
      %c0_24 = arith.constant 0 : index
      %23 = vector.load %arg1[%c0_22, %22, %c0_23, %c0_24] : memref<1x13x18x64xf32, #tpu.memory_space<vmem>>, vector<1x1x16x64xf32>
      %24 = vector.shape_cast %23 : vector<1x1x16x64xf32> to vector<16x64xf32>
      %cst_25 = arith.constant dense<0.000000e+00> : vector<16x64xf32>
      %25 = tpu.matmul %24, %1, %cst_25 {dimension_numbers = #tpu.dot_dimension_numbers<[1], [0], [0], [1], [0, 0, 1, 1], [], []>} : vector<16x64xf32>, vector<64x64xf32>, vector<16x64xf32> -> vector<16x64xf32>
      %26 = arith.addf %20, %25 : vector<16x64xf32>
      %c0_i32_26 = arith.constant 0 : i32
      %27 = arith.addi %arg5, %c0_i32_26 : i32
      %c0_27 = arith.constant 0 : index
      %28 = arith.index_cast %27 : i32 to index
      %c1_28 = arith.constant 1 : index
      %c0_29 = arith.constant 0 : index
      %29 = vector.load %arg1[%c0_27, %28, %c1_28, %c0_29] : memref<1x13x18x64xf32, #tpu.memory_space<vmem>>, vector<1x1x16x64xf32>
      %30 = vector.shape_cast %29 : vector<1x1x16x64xf32> to vector<16x64xf32>
      %cst_30 = arith.constant dense<0.000000e+00> : vector<16x64xf32>
      %31 = tpu.matmul %30, %3, %cst_30 {dimension_numbers = #tpu.dot_dimension_numbers<[1], [0], [0], [1], [0, 0, 1, 1], [], []>} : vector<16x64xf32>, vector<64x64xf32>, vector<16x64xf32> -> vector<16x64xf32>
      %32 = arith.addf %26, %31 : vector<16x64xf32>
      %c0_i32_31 = arith.constant 0 : i32
      %33 = arith.addi %arg5, %c0_i32_31 : i32
      %c0_32 = arith.constant 0 : index
      %34 = arith.index_cast %33 : i32 to index
      %c2_33 = arith.constant 2 : index
      %c0_34 = arith.constant 0 : index
      %35 = vector.load %arg1[%c0_32, %34, %c2_33, %c0_34] : memref<1x13x18x64xf32, #tpu.memory_space<vmem>>, vector<1x1x16x64xf32>
      %36 = vector.shape_cast %35 : vector<1x1x16x64xf32> to vector<16x64xf32>
      %cst_35 = arith.constant dense<0.000000e+00> : vector<16x64xf32>
      %37 = tpu.matmul %36, %5, %cst_35 {dimension_numbers = #tpu.dot_dimension_numbers<[1], [0], [0], [1], [0, 0, 1, 1], [], []>} : vector<16x64xf32>, vector<64x64xf32>, vector<16x64xf32> -> vector<16x64xf32>
      %38 = arith.addf %32, %37 : vector<16x64xf32>
      %c1_i32_36 = arith.constant 1 : i32
      %39 = arith.addi %arg5, %c1_i32_36 : i32
      %c0_37 = arith.constant 0 : index
      %40 = arith.index_cast %39 : i32 to index
      %c0_38 = arith.constant 0 : index
      %c0_39 = arith.constant 0 : index
      %41 = vector.load %arg1[%c0_37, %40, %c0_38, %c0_39] : memref<1x13x18x64xf32, #tpu.memory_space<vmem>>, vector<1x1x16x64xf32>
      %42 = vector.shape_cast %41 : vector<1x1x16x64xf32> to vector<16x64xf32>
      %cst_40 = arith.constant dense<0.000000e+00> : vector<16x64xf32>
      %43 = tpu.matmul %42, %7, %cst_40 {dimension_numbers = #tpu.dot_dimension_numbers<[1], [0], [0], [1], [0, 0, 1, 1], [], []>} : vector<16x64xf32>, vector<64x64xf32>, vector<16x64xf32> -> vector<16x64xf32>
      %44 = arith.addf %38, %43 : vector<16x64xf32>
      %c1_i32_41 = arith.constant 1 : i32
      %45 = arith.addi %arg5, %c1_i32_41 : i32
      %c0_42 = arith.constant 0 : index
      %46 = arith.index_cast %45 : i32 to index
      %c1_43 = arith.constant 1 : index
      %c0_44 = arith.constant 0 : index
      %47 = vector.load %arg1[%c0_42, %46, %c1_43, %c0_44] : memref<1x13x18x64xf32, #tpu.memory_space<vmem>>, vector<1x1x16x64xf32>
      %48 = vector.shape_cast %47 : vector<1x1x16x64xf32> to vector<16x64xf32>
      %cst_45 = arith.constant dense<0.000000e+00> : vector<16x64xf32>
      %49 = tpu.matmul %48, %9, %cst_45 {dimension_numbers = #tpu.dot_dimension_numbers<[1], [0], [0], [1], [0, 0, 1, 1], [], []>} : vector<16x64xf32>, vector<64x64xf32>, vector<16x64xf32> -> vector<16x64xf32>
      %50 = arith.addf %44, %49 : vector<16x64xf32>
      %c1_i32_46 = arith.constant 1 : i32
      %51 = arith.addi %arg5, %c1_i32_46 : i32
      %c0_47 = arith.constant 0 : index
      %52 = arith.index_cast %51 : i32 to index
      %c2_48 = arith.constant 2 : index
      %c0_49 = arith.constant 0 : index
      %53 = vector.load %arg1[%c0_47, %52, %c2_48, %c0_49] : memref<1x13x18x64xf32, #tpu.memory_space<vmem>>, vector<1x1x16x64xf32>
      %54 = vector.shape_cast %53 : vector<1x1x16x64xf32> to vector<16x64xf32>
      %cst_50 = arith.constant dense<0.000000e+00> : vector<16x64xf32>
      %55 = tpu.matmul %54, %11, %cst_50 {dimension_numbers = #tpu.dot_dimension_numbers<[1], [0], [0], [1], [0, 0, 1, 1], [], []>} : vector<16x64xf32>, vector<64x64xf32>, vector<16x64xf32> -> vector<16x64xf32>
      %56 = arith.addf %50, %55 : vector<16x64xf32>
      %c2_i32 = arith.constant 2 : i32
      %57 = arith.addi %arg5, %c2_i32 : i32
      %c0_51 = arith.constant 0 : index
      %58 = arith.index_cast %57 : i32 to index
      %c0_52 = arith.constant 0 : index
      %c0_53 = arith.constant 0 : index
      %59 = vector.load %arg1[%c0_51, %58, %c0_52, %c0_53] : memref<1x13x18x64xf32, #tpu.memory_space<vmem>>, vector<1x1x16x64xf32>
      %60 = vector.shape_cast %59 : vector<1x1x16x64xf32> to vector<16x64xf32>
      %cst_54 = arith.constant dense<0.000000e+00> : vector<16x64xf32>
      %61 = tpu.matmul %60, %13, %cst_54 {dimension_numbers = #tpu.dot_dimension_numbers<[1], [0], [0], [1], [0, 0, 1, 1], [], []>} : vector<16x64xf32>, vector<64x64xf32>, vector<16x64xf32> -> vector<16x64xf32>
      %62 = arith.addf %56, %61 : vector<16x64xf32>
      %c2_i32_55 = arith.constant 2 : i32
      %63 = arith.addi %arg5, %c2_i32_55 : i32
      %c0_56 = arith.constant 0 : index
      %64 = arith.index_cast %63 : i32 to index
      %c1_57 = arith.constant 1 : index
      %c0_58 = arith.constant 0 : index
      %65 = vector.load %arg1[%c0_56, %64, %c1_57, %c0_58] : memref<1x13x18x64xf32, #tpu.memory_space<vmem>>, vector<1x1x16x64xf32>
      %66 = vector.shape_cast %65 : vector<1x1x16x64xf32> to vector<16x64xf32>
      %cst_59 = arith.constant dense<0.000000e+00> : vector<16x64xf32>
      %67 = tpu.matmul %66, %15, %cst_59 {dimension_numbers = #tpu.dot_dimension_numbers<[1], [0], [0], [1], [0, 0, 1, 1], [], []>} : vector<16x64xf32>, vector<64x64xf32>, vector<16x64xf32> -> vector<16x64xf32>
      %68 = arith.addf %62, %67 : vector<16x64xf32>
      %c2_i32_60 = arith.constant 2 : i32
      %69 = arith.addi %arg5, %c2_i32_60 : i32
      %c0_61 = arith.constant 0 : index
      %70 = arith.index_cast %69 : i32 to index
      %c2_62 = arith.constant 2 : index
      %c0_63 = arith.constant 0 : index
      %71 = vector.load %arg1[%c0_61, %70, %c2_62, %c0_63] : memref<1x13x18x64xf32, #tpu.memory_space<vmem>>, vector<1x1x16x64xf32>
      %72 = vector.shape_cast %71 : vector<1x1x16x64xf32> to vector<16x64xf32>
      %cst_64 = arith.constant dense<0.000000e+00> : vector<16x64xf32>
      %73 = tpu.matmul %72, %17, %cst_64 {dimension_numbers = #tpu.dot_dimension_numbers<[1], [0], [0], [1], [0, 0, 1, 1], [], []>} : vector<16x64xf32>, vector<64x64xf32>, vector<16x64xf32> -> vector<16x64xf32>
      %74 = arith.addf %68, %73 : vector<16x64xf32>
      %75 = vector.broadcast %18 : vector<1x64xf32> to vector<16x64xf32>
      %76 = arith.addf %74, %75 : vector<16x64xf32>
      %cst_65 = arith.constant 0.000000e+00 : f32
      %77 = vector.broadcast %cst_65 : f32 to vector<16x64xf32>
      %78 = arith.maximumf %76, %77 : vector<16x64xf32>
      %c0_66 = arith.constant 0 : index
      %79 = arith.index_cast %arg5 : i32 to index
      %c0_67 = arith.constant 0 : index
      %c0_68 = arith.constant 0 : index
      %80 = vector.load %arg4[%c0_66, %79, %c0_67, %c0_68] : memref<1x11x16x64xf32, #tpu.memory_space<vmem>>, vector<1x1x16x64xf32>
      %81 = vector.shape_cast %80 : vector<1x1x16x64xf32> to vector<16x64xf32>
      %82 = vector.shape_cast %78 : vector<16x64xf32> to vector<1x1x16x64xf32>
      tpu.vector_store %arg4[%c0_66, %79, %c0_67, %c0_68], %82 {strides = array<i32>} : memref<1x11x16x64xf32, #tpu.memory_space<vmem>>, vector<1x1x16x64xf32>,
    }
    %c11_i32_20 = arith.constant 11 : i32
    return
  }
  func.func @transform_0(%arg0: i32) -> (i32, i32, i32, i32) {
    %c0_i32 = arith.constant 0 : i32
    %c0_i32_0 = arith.constant 0 : i32
    %c0_i32_1 = arith.constant 0 : i32
    %c0_i32_2 = arith.constant 0 : i32
    return %arg0, %c0_i32, %c0_i32_0, %c0_i32_1 : i32, i32, i32, i32
  }
  func.func @transform_1(%arg0: i32) -> (i32, i32, i32) {
    %c0_i32 = arith.constant 0 : i32
    %c0_i32_0 = arith.constant 0 : i32
    %c0_i32_1 = arith.constant 0 : i32
    %c0_i32_2 = arith.constant 0 : i32
    return %c0_i32, %c0_i32_0, %c0_i32_1 : i32, i32, i32
  }
  func.func @transform_2(%arg0: i32) -> (i32, i32) {
    %c0_i32 = arith.constant 0 : i32
    %c0_i32_0 = arith.constant 0 : i32
    %c0_i32_1 = arith.constant 0 : i32
    return %c0_i32, %c0_i32_0 : i32, i32
  }
  func.func @transform_3(%arg0: i32) -> (i32, i32, i32, i32) {
    %c0_i32 = arith.constant 0 : i32
    %c0_i32_0 = arith.constant 0 : i32
    %c0_i32_1 = arith.constant 0 : i32
    %c0_i32_2 = arith.constant 0 : i32
    return %arg0, %c0_i32, %c0_i32_0, %c0_i32_1 : i32, i32, i32, i32
  }
}

module attributes {stable_mosaic.version = 11 : i64} {
  func.func @_matmul_bias_relu_kernel(%arg0: i32, %arg1: i32, %arg2: memref<2x512xf32, #tpu.memory_space<vmem>>, %arg3: memref<512x256xf32, #tpu.memory_space<vmem>>, %arg4: memref<1x256xf32, #tpu.memory_space<vmem>>, %arg5: memref<2x256xf32, #tpu.memory_space<vmem>>, %arg6: memref<2x256xf32, #tpu.memory_space<vmem>>) attributes {dimension_semantics = [#tpu.dimension_semantics<parallel>, #tpu.dimension_semantics<arbitrary>], iteration_bounds = array<i64: 2, 22>, scalar_prefetch = 0 : i64, scratch_operands = 1 : i64, tpu.core_type = #tpu.core_type<tc>, window_params = [{transform_indices = @transform_0, window_bounds = array<i64: 2, 512>}, {transform_indices = @transform_1, window_bounds = array<i64: 512, 256>}, {transform_indices = @transform_2, window_bounds = array<i64: 1, 256>}, {transform_indices = @transform_3, window_bounds = array<i64: 2, 256>}]} {
    %c0_i32 = arith.constant 0 : i32
    %0 = arith.cmpi eq, %arg1, %c0_i32 : i32
    %1 = arith.extui %0 : i1 to i32
    %c0_i32_0 = arith.constant 0 : i32
    %2 = arith.cmpi ne, %1, %c0_i32_0 : i32
    scf.if %2 {
      %cst_9 = arith.constant 0.000000e+00 : f32
      %12 = vector.broadcast %cst_9 : f32 to vector<2x256xf32>
      %c0_10 = arith.constant 0 : index
      %c0_11 = arith.constant 0 : index
      %13 = vector.load %arg6[%c0_10, %c0_11] : memref<2x256xf32, #tpu.memory_space<vmem>>, vector<2x256xf32>
      tpu.vector_store %arg6[%c0_10, %c0_11], %12 {strides = array<i32>} : memref<2x256xf32, #tpu.memory_space<vmem>>, vector<2x256xf32>,
    } else {
    }
    %c0 = arith.constant 0 : index
    %c0_1 = arith.constant 0 : index
    %3 = vector.load %arg6[%c0, %c0_1] : memref<2x256xf32, #tpu.memory_space<vmem>>, vector<2x256xf32>
    %c0_2 = arith.constant 0 : index
    %c0_3 = arith.constant 0 : index
    %4 = vector.load %arg2[%c0_2, %c0_3] : memref<2x512xf32, #tpu.memory_space<vmem>>, vector<2x512xf32>
    %c0_4 = arith.constant 0 : index
    %c0_5 = arith.constant 0 : index
    %5 = vector.load %arg3[%c0_4, %c0_5] : memref<512x256xf32, #tpu.memory_space<vmem>>, vector<512x256xf32>
    %cst = arith.constant dense<0.000000e+00> : vector<2x256xf32>
    %6 = tpu.matmul %4, %5, %cst {dimension_numbers = #tpu.dot_dimension_numbers<[1], [0], [0], [1], [0, 0, 1, 1], [], []>} : vector<2x512xf32>, vector<512x256xf32>, vector<2x256xf32> -> vector<2x256xf32>
    %7 = arith.addf %3, %6 : vector<2x256xf32>
    %c0_6 = arith.constant 0 : index
    %c0_7 = arith.constant 0 : index
    %8 = vector.load %arg6[%c0_6, %c0_7] : memref<2x256xf32, #tpu.memory_space<vmem>>, vector<2x256xf32>
    tpu.vector_store %arg6[%c0_6, %c0_7], %7 {strides = array<i32>} : memref<2x256xf32, #tpu.memory_space<vmem>>, vector<2x256xf32>,
    %c21_i32 = arith.constant 21 : i32
    %9 = arith.cmpi eq, %arg1, %c21_i32 : i32
    %10 = arith.extui %9 : i1 to i32
    %c0_i32_8 = arith.constant 0 : i32
    %11 = arith.cmpi ne, %10, %c0_i32_8 : i32
    scf.if %11 {
      %c0_9 = arith.constant 0 : index
      %c0_10 = arith.constant 0 : index
      %12 = vector.load %arg6[%c0_9, %c0_10] : memref<2x256xf32, #tpu.memory_space<vmem>>, vector<2x256xf32>
      %c0_11 = arith.constant 0 : index
      %c0_12 = arith.constant 0 : index
      %13 = vector.load %arg4[%c0_11, %c0_12] : memref<1x256xf32, #tpu.memory_space<vmem>>, vector<1x256xf32>
      %14 = vector.broadcast %13 : vector<1x256xf32> to vector<2x256xf32>
      %15 = arith.addf %12, %14 : vector<2x256xf32>
      %cst_13 = arith.constant 0.000000e+00 : f32
      %16 = vector.broadcast %cst_13 : f32 to vector<2x256xf32>
      %17 = arith.maximumf %15, %16 : vector<2x256xf32>
      %c0_14 = arith.constant 0 : index
      %c0_15 = arith.constant 0 : index
      %18 = vector.load %arg5[%c0_14, %c0_15] : memref<2x256xf32, #tpu.memory_space<vmem>>, vector<2x256xf32>
      tpu.vector_store %arg5[%c0_14, %c0_15], %17 {strides = array<i32>} : memref<2x256xf32, #tpu.memory_space<vmem>>, vector<2x256xf32>,
    } else {
    }
    return
  }
  func.func @transform_0(%arg0: i32, %arg1: i32) -> (i32, i32) {
    %c0_i32 = arith.constant 0 : i32
    %c0_i32_0 = arith.constant 0 : i32
    return %c0_i32, %arg1 : i32, i32
  }
  func.func @transform_1(%arg0: i32, %arg1: i32) -> (i32, i32) {
    %c0_i32 = arith.constant 0 : i32
    return %arg1, %arg0 : i32, i32
  }
  func.func @transform_2(%arg0: i32, %arg1: i32) -> (i32, i32) {
    %c0_i32 = arith.constant 0 : i32
    %c0_i32_0 = arith.constant 0 : i32
    return %c0_i32, %arg0 : i32, i32
  }
  func.func @transform_3(%arg0: i32, %arg1: i32) -> (i32, i32) {
    %c0_i32 = arith.constant 0 : i32
    %c0_i32_0 = arith.constant 0 : i32
    return %c0_i32, %arg0 : i32, i32
  }
}

</mosaic_0001>

<bundles_post_ra>
// kernel: nature_cnn_forward.4
= control target key start
LH: loop header
LB: loop body
LE: loop exit
PB: predicated region body
PF: predicated region fallthrough
CT: control target
= control target key end

     0   :  { %s1058_s12 = smov 0   ;;  %s1341_s0 = inlined_call_operand.vmem [shape: f32[2,30,40,48], index: 0, kind: input, shape index: {}]   ;;  %s1342_s1 = inlined_call_operand.vmem [shape: f32[4,48,32], index: 1, kind: input, shape index: {}]   ;;  %s1343_s2 = inlined_call_operand.vmem [shape: f32[1,32], index: 2, kind: input, shape index: {}]   ;;  %s1344_s3 = inlined_call_operand.vmem [shape: f32[2,29,39,32], index: 3, kind: output, shape index: {}]  }
   0x1 LB: > { %s752_s13 = sadd.s32 4294967295, %s1029_s12   ;;  %p756_p0 = scmp.ge.s32.totalorder %s1029_s12, 1  ;;  %s1029_s12 = sphi %s1058_s12, %s13_s12  }
   0x2   : > { %p137_p1 = scmp.lt.s32.totalorder %s1029_s12, 3 }
   0x4   : > { %p138_p2 = pnand %p756_p0, %p137_p1 }
   0x5   : > { %p161_p3 = scmp.lt.s32.totalorder (!%p138_p2), %s752_s13, 1  ;;  %v1069_v0 = vld [vmem:[%s1342_s1] sm:$0xff] (!%p138_p2)  ;;  %v1074_v1 = vld [vmem:[%s1342_s1 + $0x8] sm:$0xff] (!%p138_p2)  ;;  %v1079_v2 = vld [vmem:[%s1342_s1 + $0x10] sm:$0xff] (!%p138_p2) }
   0x6   : > { %141 = sbr.rel (%p138_p2) target bundleno = 288 (0x120), region = 32  ;;  %v1084_v3 = vld [vmem:[%s1342_s1 + $0x18] sm:$0xff] (!%p138_p2)  ;;  %v1089_v4 = vld [vmem:[%s1342_s1 + $0x20] sm:$0xff] (!%p138_p2)  ;;  %v1094_v5 = vld [vmem:[%s1342_s1 + $0x28] sm:$0xff] (!%p138_p2) }
   0x7   : > { %v1099_v6 = vld [vmem:[%s1342_s1 + $0x30] sm:$0xff] (!%p138_p2)  ;;  %v1104_v7 = vld [vmem:[%s1342_s1 + $0x38] sm:$0xff] (!%p138_p2)  ;;  %v1109_v8 = vld [vmem:[%s1342_s1 + $0x40] sm:$0xff] (!%p138_p2) }
   0x8   : > { %v1114_v9 = vld [vmem:[%s1342_s1 + $0x48] sm:$0xff] (!%p138_p2)  ;;  %v1119_v10 = vld [vmem:[%s1342_s1 + $0x50] sm:$0xff] (!%p138_p2)  ;;  %v1124_v11 = vld [vmem:[%s1342_s1 + $0x58] sm:$0xff] (!%p138_p2) }
   0x9   : > { %v1129_v12 = vld [vmem:[%s1342_s1 + $0x60] sm:$0xff] (!%p138_p2)  ;;  %v1134_v13 = vld [vmem:[%s1342_s1 + $0x68] sm:$0xff] (!%p138_p2)  ;;  %v1139_v14 = vld [vmem:[%s1342_s1 + $0x70] sm:$0xff] (!%p138_p2) }
   0xa   : > { %v1144_v15 = vld [vmem:[%s1342_s1 + $0x78] sm:$0xff] (!%p138_p2)  ;;  %v1149_v16 = vld [vmem:[%s1342_s1 + $0x80] sm:$0xff] (!%p138_p2)  ;;  %v1154_v17 = vld [vmem:[%s1342_s1 + $0x88] sm:$0xff] (!%p138_p2) }
   0xb   : > { %v1164_v18 = vld [vmem:[%s1342_s1 + $0x90] sm:$0xff] (!%p138_p2)  ;;  %v1169_v19 = vld [vmem:[%s1342_s1 + $0x98] sm:$0xff] (!%p138_p2)  ;;  %v1174_v20 = vld [vmem:[%s1342_s1 + $0xa0] sm:$0xff] (!%p138_p2) }
   0xc   : > { %v1184_v21 = vld [vmem:[%s1342_s1 + $0xa8] sm:$0xff] (!%p138_p2)  ;;  %v1189_v22 = vld [vmem:[%s1342_s1 + $0xb0] sm:$0xff] (!%p138_p2)  ;;  %v1194_v23 = vld [vmem:[%s1342_s1 + $0xb8] sm:$0xff] (!%p138_p2) }
   0xd   : > { %s1346_s13 = smov (!%p161_p3, %s752_s13), 1  ;;  %v1199_v24 = vld [vmem:[%s1343_s2] ss:$0 sm:$0xff] }
   0xe   : > { %s998_s11 = smul.u32 1200, %s1346_s13 }
   0xf   : > { %s999_s20 = smul.u32 1160, %s1346_s13 }
  0x10   : > { %s1159_s29 = scalar_lea.vmem %s1341_s0, %s998_s11 }
  0x11   : > { %s1179_s10 = scalar_lea.vmem %s1344_s3, %s999_s20  ;;  %s1201_s20 = smov 0  }
  0x12 LB: >> { %v963_v25 = vpack.c.bf16 %v1104_v7, %v1099_v6  ;;  %v972_v26 = vpack.c.bf16 %v1074_v1, %v1069_v0  ;;  %v1035_v27 = vmov 0.0|0.0   ;;  %v966_v28 = vpack.c.bf16 %v1114_v9, %v1109_v8  ;;  %s205_s22 = smul.u32 40, %s1033_s20  ;;  %s204_s20 = sadd.s32 1, %s1033_s20   ;;  %s1033_s20 = sphi %s1201_s20, %s204_s20  }
  0x13   : >> { %962 = vmatprep.subr.bf16.mxu0 %v1035_v27  ;;  %971 = vmatprep.subr.bf16.mxu1 %v1035_v27  ;;  %v975_v29 = vpack.c.bf16 %v1084_v3, %v1079_v2  ;;  %vm1036_vm0 = vmmov 0   ;;  %v1037_v30 = vmov 0.0   ;;  %v969_v31 = vpack.c.bf16 %v1124_v11, %v1119_v10  ;;  %p201_p4 = scmp.ge.s32.totalorder %s204_s20, 29  }
  0x14   : >> { %964 = vmatpush3.bf16.msra.mxu0 %v963_v25  ;;  %973 = vmatpush3.bf16.msra.mxu1 %v972_v26  ;;  %v978_v32 = vpack.c.bf16 %v1094_v5, %v1089_v4  ;;  %s1226_s23 = scalar_lea.vmem %s1159_s29, %s205_s22  ;;  %vm217_vm1 = vcmask 392192   ;;  %v981_v35 = vpack.c.bf16 %v1134_v13, %v1129_v12  ;;  %v990_v36 = vpack.c.bf16 %v1169_v19, %v1164_v18  ;;  %s1320_s24 = scalar_lea.vmem %s1179_s10, %s205_s22 }
  0x15   : >> { %965 = vmatprep.subr.bf16.mxu0 %v1035_v27  ;;  %974 = vmatprep.subr.bf16.mxu1 %v1035_v27  ;;  %v212_v33 = vld [vmem:[%s1226_s23 + $0x1] sm:$0xff]  ;;  %v213_v37 = vld [vmem:[%s1226_s23 + $0x9] sm:$0xff]  ;;  %v984_v39 = vpack.c.bf16 %v1144_v15, %v1139_v14  ;;  %v993_v40 = vpack.c.bf16 %v1184_v21, %v1174_v20  ;;  %v214_v41 = vld [vmem:[%s1226_s23 + $0x11] sm:$0xff]  ;;  %v987_v43 = vpack.c.bf16 %v1154_v17, %v1149_v16  ;;  %vm678_vm2 = vcmask 261120  }
  0x16   : >> { %866 = vmatprep.mubr.msk.f32.mxu0 %vm1036_vm0, %v1037_v30  ;;  %893 = vmatprep.mubr.msk.f32.mxu1 %vm1036_vm0, %v1037_v30  ;;  %v207_v34 = vld [vmem:[%s1226_s23] sm:$0xff]  ;;  %v208_v38 = vld [vmem:[%s1226_s23 + $0x8] sm:$0xff]  ;;  %v209_v42 = vld [vmem:[%s1226_s23 + $0x10] sm:$0xff]  ;;  %v996_v44 = vpack.c.bf16 %v1194_v23, %v1189_v22  ;;  %vm683_vm3 = vcmask 260096  }
  0x17   : >> { %v215_v45 = vld [vmem:[%s1226_s23 + $0x19] sm:$0xff]  ;;  %v216_v47 = vld [vmem:[%s1226_s23 + $0x21] sm:$0x7f]  ;;  %v787_v49 = vld [vmem:[%s1226_s23 + $0x28] sm:$0xff] }
  0x18   : >> { %967 = vmatpush3.bf16.msra.mxu0 %v966_v28  ;;  %976 = vmatpush3.bf16.msra.mxu1 %v975_v29  ;;  %v210_v46 = vld [vmem:[%s1226_s23 + $0x18] sm:$0xff]  ;;  %v211_v48 = vld [vmem:[%s1226_s23 + $0x20] sm:$0x7f]  ;;  %v797_v50 = vld [vmem:[%s1226_s23 + $0x29] sm:$0xff] }
  0x19   : >> { %968 = vmatprep.subr.bf16.mxu0 %v1035_v27  ;;  %977 = vmatprep.subr.bf16.mxu1 %v1035_v27  ;;  %v788_v51 = vld [vmem:[%s1226_s23 + $0x30] sm:$0xff]  ;;  %v789_v53 = vld [vmem:[%s1226_s23 + $0x38] sm:$0xff]  ;;  %v790_v55 = vld [vmem:[%s1226_s23 + $0x40] sm:$0xff] }
  0x1a   : >> { %v798_v52 = vld [vmem:[%s1226_s23 + $0x31] sm:$0xff]  ;;  %v799_v54 = vld [vmem:[%s1226_s23 + $0x39] sm:$0xff]  ;;  %v800_v56 = vld [vmem:[%s1226_s23 + $0x41] sm:$0xff] }
  0x1b   : >> { %v791_v57 = vld [vmem:[%s1226_s23 + $0x48] sm:$0x7f] }
  0x1c   : >> { %970 = vmatpush3.bf16.msra.mxu0 %v969_v31  ;;  %979 = vmatpush3.bf16.msra.mxu1 %v978_v32  ;;  %v801_v58 = vld [vmem:[%s1226_s23 + $0x49] sm:$0x7f] }
  0x1d   : >> { %980 = vmatprep.subr.bf16.mxu0 %v1035_v27  ;;  %989 = vmatprep.subr.bf16.mxu1 %v1035_v27 }
  0x1f   : >> { %867 = vmatmul.mubr.msk.f32.vlgmr.msra.gmra.mrb[0].mxu0 %vm217_vm1, %v212_v33  ;;  %894 = vmatmul.mubr.msk.f32.vlgmr.msra.gmra.mrb[0].mxu1 %vm217_vm1, %v207_v34 }
  0x20   : >> { %982 = vmatpush3.bf16.msra.mxu0 %v981_v35  ;;  %869 = vmatprep.mubr.msk.f32.mxu0 %vm1036_vm0, %v1037_v30 }
  0x21   : >> { %991 = vmatpush3.bf16.msra.mxu1 %v990_v36  ;;  %896 = vmatprep.mubr.msk.f32.mxu1 %vm1036_vm0, %v1037_v30 }
  0x22   : >> { %983 = vmatprep.subr.bf16.mxu0 %v1035_v27  ;;  %992 = vmatprep.subr.bf16.mxu1 %v1035_v27 }
  0x23   : >> { %870 = vmatmul.mubr.msk.f32.gmra.mrb[2].mxu0 %vm217_vm1, %v213_v37  ;;  %897 = vmatmul.mubr.msk.f32.gmra.mrb[2].mxu1 %vm217_vm1, %v208_v38 }
  0x24   : >> { %872 = vmatprep.mubr.msk.f32.mxu0 %vm1036_vm0, %v1037_v30  ;;  %899 = vmatprep.mubr.msk.f32.mxu1 %vm1036_vm0, %v1037_v30 }
  0x25   : >> { %985 = vmatpush3.bf16.msra.mxu0 %v984_v39  ;;  %994 = vmatpush3.bf16.msra.mxu1 %v993_v40 }
  0x26   : >> { %986 = vmatprep.subr.bf16.mxu0 %v1035_v27  ;;  %995 = vmatprep.subr.bf16.mxu1 %v1035_v27 }
  0x27   : >> { %873 = vmatmul.mubr.msk.f32.gmra.mrb[4].mxu0 %vm217_vm1, %v214_v41  ;;  %900 = vmatmul.mubr.msk.f32.gmra.mrb[4].mxu1 %vm217_vm1, %v209_v42 }
  0x28   : >> { %875 = vmatprep.mubr.msk.f32.mxu0 %vm1036_vm0, %v1037_v30  ;;  %902 = vmatprep.mubr.msk.f32.mxu1 %vm1036_vm0, %v1037_v30 }
  0x29   : >> { %988 = vmatpush3.bf16.msra.mxu0 %v987_v43  ;;  %997 = vmatpush3.bf16.msra.mxu1 %v996_v44 }
  0x2b   : >> { %876 = vmatmul.mubr.msk.f32.gmra.mrb[6].mxu0 %vm217_vm1, %v215_v45  ;;  %903 = vmatmul.mubr.msk.f32.gmra.mrb[6].mxu1 %vm217_vm1, %v210_v46 }
  0x2c   : >> { %878 = vmatprep.mubr.msk.f32.mxu0 %vm1036_vm0, %v1037_v30  ;;  %905 = vmatprep.mubr.msk.f32.mxu1 %vm1036_vm0, %v1037_v30 }
  0x2f   : >> { %879 = vmatmul.mubr.msk.f32.gmra.mrb[8].mxu0 %vm217_vm1, %v216_v47  ;;  %906 = vmatmul.mubr.msk.f32.gmra.mrb[8].mxu1 %vm217_vm1, %v211_v48 }
  0x30   : >> { %920 = vmatprep.mubr.msk.f32.mxu0 %vm1036_vm0, %v1037_v30  ;;  %947 = vmatprep.mubr.msk.f32.mxu1 %vm1036_vm0, %v1037_v30 }
  0x33   : >> { %921 = vmatmul.mubr.msk.f32.vlgmr.msra.gmra.mrb[10].mxu0 %vm217_vm1, %v787_v49  ;;  %948 = vmatmul.mubr.msk.f32.vlgmr.msra.gmra.mrb[10].mxu1 %vm217_vm1, %v797_v50 }
  0x34   : >> { %923 = vmatprep.mubr.msk.f32.mxu0 %vm1036_vm0, %v1037_v30  ;;  %950 = vmatprep.mubr.msk.f32.mxu1 %vm1036_vm0, %v1037_v30 }
  0x37   : >> { %924 = vmatmul.mubr.msk.f32.gmra.mrb[12].mxu0 %vm217_vm1, %v788_v51  ;;  %951 = vmatmul.mubr.msk.f32.gmra.mrb[12].mxu1 %vm217_vm1, %v798_v52 }
  0x38   : >> { %926 = vmatprep.mubr.msk.f32.mxu0 %vm1036_vm0, %v1037_v30  ;;  %953 = vmatprep.mubr.msk.f32.mxu1 %vm1036_vm0, %v1037_v30 }
  0x3b   : >> { %927 = vmatmul.mubr.msk.f32.gmra.mrb[14].mxu0 %vm217_vm1, %v789_v53  ;;  %954 = vmatmul.mubr.msk.f32.gmra.mrb[14].mxu1 %vm217_vm1, %v799_v54 }
  0x3c   : >> { %929 = vmatprep.mubr.msk.f32.mxu0 %vm1036_vm0, %v1037_v30  ;;  %956 = vmatprep.mubr.msk.f32.mxu1 %vm1036_vm0, %v1037_v30 }
  0x3f   : >> { %930 = vmatmul.mubr.msk.f32.gmra.mrb[16].mxu0 %vm217_vm1, %v790_v55  ;;  %957 = vmatmul.mubr.msk.f32.gmra.mrb[16].mxu1 %vm217_vm1, %v800_v56 }
  0x40   : >> { %932 = vmatprep.mubr.msk.f32.mxu0 %vm1036_vm0, %v1037_v30  ;;  %959 = vmatprep.mubr.msk.f32.mxu1 %vm1036_vm0, %v1037_v30 }
  0x43   : >> { %933 = vmatmul.mubr.msk.f32.gmra.mrb[18].mxu0 %vm217_vm1, %v791_v57  ;;  %960 = vmatmul.mubr.msk.f32.gmra.mrb[18].mxu1 %vm217_vm1, %v801_v58 }
  0xf2   : >> { %v299_v59 = vpop.f32.mrb[0].mxu0  ;;  %v404_v60 = vpop.f32.mrb[0].mxu1 }
  0xf3   : >> { %v868_v61 = vpop.f32.mrb[1].mxu0  ;;  %v405_v62 = vadd.f32 %v404_v60, %v299_v59  ;;  %v895_v63 = vpop.f32.mrb[1].mxu1 }
  0xf6   : >> { %v304_v25 = vpop.f32.mrb[2].mxu0  ;;  %v409_v26 = vpop.f32.mrb[2].mxu1 }
  0xf7   : >> { %v871_v27 = vpop.f32.mrb[3].mxu0  ;;  %v410_v28 = vadd.f32 %v409_v26, %v304_v25  ;;  %v898_v29 = vpop.f32.mrb[3].mxu1 }
  0xfa   : >> { %v309_v31 = vpop.f32.mrb[4].mxu0  ;;  %v414_v32 = vpop.f32.mrb[4].mxu1 }
  0xfb   : >> { %v874_v33 = vpop.f32.mrb[5].mxu0  ;;  %v415_v34 = vadd.f32 %v414_v32, %v309_v31  ;;  %v901_v30 = vpop.f32.mrb[5].mxu1 }
  0xfe   : >> { %v314_v35 = vpop.f32.mrb[6].mxu0  ;;  %v419_v36 = vpop.f32.mrb[6].mxu1 }
  0xff   : >> { %v877_v37 = vpop.f32.mrb[7].mxu0  ;;  %v420_v38 = vadd.f32 %v419_v36, %v314_v35  ;;  %v904_v39 = vpop.f32.mrb[7].mxu1 }
 0x102   : >> { %v319_v40 = vpop.f32.mrb[8].mxu0  ;;  %v424_v41 = vpop.f32.mrb[8].mxu1 }
 0x103   : >> { %v880_v42 = vpop.f32.mrb[9].mxu0  ;;  %v425_v43 = vadd.f32 %v424_v41, %v319_v40  ;;  %v907_v44 = vpop.f32.mrb[9].mxu1 }
 0x106   : >> { %v517_v45 = vpop.f32.mrb[10].mxu0  ;;  %v632_v46 = vpop.f32.mrb[10].mxu1 }
 0x107   : >> { %v541_v47 = vadd.f32 %v517_v45, %v405_v62  ;;  %v922_v48 = vpop.f32.mrb[11].mxu0  ;;  %v949_v49 = vpop.f32.mrb[11].mxu1 }
 0x109   : >> { %v656_v50 = vadd.f32 %v632_v46, %v541_v47 }
 0x10a   : >> { %v522_v51 = vpop.f32.mrb[12].mxu0  ;;  %v637_v52 = vpop.f32.mrb[12].mxu1 }
 0x10b   : >> { %v667_v53 = vadd.f32 %v1199_v24, %v656_v50  ;;  %v542_v54 = vadd.f32 %v522_v51, %v410_v28  ;;  %v925_v55 = vpop.f32.mrb[13].mxu0  ;;  %v952_v56 = vpop.f32.mrb[13].mxu1 }
 0x10d   : >> { %v672_v57 = vmax.f32 %v667_v53, 0.0  ;;  %v657_v58 = vadd.f32 %v637_v52, %v542_v54 }
 0x10e   : >> { %v527_v59 = vpop.f32.mrb[14].mxu0  ;;  %v642_v60 = vpop.f32.mrb[14].mxu1 }
 0x10f   : >> { %679 = vst.msk [vmem:[%s1320_s24] sm:$0xff] %vm678_vm2, %v672_v57  ;;  %v668_v61 = vadd.f32 %v1199_v24, %v657_v58  ;;  %v543_v62 = vadd.f32 %v527_v59, %v415_v34  ;;  %v928_v63 = vpop.f32.mrb[15].mxu0  ;;  %v955_v25 = vpop.f32.mrb[15].mxu1 }
 0x111   : >> { %v673_v26 = vmax.f32 %v668_v61, 0.0  ;;  %v658_v27 = vadd.f32 %v642_v60, %v543_v62 }
 0x112   : >> { %v532_v28 = vpop.f32.mrb[16].mxu0  ;;  %v647_v29 = vpop.f32.mrb[16].mxu1 }
 0x113   : >> { %680 = vst.msk [vmem:[%s1320_s24 + $0x8] sm:$0xff] %vm678_vm2, %v673_v26  ;;  %v669_v31 = vadd.f32 %v1199_v24, %v658_v27  ;;  %v544_v32 = vadd.f32 %v532_v28, %v420_v38  ;;  %v931_v33 = vpop.f32.mrb[17].mxu0  ;;  %v958_v30 = vpop.f32.mrb[17].mxu1 }
 0x115   : >> { %v674_v35 = vmax.f32 %v669_v31, 0.0  ;;  %v659_v36 = vadd.f32 %v647_v29, %v544_v32 }
 0x116   : >> { %v537_v37 = vpop.f32.mrb[18].mxu0  ;;  %v652_v34 = vpop.f32.mrb[18].mxu1 }
 0x117   : >> { %681 = vst.msk [vmem:[%s1320_s24 + $0x10] sm:$0xff] %vm678_vm2, %v674_v35  ;;  %v670_v39 = vadd.f32 %v1199_v24, %v659_v36  ;;  %v545_v40 = vadd.f32 %v537_v37, %v425_v43  ;;  %v934_v41 = vpop.f32.mrb[19].mxu0  ;;  %v961_v42 = vpop.f32.mrb[19].mxu1 }
 0x119   : >> { %v675_v44 = vmax.f32 %v670_v39, 0.0  ;;  %v660_v45 = vadd.f32 %v652_v34, %v545_v40  ;;  %203 = sbr.rel (!%p201_p4) target bundleno = 18 (0x12), region = 75 }
 0x11b   : >> { %682 = vst.msk [vmem:[%s1320_s24 + $0x18] sm:$0xff] %vm678_vm2, %v675_v44  ;;  %v671_v38 = vadd.f32 %v1199_v24, %v660_v45 }
 0x11d   : >> { %v676_v46 = vmax.f32 %v671_v38, 0.0 }
 0x11f   : >> { %684 = vst.msk [vmem:[%s1320_s24 + $0x20] sm:$0x7f] %vm683_vm3, %v676_v46 }
 0x120 PF: > { %s13_s12 = sadd.s32 1, %s1029_s12  }
 0x121   : > { %p10_p5 = scmp.ge.s32.totalorder %s13_s12, 4  }
 0x123   :  { %12 = sbr.rel (!%p10_p5) target bundleno = 1 (0x1), region = 86 }

// kernel: nature_cnn_forward.5
= control target key start
LH: loop header
LB: loop body
LE: loop exit
PB: predicated region body
PF: predicated region fallthrough
CT: control target
= control target key end

     0   :  { %s1133_s12 = smov 0   ;;  %s1631_s0 = inlined_call_operand.vmem [shape: f32[2,14,19,128], index: 0, kind: input, shape index: {}]   ;;  %s1632_s1 = inlined_call_operand.vmem [shape: f32[4,128,64], index: 1, kind: input, shape index: {}]   ;;  %s1633_s2 = inlined_call_operand.vmem [shape: f32[1,64], index: 2, kind: input, shape index: {}]   ;;  %s1634_s3 = inlined_call_operand.vmem [shape: f32[2,13,18,64], index: 3, kind: output, shape index: {}]  }
   0x1 LB: > { %s673_s13 = sadd.s32 4294967295, %s1104_s12   ;;  %p677_p0 = scmp.ge.s32.totalorder %s1104_s12, 1  ;;  %s1104_s12 = sphi %s1133_s12, %s13_s12  }
   0x2   : > { %p137_p1 = scmp.lt.s32.totalorder %s1104_s12, 3 }
   0x4   : > { %p138_p2 = pnand %p677_p0, %p137_p1 }
   0x5   : > { %p161_p3 = scmp.lt.s32.totalorder (!%p138_p2), %s673_s13, 1  ;;  %v1144_v0 = vld [vmem:[%s1632_s1] sm:$0xff] (!%p138_p2)  ;;  %v1149_v1 = vld [vmem:[%s1632_s1 + $0x8] sm:$0xff] (!%p138_p2)  ;;  %v1154_v2 = vld [vmem:[%s1632_s1 + $0x10] sm:$0xff] (!%p138_p2) }
   0x6   : > { %141 = sbr.rel (%p138_p2) target bundleno = 326 (0x146), region = 32  ;;  %1638 = vst [vmem:[#allocation2_spill] sm:$0xff] (!%p138_p2), %v1144_v0  ;;  %1639 = vst [vmem:[#allocation3_spill] sm:$0xff] (!%p138_p2), %v1149_v1  ;;  %v1159_v3 = vld [vmem:[%s1632_s1 + $0x18] sm:$0xff] (!%p138_p2)  ;;  %v1164_v4 = vld [vmem:[%s1632_s1 + $0x20] sm:$0xff] (!%p138_p2) }
   0x7   : > { %1640 = vst [vmem:[#allocation4_spill] sm:$0xff] (!%p138_p2), %v1154_v2  ;;  %1641 = vst [vmem:[#allocation5_spill] sm:$0xff] (!%p138_p2), %v1159_v3  ;;  %v1169_v5 = vld [vmem:[%s1632_s1 + $0x28] sm:$0xff] (!%p138_p2)  ;;  %v1174_v6 = vld [vmem:[%s1632_s1 + $0x30] sm:$0xff] (!%p138_p2) }
   0x8   : > { %1642 = vst [vmem:[#allocation6_spill] sm:$0xff] (!%p138_p2), %v1164_v4  ;;  %1643 = vst [vmem:[#allocation7_spill] sm:$0xff] (!%p138_p2), %v1169_v5  ;;  %v1179_v7 = vld [vmem:[%s1632_s1 + $0x38] sm:$0xff] (!%p138_p2)  ;;  %v1184_v8 = vld [vmem:[%s1632_s1 + $0x40] sm:$0xff] (!%p138_p2) }
   0x9   : > { %1644 = vst [vmem:[#allocation8_spill] sm:$0xff] (!%p138_p2), %v1174_v6  ;;  %1645 = vst [vmem:[#allocation9_spill] sm:$0xff] (!%p138_p2), %v1179_v7  ;;  %v1189_v9 = vld [vmem:[%s1632_s1 + $0x48] sm:$0xff] (!%p138_p2)  ;;  %v1194_v10 = vld [vmem:[%s1632_s1 + $0x50] sm:$0xff] (!%p138_p2) }
   0xa   : > { %1646 = vst [vmem:[#allocation10_spill] sm:$0xff] (!%p138_p2), %v1184_v8  ;;  %1647 = vst [vmem:[#allocation11_spill] sm:$0xff] (!%p138_p2), %v1189_v9  ;;  %v1199_v11 = vld [vmem:[%s1632_s1 + $0x58] sm:$0xff] (!%p138_p2)  ;;  %v1204_v12 = vld [vmem:[%s1632_s1 + $0x60] sm:$0xff] (!%p138_p2) }
   0xb   : > { %1648 = vst [vmem:[#allocation12_spill] sm:$0xff] (!%p138_p2), %v1194_v10  ;;  %1649 = vst [vmem:[#allocation13_spill] sm:$0xff] (!%p138_p2), %v1199_v11  ;;  %v1209_v13 = vld [vmem:[%s1632_s1 + $0x68] sm:$0xff] (!%p138_p2)  ;;  %v1214_v14 = vld [vmem:[%s1632_s1 + $0x70] sm:$0xff] (!%p138_p2) }
   0xc   : > { %1650 = vst [vmem:[#allocation14_spill] sm:$0xff] (!%p138_p2), %v1204_v12  ;;  %1651 = vst [vmem:[#allocation15_spill] sm:$0xff] (!%p138_p2), %v1209_v13  ;;  %v1219_v15 = vld [vmem:[%s1632_s1 + $0x78] sm:$0xff] (!%p138_p2)  ;;  %v1224_v16 = vld [vmem:[%s1632_s1 + $0x80] sm:$0xff] (!%p138_p2) }
   0xd   : > { %s1684_s13 = smov (!%p161_p3, %s673_s13), 1  ;;  %1652 = vst [vmem:[#allocation16_spill] sm:$0xff] %v1214_v14  ;;  %1653 = vst [vmem:[#allocation17_spill] sm:$0xff] %v1224_v16  ;;  %v1229_v17 = vld [vmem:[%s1632_s1 + $0x88] sm:$0xff]  ;;  %v1239_v18 = vld [vmem:[%s1632_s1 + $0x90] sm:$0xff] }
   0xe   : > { %s1073_s11 = smul.u32 336, %s1684_s13  ;;  %v1244_v19 = vld [vmem:[%s1632_s1 + $0x98] sm:$0xff]  ;;  %v1249_v20 = vld [vmem:[%s1632_s1 + $0xa0] sm:$0xff]  ;;  %v1259_v21 = vld [vmem:[%s1632_s1 + $0xa8] sm:$0xff] }
   0xf   : > { %s1074_s20 = smul.u32 312, %s1684_s13  ;;  %v1264_v22 = vld [vmem:[%s1632_s1 + $0xb0] sm:$0xff]  ;;  %v1269_v23 = vld [vmem:[%s1632_s1 + $0xb8] sm:$0xff]  ;;  %v1274_v24 = vld [vmem:[%s1632_s1 + $0xc0] sm:$0xff]  ;;  %s1476_s13 = smov 0  }
  0x10   : > { %s1234_s29 = scalar_lea.vmem %s1631_s0, %s1073_s11  ;;  %v1279_v25 = vld [vmem:[%s1632_s1 + $0xc8] sm:$0xff]  ;;  %v1284_v26 = vld [vmem:[%s1632_s1 + $0xd0] sm:$0xff]  ;;  %v1289_v27 = vld [vmem:[%s1632_s1 + $0xd8] sm:$0xff] }
  0x11   : > { %s1254_s10 = scalar_lea.vmem %s1634_s3, %s1074_s20  ;;  %v1294_v28 = vld [vmem:[%s1632_s1 + $0xe0] sm:$0xff]  ;;  %v1299_v29 = vld [vmem:[%s1632_s1 + $0xe8] sm:$0xff]  ;;  %v1304_v30 = vld [vmem:[%s1632_s1 + $0xf0] sm:$0xff] }
  0x12   : > { %v1309_v31 = vld [vmem:[%s1632_s1 + $0xf8] sm:$0xff]  ;;  %v1314_v32 = vld [vmem:[%s1632_s1 + $0x100] sm:$0xff]  ;;  %v1319_v33 = vld [vmem:[%s1632_s1 + $0x108] sm:$0xff] }
  0x13   : > { %v1324_v34 = vld [vmem:[%s1632_s1 + $0x110] sm:$0xff]  ;;  %v1329_v35 = vld [vmem:[%s1632_s1 + $0x118] sm:$0xff]  ;;  %v1334_v36 = vld [vmem:[%s1632_s1 + $0x120] sm:$0xff] }
  0x14   : > { %v1339_v37 = vld [vmem:[%s1632_s1 + $0x128] sm:$0xff]  ;;  %v1344_v38 = vld [vmem:[%s1632_s1 + $0x130] sm:$0xff]  ;;  %v1349_v39 = vld [vmem:[%s1632_s1 + $0x138] sm:$0xff] }
  0x15   : > { %v1354_v40 = vld [vmem:[%s1632_s1 + $0x140] sm:$0xff]  ;;  %v1359_v41 = vld [vmem:[%s1632_s1 + $0x148] sm:$0xff]  ;;  %v1364_v42 = vld [vmem:[%s1632_s1 + $0x150] sm:$0xff] }
  0x16   : > { %v1369_v43 = vld [vmem:[%s1632_s1 + $0x158] sm:$0xff]  ;;  %v1374_v44 = vld [vmem:[%s1632_s1 + $0x160] sm:$0xff]  ;;  %v1379_v45 = vld [vmem:[%s1632_s1 + $0x168] sm:$0xff] }
  0x17   : > { %v1384_v46 = vld [vmem:[%s1632_s1 + $0x170] sm:$0xff]  ;;  %v1389_v47 = vld [vmem:[%s1632_s1 + $0x178] sm:$0xff]  ;;  %v1394_v48 = vld [vmem:[%s1632_s1 + $0x180] sm:$0xff] }
  0x18   : > { %1654 = vst [vmem:[#allocation18_spill] sm:$0xff] %v1384_v46  ;;  %1655 = vst [vmem:[#allocation19_spill] sm:$0xff] %v1389_v47  ;;  %v1399_v49 = vld [vmem:[%s1632_s1 + $0x188] sm:$0xff]  ;;  %v1404_v50 = vld [vmem:[%s1632_s1 + $0x190] sm:$0xff] }
  0x19   : > { %v1409_v51 = vld [vmem:[%s1632_s1 + $0x198] sm:$0xff]  ;;  %v1414_v52 = vld [vmem:[%s1632_s1 + $0x1a0] sm:$0xff]  ;;  %v1419_v53 = vld [vmem:[%s1632_s1 + $0x1a8] sm:$0xff] }
  0x1a   : > { %v1424_v54 = vld [vmem:[%s1632_s1 + $0x1b0] sm:$0xff]  ;;  %v1429_v55 = vld [vmem:[%s1632_s1 + $0x1b8] sm:$0xff]  ;;  %v1434_v56 = vld [vmem:[%s1632_s1 + $0x1c0] sm:$0xff] }
  0x1b   : > { %v1439_v57 = vld [vmem:[%s1632_s1 + $0x1c8] sm:$0xff]  ;;  %v1444_v58 = vld [vmem:[%s1632_s1 + $0x1d0] sm:$0xff]  ;;  %v1449_v59 = vld [vmem:[%s1632_s1 + $0x1d8] sm:$0xff] }
  0x1c   : > { %v1454_v60 = vld [vmem:[%s1632_s1 + $0x1e0] sm:$0xff]  ;;  %v1459_v61 = vld [vmem:[%s1632_s1 + $0x1e8] sm:$0xff]  ;;  %v1464_v62 = vld [vmem:[%s1632_s1 + $0x1f0] sm:$0xff] }
  0x1d   : > { %1656 = vst [vmem:[#allocation20_spill] sm:$0xff] %v1459_v61  ;;  %1657 = vst [vmem:[#allocation21_spill] sm:$0xff] %v1464_v62  ;;  %v1469_v63 = vld [vmem:[%s1632_s1 + $0x1f8] sm:$0xff]  ;;  %v1474_v47 = vld [vmem:[%s1633_s2] ss:$0 sm:$0xff] }
  0x1e   : > { %1658 = vst [vmem:[#allocation22_spill] sm:$0xff] %v1469_v63  ;;  %1659 = vst [vmem:[#allocation23_spill] sm:$0xff] %v1474_v47 }
  0x1f LB: >> { %v1660_v16 = vld [vmem:[#allocation17_spill] sm:$0xff]  ;;  %v1661_v0 = vld [vmem:[#allocation2_spill] sm:$0xff]  ;;  %v1662_v1 = vld [vmem:[#allocation3_spill] sm:$0xff]  ;;  %v1110_v61 = vmov 0.0|0.0   ;;  %v981_v47 = vpack.c.bf16 %v1244_v19, %v1239_v18  ;;  %vm1111_vm0 = vmmov 0   ;;  %s245_s30 = smul.u32 24, %s1108_s13  ;;  %s1108_s13 = sphi %s1476_s13, %s244_s13  }
  0x20   : >> { %v978_v62 = vpack.c.bf16 %v1229_v17, %v1660_v16  ;;  %v1002_v46 = vpack.c.bf16 %v1662_v1, %v1661_v0  ;;  %977 = vmatprep.subr.bf16.mxu0 %v1110_v61  ;;  %1001 = vmatprep.subr.bf16.mxu1 %v1110_v61  ;;  %v1663_v2 = vld [vmem:[#allocation4_spill] sm:$0xff]  ;;  %v1664_v3 = vld [vmem:[#allocation5_spill] sm:$0xff]  ;;  %v1636_v16 = vmov 0.0   ;;  %v1665_v4 = vld [vmem:[#allocation6_spill] sm:$0xff]  ;;  %v987_v0 = vpack.c.bf16 %v1269_v23, %v1264_v22  ;;  %s244_s13 = sadd.s32 1, %s1108_s13  }
  0x21   : >> { %v1005_v63 = vpack.c.bf16 %v1664_v3, %v1663_v2  ;;  %845 = vmatprep.mubr.msk.f32.mxu0 %vm1111_vm0, %v1636_v16  ;;  %886 = vmatprep.mubr.msk.f32.mxu1 %vm1111_vm0, %v1636_v16  ;;  %v1666_v5 = vld [vmem:[#allocation7_spill] sm:$0xff]  ;;  %v1667_v6 = vld [vmem:[#allocation8_spill] sm:$0xff]  ;;  %v1668_v7 = vld [vmem:[#allocation9_spill] sm:$0xff]  ;;  %s1537_s4 = scalar_lea.vmem %s1234_s29, %s245_s30  ;;  %v1676_v3 = vmov 0.0   ;;  %s600_s5 = scalar_lea.vmem %s1254_s10, %s245_s30  ;;  %vm601_vm1 = vcmask 523264   ;;  %vm604_vm2 = vcmask 517120  }
  0x22   : >> { %979 = vmatpush3.bf16.msra.mxu0 %v978_v62  ;;  %1003 = vmatpush3.bf16.msra.mxu1 %v1002_v46  ;;  %v984_v46 = vpack.c.bf16 %v1259_v21, %v1249_v20  ;;  %v1008_v62 = vpack.c.bf16 %v1666_v5, %v1665_v4  ;;  %v1011_v16 = vpack.c.bf16 %v1668_v7, %v1667_v6  ;;  %v1669_v8 = vld [vmem:[#allocation10_spill] sm:$0xff]  ;;  %v1670_v9 = vld [vmem:[#allocation11_spill] sm:$0xff]  ;;  %v1671_v10 = vld [vmem:[#allocation12_spill] sm:$0xff]  ;;  %p241_p4 = scmp.ge.s32.totalorder %s244_s13, 13  }
  0x23   : >> { %980 = vmatprep.subr.bf16.mxu0 %v1110_v61  ;;  %1004 = vmatprep.subr.bf16.mxu1 %v1110_v61  ;;  %v1672_v11 = vld [vmem:[#allocation13_spill] sm:$0xff]  ;;  %v1673_v12 = vld [vmem:[#allocation14_spill] sm:$0xff]  ;;  %v1674_v13 = vld [vmem:[#allocation15_spill] sm:$0xff] }
  0x24   : >> { %v1675_v14 = vld [vmem:[#allocation16_spill] sm:$0xff]  ;;  %v248_v2 = vld [vmem:[%s1537_s4 + $0x8] sm:$0xff]  ;;  %v1680_v4 = vld [vmem:[#allocation21_spill] sm:$0xff] }
  0x25   : >> { %v251_v1 = vld [vmem:[%s1537_s4 + $0x9] sm:$0xff]  ;;  %v731_v5 = vld [vmem:[%s1537_s4 + $0x19] sm:$0xff] }
  0x26   : >> { %982 = vmatpush3.bf16.msra.mxu0 %v981_v47  ;;  %1006 = vmatpush3.bf16.msra.mxu1 %v1005_v63  ;;  %v990_v47 = vpack.c.bf16 %v1279_v25, %v1274_v24  ;;  %v1014_v63 = vpack.c.bf16 %v1670_v9, %v1669_v8 }
  0x27   : >> { %983 = vmatprep.subr.bf16.mxu0 %v1110_v61  ;;  %1007 = vmatprep.subr.bf16.mxu1 %v1110_v61 }
  0x2a   : >> { %985 = vmatpush3.bf16.msra.mxu0 %v984_v46  ;;  %1009 = vmatpush3.bf16.msra.mxu1 %v1008_v62  ;;  %v993_v46 = vpack.c.bf16 %v1289_v27, %v1284_v26  ;;  %v1020_v62 = vpack.c.bf16 %v1674_v13, %v1673_v12 }
  0x2b   : >> { %986 = vmatprep.subr.bf16.mxu0 %v1110_v61  ;;  %1010 = vmatprep.subr.bf16.mxu1 %v1110_v61 }
  0x2e   : >> { %988 = vmatpush3.bf16.msra.mxu0 %v987_v0  ;;  %1012 = vmatpush3.bf16.msra.mxu1 %v1011_v16  ;;  %v1017_v0 = vpack.c.bf16 %v1672_v11, %v1671_v10  ;;  %v996_v16 = vpack.c.bf16 %v1299_v29, %v1294_v28 }
  0x2f   : >> { %989 = vmatprep.subr.bf16.mxu0 %v1110_v61  ;;  %1013 = vmatprep.subr.bf16.mxu1 %v1110_v61 }
  0x32   : >> { %991 = vmatpush3.bf16.msra.mxu0 %v990_v47  ;;  %1015 = vmatpush3.bf16.msra.mxu1 %v1014_v63  ;;  %v999_v47 = vpack.c.bf16 %v1309_v31, %v1304_v30  ;;  %v1023_v63 = vpack.c.bf16 %v1219_v15, %v1675_v14 }
  0x33   : >> { %992 = vmatprep.subr.bf16.mxu0 %v1110_v61  ;;  %1016 = vmatprep.subr.bf16.mxu1 %v1110_v61 }
  0x36   : >> { %994 = vmatpush3.bf16.msra.mxu0 %v993_v46  ;;  %1018 = vmatpush3.bf16.msra.mxu1 %v1017_v0  ;;  %v250_v46 = vld [vmem:[%s1537_s4 + $0x1] sm:$0xff] }
  0x37   : >> { %995 = vmatprep.subr.bf16.mxu0 %v1110_v61  ;;  %1019 = vmatprep.subr.bf16.mxu1 %v1110_v61  ;;  %v247_v0 = vld [vmem:[%s1537_s4] sm:$0xff] }
  0x3a   : >> { %997 = vmatpush3.bf16.msra.mxu0 %v996_v16  ;;  %1021 = vmatpush3.bf16.msra.mxu1 %v1020_v62  ;;  %v1026_v16 = vpack.c.bf16 %v1319_v33, %v1314_v32  ;;  %v1050_v62 = vpack.c.bf16 %v1399_v49, %v1394_v48 }
  0x3b   : >> { %998 = vmatprep.subr.bf16.mxu0 %v1110_v61  ;;  %1022 = vmatprep.subr.bf16.mxu1 %v1110_v61 }
  0x3e   : >> { %1000 = vmatpush3.bf16.msra.mxu0 %v999_v47  ;;  %1024 = vmatpush3.bf16.msra.mxu1 %v1023_v63  ;;  %v1029_v47 = vpack.c.bf16 %v1329_v35, %v1324_v34  ;;  %v1053_v63 = vpack.c.bf16 %v1409_v51, %v1404_v50 }
  0x3f   : >> { %1025 = vmatprep.subr.bf16.mxu0 %v1110_v61  ;;  %1049 = vmatprep.subr.bf16.mxu1 %v1110_v61 }
  0x41   : >> { %846 = vmatmul.mubr.f32.vlgmr.msra.gmra.mrb[0].mxu0 %v250_v46  ;;  %887 = vmatmul.mubr.f32.vlgmr.msra.gmra.mrb[0].mxu1 %v247_v0  ;;  %v1032_v46 = vpack.c.bf16 %v1339_v37, %v1334_v36  ;;  %v1056_v0 = vpack.c.bf16 %v1419_v53, %v1414_v52 }
  0x42   : >> { %1027 = vmatpush3.bf16.msra.mxu0 %v1026_v16  ;;  %1051 = vmatpush3.bf16.msra.mxu1 %v1050_v62  ;;  %v252_v16 = vld [vmem:[%s1537_s4 + $0x11] sm:$0x3] }
  0x43   : >> { %1028 = vmatprep.subr.bf16.mxu0 %v1110_v61  ;;  %1052 = vmatprep.subr.bf16.mxu1 %v1110_v61  ;;  %v249_v62 = vld [vmem:[%s1537_s4 + $0x10] sm:$0x3] }
  0x44   : >> { %848 = vmatprep.mubr.msk.f32.mxu0 %vm1111_vm0, %v1676_v3  ;;  %889 = vmatprep.mubr.msk.f32.mxu1 %vm1111_vm0, %v1676_v3 }
  0x45   : >> { %849 = vmatmul.mubr.f32.gmra.mrb[2].mxu0 %v251_v1  ;;  %890 = vmatmul.mubr.f32.gmra.mrb[2].mxu1 %v248_v2  ;;  %v1035_v1 = vpack.c.bf16 %v1349_v39, %v1344_v38  ;;  %v1059_v2 = vpack.c.bf16 %v1429_v55, %v1424_v54 }
  0x46   : >> { %1030 = vmatpush3.bf16.msra.mxu0 %v1029_v47  ;;  %1054 = vmatpush3.bf16.msra.mxu1 %v1053_v63  ;;  %v1038_v47 = vpack.c.bf16 %v1359_v41, %v1354_v40  ;;  %v1062_v63 = vpack.c.bf16 %v1439_v57, %v1434_v56 }
  0x47   : >> { %1031 = vmatprep.subr.bf16.mxu0 %v1110_v61  ;;  %1055 = vmatprep.subr.bf16.mxu1 %v1110_v61 }
  0x48   : >> { %851 = vmatprep.mubr.msk.f32.mxu0 %vm1111_vm0, %v1676_v3  ;;  %892 = vmatprep.mubr.msk.f32.mxu1 %vm1111_vm0, %v1676_v3 }
  0x49   : >> { %852 = vmatmul.mubr.f32.gmra.mrb[4].mxu0 %v252_v16  ;;  %893 = vmatmul.mubr.f32.gmra.mrb[4].mxu1 %v249_v62  ;;  %v1044_v16 = vpack.c.bf16 %v1379_v45, %v1374_v44  ;;  %v1677_v62 = vld [vmem:[#allocation20_spill] sm:$0xff] }
  0x4a   : >> { %1033 = vmatpush3.bf16.msra.mxu0 %v1032_v46  ;;  %1057 = vmatpush3.bf16.msra.mxu1 %v1056_v0  ;;  %v1041_v46 = vpack.c.bf16 %v1369_v43, %v1364_v42  ;;  %v1065_v0 = vpack.c.bf16 %v1449_v59, %v1444_v58 }
  0x4b   : >> { %1034 = vmatprep.subr.bf16.mxu0 %v1110_v61  ;;  %1058 = vmatprep.subr.bf16.mxu1 %v1110_v61 }
  0x4c   : >> { %927 = vmatprep.mubr.msk.f32.mxu0 %vm1111_vm0, %v1676_v3  ;;  %968 = vmatprep.mubr.msk.f32.mxu1 %vm1111_vm0, %v1676_v3 }
  0x4e   : >> { %1036 = vmatpush3.bf16.msra.mxu0 %v1035_v1  ;;  %1060 = vmatpush3.bf16.msra.mxu1 %v1059_v2  ;;  %v1068_v1 = vpack.c.bf16 %v1677_v62, %v1454_v60  ;;  %v1678_v2 = vld [vmem:[#allocation18_spill] sm:$0xff]  ;;  %v728_v62 = vld [vmem:[%s1537_s4 + $0x18] sm:$0xff] }
  0x4f   : >> { %1037 = vmatprep.subr.bf16.mxu0 %v1110_v61  ;;  %1061 = vmatprep.subr.bf16.mxu1 %v1110_v61 }
  0x52   : >> { %1039 = vmatpush3.bf16.msra.mxu0 %v1038_v47  ;;  %1063 = vmatpush3.bf16.msra.mxu1 %v1062_v63  ;;  %v1679_v47 = vld [vmem:[#allocation19_spill] sm:$0xff] }
  0x53   : >> { %1040 = vmatprep.subr.bf16.mxu0 %v1110_v61  ;;  %1064 = vmatprep.subr.bf16.mxu1 %v1110_v61  ;;  %v1047_v63 = vpack.c.bf16 %v1679_v47, %v1678_v2 }
  0x56   : >> { %1042 = vmatpush3.bf16.msra.mxu0 %v1041_v46  ;;  %1066 = vmatpush3.bf16.msra.mxu1 %v1065_v0  ;;  %v1681_v46 = vld [vmem:[#allocation22_spill] sm:$0xff] }
  0x57   : >> { %1043 = vmatprep.subr.bf16.mxu0 %v1110_v61  ;;  %1067 = vmatprep.subr.bf16.mxu1 %v1110_v61  ;;  %v1071_v0 = vpack.c.bf16 %v1681_v46, %v1680_v4  ;;  %v732_v4 = vld [vmem:[%s1537_s4 + $0x21] sm:$0xff] }
  0x5a   : >> { %1045 = vmatpush3.bf16.msra.mxu0 %v1044_v16  ;;  %1069 = vmatpush3.bf16.msra.mxu1 %v1068_v1  ;;  %v729_v16 = vld [vmem:[%s1537_s4 + $0x20] sm:$0xff]  ;;  %v733_v1 = vld [vmem:[%s1537_s4 + $0x29] sm:$0x3] }
  0x5b   : >> { %1046 = vmatprep.subr.bf16.mxu0 %v1110_v61  ;;  %1070 = vmatprep.subr.bf16.mxu1 %v1110_v61  ;;  %v730_v61 = vld [vmem:[%s1537_s4 + $0x28] sm:$0x3] }
  0x5e   : >> { %1048 = vmatpush3.bf16.msra.mxu0 %v1047_v63  ;;  %1072 = vmatpush3.bf16.msra.mxu1 %v1071_v0 }
  0x61   : >> { %928 = vmatmul.mubr.f32.vlgmr.msra.gmra.mrb[6].mxu0 %v728_v62  ;;  %969 = vmatmul.mubr.f32.vlgmr.msra.gmra.mrb[6].mxu1 %v731_v5 }
  0x62   : >> { %930 = vmatprep.mubr.msk.f32.mxu0 %vm1111_vm0, %v1676_v3  ;;  %971 = vmatprep.mubr.msk.f32.mxu1 %vm1111_vm0, %v1676_v3 }
  0x65   : >> { %931 = vmatmul.mubr.f32.gmra.mrb[8].mxu0 %v729_v16  ;;  %972 = vmatmul.mubr.f32.gmra.mrb[8].mxu1 %v732_v4 }
  0x66   : >> { %933 = vmatprep.mubr.msk.f32.mxu0 %vm1111_vm0, %v1676_v3  ;;  %974 = vmatprep.mubr.msk.f32.mxu1 %vm1111_vm0, %v1676_v3 }
  0x69   : >> { %934 = vmatmul.mubr.f32.gmra.mrb[10].mxu0 %v730_v61  ;;  %975 = vmatmul.mubr.f32.gmra.mrb[10].mxu1 %v733_v1 }
 0x114   : >> { %v319_v5 = vpop.f32.mrb[0].mxu0  ;;  %v399_v2 = vpop.f32.mrb[0].mxu1 }
 0x115   : >> { %v847_v47 = vpop.f32.mrb[1].mxu0  ;;  %v400_v63 = vadd.f32 %v399_v2, %v319_v5  ;;  %v888_v46 = vpop.f32.mrb[1].mxu1 }
 0x116   : >> { %v1682_v46 = vld [vmem:[#allocation23_spill] sm:$0xff] }
 0x118   : >> { %v324_v0 = vpop.f32.mrb[2].mxu0  ;;  %v404_v62 = vpop.f32.mrb[2].mxu1 }
 0x119   : >> { %v850_v6 = vpop.f32.mrb[3].mxu0  ;;  %v405_v16 = vadd.f32 %v404_v62, %v324_v0  ;;  %v891_v4 = vpop.f32.mrb[3].mxu1 }
 0x11c   : >> { %v329_v7 = vpop.f32.mrb[4].mxu0  ;;  %v409_v8 = vpop.f32.mrb[4].mxu1 }
 0x11d   : >> { %v853_v9 = vpop.f32.mrb[5].mxu0  ;;  %v410_v10 = vadd.f32 %v409_v8, %v329_v7  ;;  %v894_v3 = vpop.f32.mrb[5].mxu1 }
 0x134   : >> { %v485_v11 = vpop.f32.mrb[6].mxu0  ;;  %v571_v61 = vpop.f32.mrb[6].mxu1 }
 0x135   : >> { %v499_v1 = vadd.f32 %v485_v11, %v400_v63  ;;  %v929_v12 = vpop.f32.mrb[7].mxu0  ;;  %v970_v13 = vpop.f32.mrb[7].mxu1 }
 0x137   : >> { %v585_v47 = vadd.f32 %v571_v61, %v499_v1 }
 0x138   : >> { %v490_v5 = vpop.f32.mrb[8].mxu0  ;;  %v576_v2 = vpop.f32.mrb[8].mxu1 }
 0x139   : >> { %v594_v14 = vadd.f32 %v1682_v46, %v585_v47  ;;  %v500_v6 = vadd.f32 %v490_v5, %v405_v16  ;;  %v932_v0 = vpop.f32.mrb[9].mxu0  ;;  %v973_v62 = vpop.f32.mrb[9].mxu1 }
 0x13b   : >> { %v597_v4 = vmax.f32 %v594_v14, 0.0  ;;  %v586_v9 = vadd.f32 %v576_v2, %v500_v6 }
 0x13c   : >> { %v495_v7 = vpop.f32.mrb[10].mxu0  ;;  %v581_v8 = vpop.f32.mrb[10].mxu1 }
 0x13d   : >> { %602 = vst.msk [vmem:[%s600_s5] sm:$0xff] %vm601_vm1, %v597_v4  ;;  %v595_v11 = vadd.f32 %v1682_v46, %v586_v9  ;;  %v501_v12 = vadd.f32 %v495_v7, %v410_v10  ;;  %v935_v13 = vpop.f32.mrb[11].mxu0  ;;  %v976_v63 = vpop.f32.mrb[11].mxu1 }
 0x13f   : >> { %v598_v3 = vmax.f32 %v595_v11, 0.0  ;;  %v587_v61 = vadd.f32 %v581_v8, %v501_v12  ;;  %243 = sbr.rel (!%p241_p4) target bundleno = 31 (0x1f), region = 75 }
 0x141   : >> { %603 = vst.msk [vmem:[%s600_s5 + $0x8] sm:$0xff] %vm601_vm1, %v598_v3  ;;  %v596_v16 = vadd.f32 %v1682_v46, %v587_v61 }
 0x143   : >> { %v599_v1 = vmax.f32 %v596_v16, 0.0 }
 0x145   : >> { %605 = vst.msk [vmem:[%s600_s5 + $0x10] sm:$0x3] %vm604_vm2, %v599_v1 }
 0x146 PF: > { %s13_s12 = sadd.s32 1, %s1104_s12  }
 0x147   : > { %p10_p5 = scmp.ge.s32.totalorder %s13_s12, 4  }
 0x149   :  { %12 = sbr.rel (!%p10_p5) target bundleno = 1 (0x1), region = 86 }

// kernel: nature_cnn_forward.6
= control target key start
LH: loop header
LB: loop body
LE: loop exit
PB: predicated region body
PF: predicated region fallthrough
CT: control target
= control target key end

     0   :  { %s1692_s12 = smov 0   ;;  %s2204_s0 = inlined_call_operand.vmem [shape: f32[2,13,18,64], index: 0, kind: input, shape index: {}]   ;;  %s2205_s1 = inlined_call_operand.vmem [shape: f32[9,64,64], index: 1, kind: input, shape index: {}]   ;;  %s2206_s2 = inlined_call_operand.vmem [shape: f32[1,64], index: 2, kind: input, shape index: {}]   ;;  %s2207_s3 = inlined_call_operand.vmem [shape: f32[2,11,16,64], index: 3, kind: output, shape index: {}]  }
   0x1 LB: > { %s1112_s13 = sadd.s32 4294967295, %s1666_s12   ;;  %p1116_p0 = scmp.ge.s32.totalorder %s1666_s12, 1  ;;  %s1666_s12 = sphi %s1692_s12, %s13_s12  }
   0x2   : > { %p137_p1 = scmp.lt.s32.totalorder %s1666_s12, 3 }
   0x4   : > { %p138_p2 = pnand %p1116_p0, %p137_p1 }
   0x5   : > { %p161_p3 = scmp.lt.s32.totalorder (!%p138_p2), %s1112_s13, 1  ;;  %v1703_v0 = vld [vmem:[%s2205_s1] sm:$0xff] (!%p138_p2)  ;;  %v1708_v1 = vld [vmem:[%s2205_s1 + $0x8] sm:$0xff] (!%p138_p2)  ;;  %v1713_v2 = vld [vmem:[%s2205_s1 + $0x10] sm:$0xff] (!%p138_p2) }
   0x6   : > { %141 = sbr.rel (%p138_p2) target bundleno = 336 (0x150), region = 32  ;;  %2209 = vst [vmem:[#allocation2_spill] sm:$0xff] (!%p138_p2), %v1703_v0  ;;  %2210 = vst [vmem:[#allocation3_spill] sm:$0xff] (!%p138_p2), %v1708_v1  ;;  %v1718_v3 = vld [vmem:[%s2205_s1 + $0x18] sm:$0xff] (!%p138_p2)  ;;  %v1723_v4 = vld [vmem:[%s2205_s1 + $0x20] sm:$0xff] (!%p138_p2) }
   0x7   : > { %2211 = vst [vmem:[#allocation4_spill] sm:$0xff] (!%p138_p2), %v1713_v2  ;;  %2212 = vst [vmem:[#allocation5_spill] sm:$0xff] (!%p138_p2), %v1718_v3  ;;  %v1728_v5 = vld [vmem:[%s2205_s1 + $0x28] sm:$0xff] (!%p138_p2)  ;;  %v1733_v6 = vld [vmem:[%s2205_s1 + $0x30] sm:$0xff] (!%p138_p2) }
   0x8   : > { %2213 = vst [vmem:[#allocation6_spill] sm:$0xff] (!%p138_p2), %v1723_v4  ;;  %2214 = vst [vmem:[#allocation7_spill] sm:$0xff] (!%p138_p2), %v1728_v5  ;;  %v1738_v7 = vld [vmem:[%s2205_s1 + $0x38] sm:$0xff] (!%p138_p2)  ;;  %v1743_v8 = vld [vmem:[%s2205_s1 + $0x40] sm:$0xff] (!%p138_p2) }
   0x9   : > { %2215 = vst [vmem:[#allocation8_spill] sm:$0xff] (!%p138_p2), %v1733_v6  ;;  %2216 = vst [vmem:[#allocation9_spill] sm:$0xff] (!%p138_p2), %v1738_v7  ;;  %v1748_v9 = vld [vmem:[%s2205_s1 + $0x48] sm:$0xff] (!%p138_p2)  ;;  %v1753_v10 = vld [vmem:[%s2205_s1 + $0x50] sm:$0xff] (!%p138_p2) }
   0xa   : > { %2217 = vst [vmem:[#allocation10_spill] sm:$0xff] (!%p138_p2), %v1743_v8  ;;  %2218 = vst [vmem:[#allocation11_spill] sm:$0xff] (!%p138_p2), %v1748_v9  ;;  %v1758_v11 = vld [vmem:[%s2205_s1 + $0x58] sm:$0xff] (!%p138_p2)  ;;  %v1763_v12 = vld [vmem:[%s2205_s1 + $0x60] sm:$0xff] (!%p138_p2) }
   0xb   : > { %2219 = vst [vmem:[#allocation12_spill] sm:$0xff] (!%p138_p2), %v1753_v10  ;;  %2220 = vst [vmem:[#allocation13_spill] sm:$0xff] (!%p138_p2), %v1758_v11  ;;  %v1768_v13 = vld [vmem:[%s2205_s1 + $0x68] sm:$0xff] (!%p138_p2)  ;;  %v1773_v14 = vld [vmem:[%s2205_s1 + $0x70] sm:$0xff] (!%p138_p2) }
   0xc   : > { %v1778_v15 = vld [vmem:[%s2205_s1 + $0x78] sm:$0xff] (!%p138_p2)  ;;  %v1783_v16 = vld [vmem:[%s2205_s1 + $0x80] sm:$0xff] (!%p138_p2)  ;;  %v1788_v17 = vld [vmem:[%s2205_s1 + $0x88] sm:$0xff] (!%p138_p2) }
   0xd   : > { %s2260_s13 = smov (!%p161_p3, %s1112_s13), 1  ;;  %v1798_v18 = vld [vmem:[%s2205_s1 + $0x90] sm:$0xff]  ;;  %v1803_v19 = vld [vmem:[%s2205_s1 + $0x98] sm:$0xff]  ;;  %v1808_v20 = vld [vmem:[%s2205_s1 + $0xa0] sm:$0xff] }
   0xe   : > { %s1638_s11 = smul.u32 312, %s2260_s13  ;;  %v1818_v21 = vld [vmem:[%s2205_s1 + $0xa8] sm:$0xff]  ;;  %v1823_v22 = vld [vmem:[%s2205_s1 + $0xb0] sm:$0xff]  ;;  %v1828_v23 = vld [vmem:[%s2205_s1 + $0xb8] sm:$0xff] }
   0xf   : > { %s1639_s20 = smul.u32 176, %s2260_s13  ;;  %v1833_v24 = vld [vmem:[%s2205_s1 + $0xc0] sm:$0xff]  ;;  %v1838_v25 = vld [vmem:[%s2205_s1 + $0xc8] sm:$0xff]  ;;  %v1843_v26 = vld [vmem:[%s2205_s1 + $0xd0] sm:$0xff] }
  0x10   : > { %s1793_s29 = scalar_lea.vmem %s2204_s0, %s1638_s11  ;;  %v1848_v27 = vld [vmem:[%s2205_s1 + $0xd8] sm:$0xff]  ;;  %v1853_v28 = vld [vmem:[%s2205_s1 + $0xe0] sm:$0xff]  ;;  %v1858_v29 = vld [vmem:[%s2205_s1 + $0xe8] sm:$0xff] }
  0x11   : > { %s1813_s10 = scalar_lea.vmem %s2207_s3, %s1639_s20  ;;  %v1863_v30 = vld [vmem:[%s2205_s1 + $0xf0] sm:$0xff]  ;;  %v1868_v31 = vld [vmem:[%s2205_s1 + $0xf8] sm:$0xff]  ;;  %v1873_v32 = vld [vmem:[%s2205_s1 + $0x100] sm:$0xff]  ;;  %s2075_s20 = smov 0  }
  0x12   : > { %2221 = vst [vmem:[#allocation14_spill] sm:$0xff] %v1863_v30  ;;  %2222 = vst [vmem:[#allocation15_spill] sm:$0xff] %v1868_v31  ;;  %v1878_v33 = vld [vmem:[%s2205_s1 + $0x108] sm:$0xff]  ;;  %v1883_v34 = vld [vmem:[%s2205_s1 + $0x110] sm:$0xff] }
  0x13   : > { %v1888_v35 = vld [vmem:[%s2205_s1 + $0x118] sm:$0xff]  ;;  %v1893_v36 = vld [vmem:[%s2205_s1 + $0x120] sm:$0xff]  ;;  %v1898_v37 = vld [vmem:[%s2205_s1 + $0x128] sm:$0xff] }
  0x14   : > { %v1903_v38 = vld [vmem:[%s2205_s1 + $0x130] sm:$0xff]  ;;  %v1908_v39 = vld [vmem:[%s2205_s1 + $0x138] sm:$0xff]  ;;  %v1913_v40 = vld [vmem:[%s2205_s1 + $0x140] sm:$0xff] }
  0x15   : > { %v1918_v41 = vld [vmem:[%s2205_s1 + $0x148] sm:$0xff]  ;;  %v1923_v42 = vld [vmem:[%s2205_s1 + $0x150] sm:$0xff]  ;;  %v1928_v43 = vld [vmem:[%s2205_s1 + $0x158] sm:$0xff] }
  0x16   : > { %v1933_v44 = vld [vmem:[%s2205_s1 + $0x160] sm:$0xff]  ;;  %v1938_v45 = vld [vmem:[%s2205_s1 + $0x168] sm:$0xff]  ;;  %v1943_v46 = vld [vmem:[%s2205_s1 + $0x170] sm:$0xff] }
  0x17   : > { %v1948_v47 = vld [vmem:[%s2205_s1 + $0x178] sm:$0xff]  ;;  %v1953_v48 = vld [vmem:[%s2205_s1 + $0x180] sm:$0xff]  ;;  %v1958_v49 = vld [vmem:[%s2205_s1 + $0x188] sm:$0xff] }
  0x18   : > { %v1963_v50 = vld [vmem:[%s2205_s1 + $0x190] sm:$0xff]  ;;  %v1968_v51 = vld [vmem:[%s2205_s1 + $0x198] sm:$0xff]  ;;  %v1973_v52 = vld [vmem:[%s2205_s1 + $0x1a0] sm:$0xff] }
  0x19   : > { %v1978_v53 = vld [vmem:[%s2205_s1 + $0x1a8] sm:$0xff]  ;;  %v1983_v54 = vld [vmem:[%s2205_s1 + $0x1b0] sm:$0xff]  ;;  %v1988_v55 = vld [vmem:[%s2205_s1 + $0x1b8] sm:$0xff] }
  0x1a   : > { %v1993_v56 = vld [vmem:[%s2205_s1 + $0x1c0] sm:$0xff]  ;;  %v1998_v57 = vld [vmem:[%s2205_s1 + $0x1c8] sm:$0xff]  ;;  %v2003_v58 = vld [vmem:[%s2205_s1 + $0x1d0] sm:$0xff] }
  0x1b   : > { %v2008_v59 = vld [vmem:[%s2205_s1 + $0x1d8] sm:$0xff]  ;;  %v2013_v60 = vld [vmem:[%s2205_s1 + $0x1e0] sm:$0xff]  ;;  %v2018_v61 = vld [vmem:[%s2205_s1 + $0x1e8] sm:$0xff] }
  0x1c   : > { %2223 = vst [vmem:[#allocation16_spill] sm:$0xff] %v2018_v61  ;;  %v2023_v62 = vld [vmem:[%s2205_s1 + $0x1f0] sm:$0xff]  ;;  %v2028_v63 = vld [vmem:[%s2205_s1 + $0x1f8] sm:$0xff]  ;;  %v2033_v31 = vld [vmem:[%s2205_s1 + $0x200] sm:$0xff] }
  0x1d   : > { %2224 = vst [vmem:[#allocation17_spill] sm:$0xff] %v2023_v62  ;;  %2225 = vst [vmem:[#allocation18_spill] sm:$0xff] %v2028_v63  ;;  %v2038_v30 = vld [vmem:[%s2205_s1 + $0x208] sm:$0xff]  ;;  %v2043_v61 = vld [vmem:[%s2205_s1 + $0x210] sm:$0xff] }
  0x1e   : > { %2226 = vst [vmem:[#allocation19_spill] sm:$0xff] %v2033_v31  ;;  %2227 = vst [vmem:[#allocation20_spill] sm:$0xff] %v2038_v30  ;;  %v2048_v62 = vld [vmem:[%s2205_s1 + $0x218] sm:$0xff]  ;;  %v2053_v63 = vld [vmem:[%s2205_s1 + $0x220] sm:$0xff] }
  0x1f   : > { %2228 = vst [vmem:[#allocation21_spill] sm:$0xff] %v2043_v61  ;;  %2229 = vst [vmem:[#allocation22_spill] sm:$0xff] %v2048_v62  ;;  %v2058_v31 = vld [vmem:[%s2205_s1 + $0x228] sm:$0xff]  ;;  %v2063_v30 = vld [vmem:[%s2205_s1 + $0x230] sm:$0xff] }
  0x20   : > { %2230 = vst [vmem:[#allocation23_spill] sm:$0xff] %v2058_v31  ;;  %2231 = vst [vmem:[#allocation24_spill] sm:$0xff] %v2063_v30  ;;  %v2068_v61 = vld [vmem:[%s2205_s1 + $0x238] sm:$0xff]  ;;  %v2073_v62 = vld [vmem:[%s2206_s2] ss:$0 sm:$0xff] }
  0x21   : > { %2232 = vst [vmem:[#allocation25_spill] sm:$0xff] %v2068_v61  ;;  %2233 = vst [vmem:[#allocation26_spill] sm:$0xff] %v2073_v62 }
  0x22 LB: >> { %v2234_v8 = vld [vmem:[#allocation10_spill] sm:$0xff]  ;;  %v2235_v9 = vld [vmem:[#allocation11_spill] sm:$0xff]  ;;  %v1542_v61 = vpack.c.bf16 %v1878_v33, %v1873_v32  ;;  %v2236_v10 = vld [vmem:[#allocation12_spill] sm:$0xff]  ;;  %v1546_v62 = vpack.c.bf16 %v1888_v35, %v1883_v34  ;;  %s258_s22 = smul.u32 24, %s1670_s20  ;;  %vm264_vm0 = vcmask 523264   ;;  %s1214_s24 = sshll.u32 %s1670_s20, 4  ;;  %s1670_s20 = sphi %s2075_s20, %s257_s20  }
  0x23   : >> { %v1478_v30 = vpack.c.bf16 %v2235_v9, %v2234_v8  ;;  %v2237_v11 = vld [vmem:[#allocation13_spill] sm:$0xff]  ;;  %v1486_v8 = vpack.c.bf16 %v1768_v13, %v1763_v12  ;;  %v1550_v9 = vpack.c.bf16 %v1898_v37, %v1893_v36  ;;  %v2238_v0 = vld [vmem:[#allocation2_spill] sm:$0xff]  ;;  %v2239_v1 = vld [vmem:[#allocation3_spill] sm:$0xff]  ;;  %s1039_s25 = scalar_lea.vmem %s1813_s10, %s1214_s24  ;;  %s257_s20 = sadd.s32 1, %s1670_s20  }
  0x24   : >> { %v1482_v31 = vpack.c.bf16 %v2237_v11, %v2236_v10  ;;  %1543 = vmatprep.subr.bf16.mxu0 %v1542_v61  ;;  %s2094_s23 = scalar_lea.vmem %s1793_s29, %s258_s22  ;;  %v2240_v2 = vld [vmem:[#allocation4_spill] sm:$0xff]  ;;  %v2241_v3 = vld [vmem:[#allocation5_spill] sm:$0xff]  ;;  %v2242_v4 = vld [vmem:[#allocation6_spill] sm:$0xff]  ;;  %p254_p4 = scmp.ge.s32.totalorder %s257_s20, 11  }
  0x25   : >> { %1479 = vmatprep.subr.bf16.mxu1 %v1478_v30  ;;  %1545 = vmatpush3.bf16.msra.mxu0 %v1542_v61  ;;  %v262_v10 = vld [vmem:[%s2094_s23 + $0x1] sm:$0xff]  ;;  %v1193_v11 = vld [vmem:[%s2094_s23 + $0x19] sm:$0xff]  ;;  %v1554_v61 = vpack.c.bf16 %v1908_v39, %v1903_v38  ;;  %v2244_v6 = vld [vmem:[#allocation8_spill] sm:$0xff] }
  0x26   : >> { %1481 = vmatpush3.bf16.msra.mxu1 %v1478_v30  ;;  %1547 = vmatprep.subr.bf16.mxu0 %v1546_v62  ;;  %v1490_v30 = vpack.c.bf16 %v1778_v15, %v1773_v14  ;;  %v2243_v5 = vld [vmem:[#allocation7_spill] sm:$0xff]  ;;  %v2245_v7 = vld [vmem:[#allocation9_spill] sm:$0xff] }
  0x27   : >> { %1483 = vmatprep.subr.bf16.mxu1 %v1482_v31  ;;  %1323 = vmatprep.mubr.msk.f32.mxu1 %vm264_vm0, %v262_v10  ;;  %v1494_v10 = vpack.c.bf16 %v2239_v1, %v2238_v0  ;;  %v260_v0 = vld [vmem:[%s2094_s23] sm:$0xff] }
  0x28   : >> { %1399 = vmatprep.mubr.msk.f32.mxu0 %vm264_vm0, %v1193_v11  ;;  %v1558_v11 = vpack.c.bf16 %v1918_v41, %v1913_v40  ;;  %v1197_v1 = vld [vmem:[%s2094_s23 + $0x1a] sm:$0xff] }
  0x29   : >> { %1549 = vmatpush3.bf16.msra.mxu0 %v1546_v62  ;;  %v1194_v62 = vld [vmem:[%s2094_s23 + $0x21] sm:$0xff] }
  0x2a   : >> { %1485 = vmatpush3.bf16.msra.mxu1 %v1482_v31  ;;  %1551 = vmatprep.subr.bf16.mxu0 %v1550_v9  ;;  %v263_v31 = vld [vmem:[%s2094_s23 + $0x9] sm:$0xff] }
  0x2b   : >> { %1487 = vmatprep.subr.bf16.mxu1 %v1486_v8 }
  0x2d   : >> { %1553 = vmatpush3.bf16.msra.mxu0 %v1550_v9  ;;  %v1562_v9 = vpack.c.bf16 %v1928_v43, %v1923_v42 }
  0x2e   : >> { %1489 = vmatpush3.bf16.msra.mxu1 %v1486_v8  ;;  %1555 = vmatprep.subr.bf16.mxu0 %v1554_v61  ;;  %v1498_v8 = vpack.c.bf16 %v2241_v3, %v2240_v2  ;;  %v2250_v3 = vld [vmem:[#allocation18_spill] sm:$0xff] }
  0x2f   : >> { %1491 = vmatprep.subr.bf16.mxu1 %v1490_v30 }
  0x31   : >> { %1557 = vmatpush3.bf16.msra.mxu0 %v1554_v61  ;;  %v1566_v61 = vpack.c.bf16 %v1938_v45, %v1933_v44 }
  0x32   : >> { %1493 = vmatpush3.bf16.msra.mxu1 %v1490_v30  ;;  %1559 = vmatprep.subr.bf16.mxu0 %v1558_v11  ;;  %v1502_v30 = vpack.c.bf16 %v2243_v5, %v2242_v4 }
  0x33   : >> { %1495 = vmatprep.subr.bf16.mxu1 %v1494_v10 }
  0x34   : >> { %1400 = vmatmul.mubr.msk.f32.vlgmr.msra.gmra.mrb[0].mxu0 %vm264_vm0, %v1194_v62  ;;  %v1198_v62 = vld [vmem:[%s2094_s23 + $0x22] sm:$0xff] }
  0x35   : >> { %1324 = vmatmul.mubr.msk.f32.vlgmr.msra.gmra.mrb[0].mxu1 %vm264_vm0, %v263_v31  ;;  %1561 = vmatpush3.bf16.msra.mxu0 %v1558_v11  ;;  %v1570_v11 = vpack.c.bf16 %v1948_v47, %v1943_v46  ;;  %v261_v31 = vld [vmem:[%s2094_s23 + $0x8] sm:$0xff] }
  0x36   : >> { %1497 = vmatpush3.bf16.msra.mxu1 %v1494_v10  ;;  %1563 = vmatprep.subr.bf16.mxu0 %v1562_v9  ;;  %v1506_v10 = vpack.c.bf16 %v2245_v7, %v2244_v6  ;;  %v2254_v6 = vld [vmem:[#allocation22_spill] sm:$0xff] }
  0x37   : >> { %1499 = vmatprep.subr.bf16.mxu1 %v1498_v8  ;;  %1342 = vmatprep.mubr.msk.f32.mxu1 %vm264_vm0, %v260_v0  ;;  %v1510_v0 = vpack.c.bf16 %v1788_v17, %v1783_v16 }
  0x38   : >> { %1418 = vmatprep.mubr.msk.f32.mxu0 %vm264_vm0, %v1197_v1  ;;  %v1574_v1 = vpack.c.bf16 %v1958_v49, %v1953_v48 }
  0x39   : >> { %1565 = vmatpush3.bf16.msra.mxu0 %v1562_v9  ;;  %v1578_v9 = vpack.c.bf16 %v1968_v51, %v1963_v50 }
  0x3a   : >> { %1501 = vmatpush3.bf16.msra.mxu1 %v1498_v8  ;;  %1567 = vmatprep.subr.bf16.mxu0 %v1566_v61  ;;  %v1514_v8 = vpack.c.bf16 %v1803_v19, %v1798_v18 }
  0x3b   : >> { %1503 = vmatprep.subr.bf16.mxu1 %v1502_v30 }
  0x3d   : >> { %1569 = vmatpush3.bf16.msra.mxu0 %v1566_v61  ;;  %v1201_v61 = vld [vmem:[%s2094_s23 + $0x30] sm:$0xff] }
  0x3e   : >> { %1505 = vmatpush3.bf16.msra.mxu1 %v1502_v30  ;;  %1571 = vmatprep.subr.bf16.mxu0 %v1570_v11  ;;  %v427_v30 = vld [vmem:[%s2094_s23 + $0x2] sm:$0xff] }
  0x3f   : >> { %1507 = vmatprep.subr.bf16.mxu1 %v1506_v10 }
  0x41   : >> { %1573 = vmatpush3.bf16.msra.mxu0 %v1570_v11  ;;  %v1582_v11 = vpack.c.bf16 %v1978_v53, %v1973_v52 }
  0x42   : >> { %1509 = vmatpush3.bf16.msra.mxu1 %v1506_v10  ;;  %1575 = vmatprep.subr.bf16.mxu0 %v1574_v1  ;;  %v1518_v10 = vpack.c.bf16 %v1818_v21, %v1808_v20 }
  0x43   : >> { %1511 = vmatprep.subr.bf16.mxu1 %v1510_v0 }
  0x44   : >> { %1419 = vmatmul.mubr.msk.f32.vlgmr.msra.gmra.mrb[0].mxu0 %vm264_vm0, %v1198_v62  ;;  %v1590_v62 = vpack.c.bf16 %v1998_v57, %v1993_v56 }
  0x45   : >> { %1343 = vmatmul.mubr.msk.f32.vlgmr.msra.gmra.mrb[0].mxu1 %vm264_vm0, %v261_v31  ;;  %1577 = vmatpush3.bf16.msra.mxu0 %v1574_v1  ;;  %v1586_v1 = vpack.c.bf16 %v1988_v55, %v1983_v54  ;;  %v1526_v31 = vpack.c.bf16 %v1838_v25, %v1833_v24 }
  0x46   : >> { %1513 = vmatpush3.bf16.msra.mxu1 %v1510_v0  ;;  %1579 = vmatprep.subr.bf16.mxu0 %v1578_v9  ;;  %v1522_v0 = vpack.c.bf16 %v1828_v23, %v1823_v22 }
  0x47   : >> { %1515 = vmatprep.subr.bf16.mxu1 %v1514_v8  ;;  %1361 = vmatprep.mubr.msk.f32.mxu1 %vm264_vm0, %v427_v30  ;;  %v1530_v30 = vpack.c.bf16 %v1848_v27, %v1843_v26 }
  0x48   : >> { %1437 = vmatprep.mubr.msk.f32.mxu0 %vm264_vm0, %v1201_v61  ;;  %v1594_v61 = vpack.c.bf16 %v2008_v59, %v2003_v58 }
  0x49   : >> { %1581 = vmatpush3.bf16.msra.mxu0 %v1578_v9  ;;  %v1202_v9 = vld [vmem:[%s2094_s23 + $0x38] sm:$0xff] }
  0x4a   : >> { %1517 = vmatpush3.bf16.msra.mxu1 %v1514_v8  ;;  %1583 = vmatprep.subr.bf16.mxu0 %v1582_v11  ;;  %v428_v8 = vld [vmem:[%s2094_s23 + $0xa] sm:$0xff] }
  0x4b   : >> { %1519 = vmatprep.subr.bf16.mxu1 %v1518_v10 }
  0x4d   : >> { %1585 = vmatpush3.bf16.msra.mxu0 %v1582_v11  ;;  %v1205_v11 = vld [vmem:[%s2094_s23 + $0x31] sm:$0xff] }
  0x4e   : >> { %1521 = vmatpush3.bf16.msra.mxu1 %v1518_v10  ;;  %1587 = vmatprep.subr.bf16.mxu0 %v1586_v1  ;;  %v1189_v10 = vld [vmem:[%s2094_s23 + $0x18] sm:$0xff] }
  0x4f   : >> { %1523 = vmatprep.subr.bf16.mxu1 %v1522_v0 }
  0x51   : >> { %1589 = vmatpush3.bf16.msra.mxu0 %v1586_v1  ;;  %v2246_v1 = vld [vmem:[#allocation16_spill] sm:$0xff] }
  0x52   : >> { %1525 = vmatpush3.bf16.msra.mxu1 %v1522_v0  ;;  %1591 = vmatprep.subr.bf16.mxu0 %v1590_v62  ;;  %v1534_v0 = vpack.c.bf16 %v1858_v29, %v1853_v28  ;;  %v1598_v2 = vpack.c.bf16 %v2246_v1, %v2013_v60  ;;  %v2251_v1 = vld [vmem:[#allocation19_spill] sm:$0xff] }
  0x53   : >> { %1527 = vmatprep.subr.bf16.mxu1 %v1526_v31 }
  0x54   : >> { %1438 = vmatmul.mubr.msk.f32.vlgmr.msra.gmra.mrb[0].mxu0 %vm264_vm0, %v1202_v9  ;;  %v2249_v9 = vld [vmem:[#allocation17_spill] sm:$0xff] }
  0x55   : >> { %1362 = vmatmul.mubr.msk.f32.vlgmr.msra.gmra.mrb[0].mxu1 %vm264_vm0, %v428_v8  ;;  %1593 = vmatpush3.bf16.msra.mxu0 %v1590_v62  ;;  %v2248_v62 = vld [vmem:[#allocation15_spill] sm:$0xff]  ;;  %v1602_v4 = vpack.c.bf16 %v2250_v3, %v2249_v9 }
  0x56   : >> { %1529 = vmatpush3.bf16.msra.mxu1 %v1526_v31  ;;  %1595 = vmatprep.subr.bf16.mxu0 %v1594_v61  ;;  %v2247_v31 = vld [vmem:[#allocation14_spill] sm:$0xff] }
  0x57   : >> { %1531 = vmatprep.subr.bf16.mxu1 %v1530_v30  ;;  %1380 = vmatprep.mubr.msk.f32.mxu1 %vm264_vm0, %v1189_v10  ;;  %v1538_v8 = vpack.c.bf16 %v2248_v62, %v2247_v31  ;;  %v2252_v10 = vld [vmem:[#allocation20_spill] sm:$0xff] }
  0x58   : >> { %1456 = vmatprep.mubr.msk.f32.mxu0 %vm264_vm0, %v1205_v11  ;;  %v1606_v5 = vpack.c.bf16 %v2252_v10, %v2251_v1  ;;  %v2253_v11 = vld [vmem:[#allocation21_spill] sm:$0xff] }
  0x59   : >> { %1597 = vmatpush3.bf16.msra.mxu0 %v1594_v61  ;;  %v1206_v61 = vld [vmem:[%s2094_s23 + $0x39] sm:$0xff]  ;;  %v1610_v7 = vpack.c.bf16 %v2254_v6, %v2253_v11 }
  0x5a   : >> { %1533 = vmatpush3.bf16.msra.mxu1 %v1530_v30  ;;  %1599 = vmatprep.subr.bf16.mxu0 %v1598_v2  ;;  %v1190_v30 = vld [vmem:[%s2094_s23 + $0x20] sm:$0xff]  ;;  %v1209_v31 = vld [vmem:[%s2094_s23 + $0x32] sm:$0xff] }
  0x5b   : >> { %1535 = vmatprep.subr.bf16.mxu1 %v1534_v0  ;;  %v1210_v6 = vld [vmem:[%s2094_s23 + $0x3a] sm:$0xff] }
  0x5d   : >> { %1601 = vmatpush3.bf16.msra.mxu0 %v1598_v2  ;;  %v2255_v2 = vld [vmem:[#allocation23_spill] sm:$0xff] }
  0x5e   : >> { %1537 = vmatpush3.bf16.msra.mxu1 %v1534_v0  ;;  %1603 = vmatprep.subr.bf16.mxu0 %v1602_v4  ;;  %v1614_v3 = vpack.c.bf16 %v2255_v2, %v2053_v63  ;;  %v2257_v0 = vld [vmem:[#allocation25_spill] sm:$0xff] }
  0x5f   : >> { %1539 = vmatprep.subr.bf16.mxu1 %v1538_v8 }
  0x61   : >> { %1605 = vmatpush3.bf16.msra.mxu0 %v1602_v4  ;;  %v2256_v4 = vld [vmem:[#allocation24_spill] sm:$0xff] }
  0x62   : >> { %1541 = vmatpush3.bf16.msra.mxu1 %v1538_v8  ;;  %1607 = vmatprep.subr.bf16.mxu0 %v1606_v5  ;;  %v1618_v62 = vpack.c.bf16 %v2257_v0, %v2256_v4 }
  0x64   : >> { %1457 = vmatmul.mubr.msk.f32.vlgmr.msra.gmra.mrb[0].mxu0 %vm264_vm0, %v1206_v61  ;;  %v2258_v61 = vld [vmem:[#allocation26_spill] sm:$0xff] }
  0x65   : >> { %1381 = vmatmul.mubr.msk.f32.vlgmr.msra.gmra.mrb[0].mxu1 %vm264_vm0, %v1190_v30  ;;  %1609 = vmatpush3.bf16.msra.mxu0 %v1606_v5 }
  0x66   : >> { %1475 = vmatprep.mubr.msk.f32.mxu0 %vm264_vm0, %v1209_v31  ;;  %1611 = vmatprep.subr.bf16.mxu0 %v1610_v7 }
  0x69   : >> { %1613 = vmatpush3.bf16.msra.mxu0 %v1610_v7 }
  0x6a   : >> { %1615 = vmatprep.subr.bf16.mxu0 %v1614_v3 }
  0x6d   : >> { %1617 = vmatpush3.bf16.msra.mxu0 %v1614_v3 }
  0x6e   : >> { %1619 = vmatprep.subr.bf16.mxu0 %v1618_v62 }
  0x71   : >> { %1621 = vmatpush3.bf16.msra.mxu0 %v1618_v62 }
  0x74   : >> { %1476 = vmatmul.mubr.msk.f32.vlgmr.msra.gmra.mrb[0].mxu0 %vm264_vm0, %v1210_v6 }
 0x138   : >> { %v1382_v5 = vpop.f32.mrb[0].mxu1 }
 0x139   : >> { %v589_v8 = vpop.f32.mrb[1].mxu1 }
 0x147   : >> { %v1477_v9 = vpop.f32.mrb[0].mxu0 }
 0x148   : >> { %v1622_v1 = vadd.f32 %v1477_v9, %v1382_v5  ;;  %v1017_v10 = vpop.f32.mrb[1].mxu0 }
 0x149   : >> { %v1623_v30 = vadd.f32 %v1017_v10, %v589_v8  ;;  %256 = sbr.rel (!%p254_p4) target bundleno = 34 (0x22), region = 81 }
 0x14a   : >> { %v1035_v7 = vadd.f32 %v1622_v1, %v2258_v61 }
 0x14b   : >> { %v1034_v11 = vadd.f32 %v1623_v30, %v2258_v61 }
 0x14c   : >> { %v1037_v31 = vmax.f32 %v1035_v7, 0.0 }
 0x14d   : >> { %v1036_v2 = vmax.f32 %v1034_v11, 0.0 }
 0x14e   : >> { %1041 = vst.msk [vmem:[%s1039_s25 + $0x8] sm:$0xff] %vm264_vm0, %v1037_v31 }
 0x14f   : >> { %1040 = vst.msk [vmem:[%s1039_s25] sm:$0xff] %vm264_vm0, %v1036_v2 }
 0x150 PF: > { %s13_s12 = sadd.s32 1, %s1666_s12  }
 0x151   : > { %p10_p5 = scmp.ge.s32.totalorder %s13_s12, 4  }
 0x153   :  { %12 = sbr.rel (!%p10_p5) target bundleno = 1 (0x1), region = 92 }

// kernel: nature_cnn_forward.7
= control target key start
LH: loop header
LB: loop body
LE: loop exit
PB: predicated region body
PF: predicated region fallthrough
CT: control target
= control target key end

     0   :  { %s1940_s0 = inlined_call_operand.vmem [shape: f32[2,11264], index: 0, kind: input, shape index: {}]   ;;  %s1941_s1 = inlined_call_operand.vmem [shape: f32[11264,512], index: 1, kind: input, shape index: {}]   ;;  %s1942_s2 = inlined_call_operand.vmem [shape: f32[1,512], index: 2, kind: input, shape index: {}]   ;;  %s1943_s3 = inlined_call_operand.hbm [shape: f32[2,512], index: 3, kind: output, shape index: {}]  }
   0x1   :  { %1945 = sst [smem:[#allocation7_spill]] %s1941_s1 }
   0x2   :  { %8 = vsyncpa [#allocation5], 0 }
   0x3   :  { %10 = vsyncpa [#allocation5 + $0x1], 0  ;;  %s1337_s12 = smov 0   ;;  %s1339_s13 = smov 0  }
   0x4   :  { %s1341_s14 = smov 0   ;;  %s1343_s15 = smov 0  }
   0x5   :  { %s1345_s16 = smov 0   ;;  %s1347_s17 = smov 0  }
   0x6   :  { %s1349_s18 = smov 0   ;;  %s1351_s19 = smov 0  }
   0x7   :  { %s1353_s20 = smov 0   ;;  %s1355_s21 = smov 0  }
   0x8 LB: > { %s958_s22 = sadd.s32 4294967295, %s1312_s21   ;;  %s959_s23 = sadd.s32 4294967294, %s1312_s21   ;;  %s1312_s21 = sphi %s1355_s21, %s16_s21   ;;  %s1308_s20 = sphi %s1353_s20, %s1959_s20   ;;  %s1304_s19 = sphi %s1351_s19, %s1958_s19   ;;  %s1300_s18 = sphi %s1349_s18, %s1957_s18   ;;  %s1296_s17 = sphi %s1347_s17, %s1956_s17   ;;  %s1292_s16 = sphi %s1345_s16, %s1955_s16   ;;  %s1288_s15 = sphi %s1343_s15, %s1954_s15   ;;  %s1284_s14 = sphi %s1341_s14, %s1953_s14   ;;  %s1280_s13 = sphi %s1339_s13, %s1952_s13   ;;  %s1276_s12 = sphi %s1337_s12, %s1951_s12  }
   0x9   : > { %s25_s24 = sadd.s32 1, %s1304_s19  ;;  %s28_s25 = sadd.s32 1, %s1308_s20 }
   0xa   : > { %p26_p0 = scmp.ge.s32.totalorder %s25_s24, 22  ;;  %s63_s26 = sadd.s32 1, %s1292_s16 }
   0xb   : > { %p70_p1 = scmp.ne.s32.totalorder %s1292_s16, %s1288_s15  ;;  %p71_p2 = scmp.eq.s32.totalorder %s1312_s21, 0 }
   0xc   : > { %s1961_s24 = smov (%p26_p0, %s25_s24), 0  ;;  %s1963_s25 = smov (!%p26_p0, %s28_s25), %s1308_s20 }
   0xd   : > { %s58_s27 = ssub.s32 %s1304_s19, %s1961_s24  ;;  %p1400_p3 = por %p71_p2, %p70_p1 }
   0xe   : > { %p30_p4 = scmp.ge.s32.totalorder %s1963_s25, 2  ;;  %s115_s29 = sadd.s32 1, %s1284_s14 }
   0xf   : > { %p125_p5 = scmp.ne.s32.totalorder %s1284_s14, %s1280_s13  ;;  %p126_p6 = scmp.eq.s32.totalorder %s958_s22, 43 }
  0x10   : > { %s1965_s25 = smov (%p30_p4, %s1963_s25), 0  ;;  %p131_p8 = scmp.ne.s32.totalorder %s1280_s13, %s1276_s12 }
  0x11   : > { %p1409_p7 = por %p126_p6, %p125_p5  ;;  %s59_s4 = ssub.s32 %s1308_s20, %s1965_s25 }
  0x12   : > { %p132_p9 = scmp.eq.s32.totalorder %s959_s23, 43  ;;  %s60_s5 = sor.u32 %s59_s4, %s58_s27 }
  0x13   : > { %p113_p10 = scmp.eq.s32.totalorder %s59_s4, 0  ;;  %p61_p11 = scmp.eq.s32.totalorder %s60_s5, 0 }
  0x14   : > { %p1417_p12 = por %p132_p9, %p131_p8  ;;  %p961_p13 = scmp.ge.s32.totalorder %s1312_s21, 44 }
  0x15   : > { %s1422_s7 = scalar_select %p113_p10, %s1284_s14, %s115_s29  }
  0x16   : > { %s1425_s8 = scalar_select %p61_p11, %s1292_s16, %s63_s26  }
  0x17   : > { %148 = sbr.rel (%p961_p13) target bundleno = 104 (0x68), region = 16 }
  0x1e   : > { %160 = sbr.rel (!%p1400_p3) target bundleno = 104 (0x68), region = 24  ;;  %s162_s9 = sand.u32 (%p1400_p3), 1, %s1292_s16  }
  0x1f   : > { %s964_s10 = sshll.u32 (%p1400_p3), %s1308_s20, 1  ;;  %s962_s11 = sshll.u32 (%p1400_p3), %s162_s9, 10 }
  0x20   : > { %s980_s22 = sshll.u32 (%p1400_p3), %s1304_s19, 8  ;;  %s1949_s1 = sld [smem:[#allocation7_spill]] (%p1400_p3) }
  0x21   : > { %s168_s23 = sadd.s32 (%p1400_p3), %s980_s22, %s964_s10  ;;  %s1441_s28 = scalar_lea.vmem (%p1400_p3), [#allocation3], %s962_s11 }
  0x22   : > { %s966_s27 = sshll.u32 (%p1400_p3), %s168_s23, 3 }
  0x26   : > { %s1436_s26 = scalar_lea.vmem %s1949_s1, %s966_s27 }
  0x27   : > { %v183_v0 = vld [vmem:[%s1436_s26] sm:$0xff]  ;;  %v185_v1 = vld [vmem:[%s1436_s26 + $0x8] sm:$0xff] }
  0x28   : > { %v187_v2 = vld [vmem:[%s1436_s26 + $0x20] sm:$0xff]  ;;  %184 = vst [vmem:[%s1441_s28] sm:$0xff] %v183_v0  ;;  %186 = vst [vmem:[%s1441_s28 + $0x8] sm:$0xff] %v185_v1  ;;  %v189_v3 = vld [vmem:[%s1436_s26 + $0x28] sm:$0xff] }
  0x29   : > { %188 = vst [vmem:[%s1441_s28 + $0x10] sm:$0xff] %v187_v2  ;;  %v191_v4 = vld [vmem:[%s1436_s26 + $0x40] sm:$0xff]  ;;  %v193_v5 = vld [vmem:[%s1436_s26 + $0x48] sm:$0xff]  ;;  %190 = vst [vmem:[%s1441_s28 + $0x18] sm:$0xff] %v189_v3 }
  0x2a   : > { %192 = vst [vmem:[%s1441_s28 + $0x20] sm:$0xff] %v191_v4  ;;  %194 = vst [vmem:[%s1441_s28 + $0x28] sm:$0xff] %v193_v5  ;;  %v195_v6 = vld [vmem:[%s1436_s26 + $0x60] sm:$0xff]  ;;  %v197_v7 = vld [vmem:[%s1436_s26 + $0x68] sm:$0xff] }
  0x2b   : > { %v199_v8 = vld [vmem:[%s1436_s26 + $0x80] sm:$0xff]  ;;  %196 = vst [vmem:[%s1441_s28 + $0x30] sm:$0xff] %v195_v6  ;;  %198 = vst [vmem:[%s1441_s28 + $0x38] sm:$0xff] %v197_v7  ;;  %v201_v9 = vld [vmem:[%s1436_s26 + $0x88] sm:$0xff] }
  0x2c   : > { %200 = vst [vmem:[%s1441_s28 + $0x40] sm:$0xff] %v199_v8  ;;  %v203_v10 = vld [vmem:[%s1436_s26 + $0xa0] sm:$0xff]  ;;  %v205_v11 = vld [vmem:[%s1436_s26 + $0xa8] sm:$0xff]  ;;  %202 = vst [vmem:[%s1441_s28 + $0x48] sm:$0xff] %v201_v9 }
  0x2d   : > { %204 = vst [vmem:[%s1441_s28 + $0x50] sm:$0xff] %v203_v10  ;;  %206 = vst [vmem:[%s1441_s28 + $0x58] sm:$0xff] %v205_v11  ;;  %v207_v12 = vld [vmem:[%s1436_s26 + $0xc0] sm:$0xff]  ;;  %v209_v13 = vld [vmem:[%s1436_s26 + $0xc8] sm:$0xff] }
  0x2e   : > { %v211_v14 = vld [vmem:[%s1436_s26 + $0xe0] sm:$0xff]  ;;  %208 = vst [vmem:[%s1441_s28 + $0x60] sm:$0xff] %v207_v12  ;;  %210 = vst [vmem:[%s1441_s28 + $0x68] sm:$0xff] %v209_v13  ;;  %v213_v15 = vld [vmem:[%s1436_s26 + $0xe8] sm:$0xff] }
  0x2f   : > { %212 = vst [vmem:[%s1441_s28 + $0x70] sm:$0xff] %v211_v14  ;;  %v215_v16 = vld [vmem:[%s1436_s26 + $0x100] sm:$0xff]  ;;  %v217_v17 = vld [vmem:[%s1436_s26 + $0x108] sm:$0xff]  ;;  %214 = vst [vmem:[%s1441_s28 + $0x78] sm:$0xff] %v213_v15 }
  0x30   : > { %216 = vst [vmem:[%s1441_s28 + $0x80] sm:$0xff] %v215_v16  ;;  %218 = vst [vmem:[%s1441_s28 + $0x88] sm:$0xff] %v217_v17  ;;  %v219_v18 = vld [vmem:[%s1436_s26 + $0x120] sm:$0xff]  ;;  %v221_v19 = vld [vmem:[%s1436_s26 + $0x128] sm:$0xff] }
  0x31   : > { %v223_v20 = vld [vmem:[%s1436_s26 + $0x140] sm:$0xff]  ;;  %220 = vst [vmem:[%s1441_s28 + $0x90] sm:$0xff] %v219_v18  ;;  %222 = vst [vmem:[%s1441_s28 + $0x98] sm:$0xff] %v221_v19  ;;  %v225_v21 = vld [vmem:[%s1436_s26 + $0x148] sm:$0xff] }
  0x32   : > { %224 = vst [vmem:[%s1441_s28 + $0xa0] sm:$0xff] %v223_v20  ;;  %v227_v22 = vld [vmem:[%s1436_s26 + $0x160] sm:$0xff]  ;;  %v229_v23 = vld [vmem:[%s1436_s26 + $0x168] sm:$0xff]  ;;  %226 = vst [vmem:[%s1441_s28 + $0xa8] sm:$0xff] %v225_v21 }
  0x33   : > { %228 = vst [vmem:[%s1441_s28 + $0xb0] sm:$0xff] %v227_v22  ;;  %230 = vst [vmem:[%s1441_s28 + $0xb8] sm:$0xff] %v229_v23  ;;  %v231_v24 = vld [vmem:[%s1436_s26 + $0x180] sm:$0xff]  ;;  %v233_v25 = vld [vmem:[%s1436_s26 + $0x188] sm:$0xff] }
  0x34   : > { %v235_v26 = vld [vmem:[%s1436_s26 + $0x1a0] sm:$0xff]  ;;  %232 = vst [vmem:[%s1441_s28 + $0xc0] sm:$0xff] %v231_v24  ;;  %234 = vst [vmem:[%s1441_s28 + $0xc8] sm:$0xff] %v233_v25  ;;  %v237_v27 = vld [vmem:[%s1436_s26 + $0x1a8] sm:$0xff] }
  0x35   : > { %236 = vst [vmem:[%s1441_s28 + $0xd0] sm:$0xff] %v235_v26  ;;  %v239_v28 = vld [vmem:[%s1436_s26 + $0x1c0] sm:$0xff]  ;;  %v241_v29 = vld [vmem:[%s1436_s26 + $0x1c8] sm:$0xff]  ;;  %238 = vst [vmem:[%s1441_s28 + $0xd8] sm:$0xff] %v237_v27 }
  0x36   : > { %240 = vst [vmem:[%s1441_s28 + $0xe0] sm:$0xff] %v239_v28  ;;  %242 = vst [vmem:[%s1441_s28 + $0xe8] sm:$0xff] %v241_v29  ;;  %v243_v30 = vld [vmem:[%s1436_s26 + $0x1e0] sm:$0xff]  ;;  %v245_v31 = vld [vmem:[%s1436_s26 + $0x1e8] sm:$0xff] }
  0x37   : > { %v247_v32 = vld [vmem:[%s1436_s26 + $0x200] sm:$0xff]  ;;  %244 = vst [vmem:[%s1441_s28 + $0xf0] sm:$0xff] %v243_v30  ;;  %246 = vst [vmem:[%s1441_s28 + $0xf8] sm:$0xff] %v245_v31  ;;  %v249_v33 = vld [vmem:[%s1436_s26 + $0x208] sm:$0xff] }
  0x38   : > { %248 = vst [vmem:[%s1441_s28 + $0x100] sm:$0xff] %v247_v32  ;;  %v251_v34 = vld [vmem:[%s1436_s26 + $0x220] sm:$0xff]  ;;  %v253_v35 = vld [vmem:[%s1436_s26 + $0x228] sm:$0xff]  ;;  %250 = vst [vmem:[%s1441_s28 + $0x108] sm:$0xff] %v249_v33 }
  0x39   : > { %252 = vst [vmem:[%s1441_s28 + $0x110] sm:$0xff] %v251_v34  ;;  %254 = vst [vmem:[%s1441_s28 + $0x118] sm:$0xff] %v253_v35  ;;  %v255_v36 = vld [vmem:[%s1436_s26 + $0x240] sm:$0xff]  ;;  %v257_v37 = vld [vmem:[%s1436_s26 + $0x248] sm:$0xff] }
  0x3a   : > { %v259_v38 = vld [vmem:[%s1436_s26 + $0x260] sm:$0xff]  ;;  %256 = vst [vmem:[%s1441_s28 + $0x120] sm:$0xff] %v255_v36  ;;  %258 = vst [vmem:[%s1441_s28 + $0x128] sm:$0xff] %v257_v37  ;;  %v261_v39 = vld [vmem:[%s1436_s26 + $0x268] sm:$0xff] }
  0x3b   : > { %260 = vst [vmem:[%s1441_s28 + $0x130] sm:$0xff] %v259_v38  ;;  %v263_v40 = vld [vmem:[%s1436_s26 + $0x280] sm:$0xff]  ;;  %v265_v41 = vld [vmem:[%s1436_s26 + $0x288] sm:$0xff]  ;;  %262 = vst [vmem:[%s1441_s28 + $0x138] sm:$0xff] %v261_v39 }
  0x3c   : > { %264 = vst [vmem:[%s1441_s28 + $0x140] sm:$0xff] %v263_v40  ;;  %266 = vst [vmem:[%s1441_s28 + $0x148] sm:$0xff] %v265_v41  ;;  %v267_v42 = vld [vmem:[%s1436_s26 + $0x2a0] sm:$0xff]  ;;  %v269_v43 = vld [vmem:[%s1436_s26 + $0x2a8] sm:$0xff] }
  0x3d   : > { %v271_v44 = vld [vmem:[%s1436_s26 + $0x2c0] sm:$0xff]  ;;  %268 = vst [vmem:[%s1441_s28 + $0x150] sm:$0xff] %v267_v42  ;;  %270 = vst [vmem:[%s1441_s28 + $0x158] sm:$0xff] %v269_v43  ;;  %v273_v45 = vld [vmem:[%s1436_s26 + $0x2c8] sm:$0xff] }
  0x3e   : > { %272 = vst [vmem:[%s1441_s28 + $0x160] sm:$0xff] %v271_v44  ;;  %v275_v46 = vld [vmem:[%s1436_s26 + $0x2e0] sm:$0xff]  ;;  %v277_v47 = vld [vmem:[%s1436_s26 + $0x2e8] sm:$0xff]  ;;  %274 = vst [vmem:[%s1441_s28 + $0x168] sm:$0xff] %v273_v45 }
  0x3f   : > { %276 = vst [vmem:[%s1441_s28 + $0x170] sm:$0xff] %v275_v46  ;;  %278 = vst [vmem:[%s1441_s28 + $0x178] sm:$0xff] %v277_v47  ;;  %v279_v48 = vld [vmem:[%s1436_s26 + $0x300] sm:$0xff]  ;;  %v281_v49 = vld [vmem:[%s1436_s26 + $0x308] sm:$0xff] }
  0x40   : > { %v283_v50 = vld [vmem:[%s1436_s26 + $0x320] sm:$0xff]  ;;  %280 = vst [vmem:[%s1441_s28 + $0x180] sm:$0xff] %v279_v48  ;;  %282 = vst [vmem:[%s1441_s28 + $0x188] sm:$0xff] %v281_v49  ;;  %v285_v51 = vld [vmem:[%s1436_s26 + $0x328] sm:$0xff] }
  0x41   : > { %284 = vst [vmem:[%s1441_s28 + $0x190] sm:$0xff] %v283_v50  ;;  %v287_v52 = vld [vmem:[%s1436_s26 + $0x340] sm:$0xff]  ;;  %v289_v53 = vld [vmem:[%s1436_s26 + $0x348] sm:$0xff]  ;;  %286 = vst [vmem:[%s1441_s28 + $0x198] sm:$0xff] %v285_v51 }
  0x42   : > { %288 = vst [vmem:[%s1441_s28 + $0x1a0] sm:$0xff] %v287_v52  ;;  %290 = vst [vmem:[%s1441_s28 + $0x1a8] sm:$0xff] %v289_v53  ;;  %v291_v54 = vld [vmem:[%s1436_s26 + $0x360] sm:$0xff]  ;;  %v293_v55 = vld [vmem:[%s1436_s26 + $0x368] sm:$0xff] }
  0x43   : > { %v295_v56 = vld [vmem:[%s1436_s26 + $0x380] sm:$0xff]  ;;  %292 = vst [vmem:[%s1441_s28 + $0x1b0] sm:$0xff] %v291_v54  ;;  %294 = vst [vmem:[%s1441_s28 + $0x1b8] sm:$0xff] %v293_v55  ;;  %v297_v57 = vld [vmem:[%s1436_s26 + $0x388] sm:$0xff] }
  0x44   : > { %296 = vst [vmem:[%s1441_s28 + $0x1c0] sm:$0xff] %v295_v56  ;;  %v299_v58 = vld [vmem:[%s1436_s26 + $0x3a0] sm:$0xff]  ;;  %v301_v59 = vld [vmem:[%s1436_s26 + $0x3a8] sm:$0xff]  ;;  %298 = vst [vmem:[%s1441_s28 + $0x1c8] sm:$0xff] %v297_v57 }
  0x45   : > { %300 = vst [vmem:[%s1441_s28 + $0x1d0] sm:$0xff] %v299_v58  ;;  %302 = vst [vmem:[%s1441_s28 + $0x1d8] sm:$0xff] %v301_v59  ;;  %v303_v60 = vld [vmem:[%s1436_s26 + $0x3c0] sm:$0xff]  ;;  %v305_v61 = vld [vmem:[%s1436_s26 + $0x3c8] sm:$0xff] }
  0x46   : > { %v307_v62 = vld [vmem:[%s1436_s26 + $0x3e0] sm:$0xff]  ;;  %304 = vst [vmem:[%s1441_s28 + $0x1e0] sm:$0xff] %v303_v60  ;;  %306 = vst [vmem:[%s1441_s28 + $0x1e8] sm:$0xff] %v305_v61  ;;  %v309_v63 = vld [vmem:[%s1436_s26 + $0x3e8] sm:$0xff] }
  0x47   : > { %308 = vst [vmem:[%s1441_s28 + $0x1f0] sm:$0xff] %v307_v62  ;;  %v311_v0 = vld [vmem:[%s1436_s26 + $0x400] sm:$0xff]  ;;  %v313_v1 = vld [vmem:[%s1436_s26 + $0x408] sm:$0xff]  ;;  %310 = vst [vmem:[%s1441_s28 + $0x1f8] sm:$0xff] %v309_v63 }
  0x48   : > { %312 = vst [vmem:[%s1441_s28 + $0x200] sm:$0xff] %v311_v0  ;;  %314 = vst [vmem:[%s1441_s28 + $0x208] sm:$0xff] %v313_v1  ;;  %v315_v2 = vld [vmem:[%s1436_s26 + $0x420] sm:$0xff]  ;;  %v317_v3 = vld [vmem:[%s1436_s26 + $0x428] sm:$0xff] }
  0x49   : > { %v319_v4 = vld [vmem:[%s1436_s26 + $0x440] sm:$0xff]  ;;  %316 = vst [vmem:[%s1441_s28 + $0x210] sm:$0xff] %v315_v2  ;;  %318 = vst [vmem:[%s1441_s28 + $0x218] sm:$0xff] %v317_v3  ;;  %v321_v5 = vld [vmem:[%s1436_s26 + $0x448] sm:$0xff] }
  0x4a   : > { %320 = vst [vmem:[%s1441_s28 + $0x220] sm:$0xff] %v319_v4  ;;  %v323_v6 = vld [vmem:[%s1436_s26 + $0x460] sm:$0xff]  ;;  %v325_v7 = vld [vmem:[%s1436_s26 + $0x468] sm:$0xff]  ;;  %322 = vst [vmem:[%s1441_s28 + $0x228] sm:$0xff] %v321_v5 }
  0x4b   : > { %324 = vst [vmem:[%s1441_s28 + $0x230] sm:$0xff] %v323_v6  ;;  %326 = vst [vmem:[%s1441_s28 + $0x238] sm:$0xff] %v325_v7  ;;  %v327_v8 = vld [vmem:[%s1436_s26 + $0x480] sm:$0xff]  ;;  %v329_v9 = vld [vmem:[%s1436_s26 + $0x488] sm:$0xff] }
  0x4c   : > { %v331_v10 = vld [vmem:[%s1436_s26 + $0x4a0] sm:$0xff]  ;;  %328 = vst [vmem:[%s1441_s28 + $0x240] sm:$0xff] %v327_v8  ;;  %330 = vst [vmem:[%s1441_s28 + $0x248] sm:$0xff] %v329_v9  ;;  %v333_v11 = vld [vmem:[%s1436_s26 + $0x4a8] sm:$0xff] }
  0x4d   : > { %332 = vst [vmem:[%s1441_s28 + $0x250] sm:$0xff] %v331_v10  ;;  %v335_v12 = vld [vmem:[%s1436_s26 + $0x4c0] sm:$0xff]  ;;  %v337_v13 = vld [vmem:[%s1436_s26 + $0x4c8] sm:$0xff]  ;;  %334 = vst [vmem:[%s1441_s28 + $0x258] sm:$0xff] %v333_v11 }
  0x4e   : > { %336 = vst [vmem:[%s1441_s28 + $0x260] sm:$0xff] %v335_v12  ;;  %338 = vst [vmem:[%s1441_s28 + $0x268] sm:$0xff] %v337_v13  ;;  %v339_v14 = vld [vmem:[%s1436_s26 + $0x4e0] sm:$0xff]  ;;  %v341_v15 = vld [vmem:[%s1436_s26 + $0x4e8] sm:$0xff] }
  0x4f   : > { %v343_v16 = vld [vmem:[%s1436_s26 + $0x500] sm:$0xff]  ;;  %340 = vst [vmem:[%s1441_s28 + $0x270] sm:$0xff] %v339_v14  ;;  %342 = vst [vmem:[%s1441_s28 + $0x278] sm:$0xff] %v341_v15  ;;  %v345_v17 = vld [vmem:[%s1436_s26 + $0x508] sm:$0xff] }
  0x50   : > { %344 = vst [vmem:[%s1441_s28 + $0x280] sm:$0xff] %v343_v16  ;;  %v347_v18 = vld [vmem:[%s1436_s26 + $0x520] sm:$0xff]  ;;  %v349_v19 = vld [vmem:[%s1436_s26 + $0x528] sm:$0xff]  ;;  %346 = vst [vmem:[%s1441_s28 + $0x288] sm:$0xff] %v345_v17 }
  0x51   : > { %348 = vst [vmem:[%s1441_s28 + $0x290] sm:$0xff] %v347_v18  ;;  %350 = vst [vmem:[%s1441_s28 + $0x298] sm:$0xff] %v349_v19  ;;  %v351_v20 = vld [vmem:[%s1436_s26 + $0x540] sm:$0xff]  ;;  %v353_v21 = vld [vmem:[%s1436_s26 + $0x548] sm:$0xff] }
  0x52   : > { %v355_v22 = vld [vmem:[%s1436_s26 + $0x560] sm:$0xff]  ;;  %352 = vst [vmem:[%s1441_s28 + $0x2a0] sm:$0xff] %v351_v20  ;;  %354 = vst [vmem:[%s1441_s28 + $0x2a8] sm:$0xff] %v353_v21  ;;  %v357_v23 = vld [vmem:[%s1436_s26 + $0x568] sm:$0xff] }
  0x53   : > { %356 = vst [vmem:[%s1441_s28 + $0x2b0] sm:$0xff] %v355_v22  ;;  %v359_v24 = vld [vmem:[%s1436_s26 + $0x580] sm:$0xff]  ;;  %v361_v25 = vld [vmem:[%s1436_s26 + $0x588] sm:$0xff]  ;;  %358 = vst [vmem:[%s1441_s28 + $0x2b8] sm:$0xff] %v357_v23 }
  0x54   : > { %360 = vst [vmem:[%s1441_s28 + $0x2c0] sm:$0xff] %v359_v24  ;;  %362 = vst [vmem:[%s1441_s28 + $0x2c8] sm:$0xff] %v361_v25  ;;  %v363_v26 = vld [vmem:[%s1436_s26 + $0x5a0] sm:$0xff]  ;;  %v365_v27 = vld [vmem:[%s1436_s26 + $0x5a8] sm:$0xff] }
  0x55   : > { %v367_v28 = vld [vmem:[%s1436_s26 + $0x5c0] sm:$0xff]  ;;  %364 = vst [vmem:[%s1441_s28 + $0x2d0] sm:$0xff] %v363_v26  ;;  %366 = vst [vmem:[%s1441_s28 + $0x2d8] sm:$0xff] %v365_v27  ;;  %v369_v29 = vld [vmem:[%s1436_s26 + $0x5c8] sm:$0xff] }
  0x56   : > { %368 = vst [vmem:[%s1441_s28 + $0x2e0] sm:$0xff] %v367_v28  ;;  %v371_v30 = vld [vmem:[%s1436_s26 + $0x5e0] sm:$0xff]  ;;  %v373_v31 = vld [vmem:[%s1436_s26 + $0x5e8] sm:$0xff]  ;;  %370 = vst [vmem:[%s1441_s28 + $0x2e8] sm:$0xff] %v369_v29 }
  0x57   : > { %372 = vst [vmem:[%s1441_s28 + $0x2f0] sm:$0xff] %v371_v30  ;;  %374 = vst [vmem:[%s1441_s28 + $0x2f8] sm:$0xff] %v373_v31  ;;  %v375_v32 = vld [vmem:[%s1436_s26 + $0x600] sm:$0xff]  ;;  %v377_v33 = vld [vmem:[%s1436_s26 + $0x608] sm:$0xff] }
  0x58   : > { %v379_v34 = vld [vmem:[%s1436_s26 + $0x620] sm:$0xff]  ;;  %376 = vst [vmem:[%s1441_s28 + $0x300] sm:$0xff] %v375_v32  ;;  %378 = vst [vmem:[%s1441_s28 + $0x308] sm:$0xff] %v377_v33  ;;  %v381_v35 = vld [vmem:[%s1436_s26 + $0x628] sm:$0xff] }
  0x59   : > { %380 = vst [vmem:[%s1441_s28 + $0x310] sm:$0xff] %v379_v34  ;;  %v383_v36 = vld [vmem:[%s1436_s26 + $0x640] sm:$0xff]  ;;  %v385_v37 = vld [vmem:[%s1436_s26 + $0x648] sm:$0xff]  ;;  %382 = vst [vmem:[%s1441_s28 + $0x318] sm:$0xff] %v381_v35 }
  0x5a   : > { %384 = vst [vmem:[%s1441_s28 + $0x320] sm:$0xff] %v383_v36  ;;  %386 = vst [vmem:[%s1441_s28 + $0x328] sm:$0xff] %v385_v37  ;;  %v387_v38 = vld [vmem:[%s1436_s26 + $0x660] sm:$0xff]  ;;  %v389_v39 = vld [vmem:[%s1436_s26 + $0x668] sm:$0xff] }
  0x5b   : > { %v391_v40 = vld [vmem:[%s1436_s26 + $0x680] sm:$0xff]  ;;  %388 = vst [vmem:[%s1441_s28 + $0x330] sm:$0xff] %v387_v38  ;;  %390 = vst [vmem:[%s1441_s28 + $0x338] sm:$0xff] %v389_v39  ;;  %v393_v41 = vld [vmem:[%s1436_s26 + $0x688] sm:$0xff] }
  0x5c   : > { %392 = vst [vmem:[%s1441_s28 + $0x340] sm:$0xff] %v391_v40  ;;  %v395_v42 = vld [vmem:[%s1436_s26 + $0x6a0] sm:$0xff]  ;;  %v397_v43 = vld [vmem:[%s1436_s26 + $0x6a8] sm:$0xff]  ;;  %394 = vst [vmem:[%s1441_s28 + $0x348] sm:$0xff] %v393_v41 }
  0x5d   : > { %396 = vst [vmem:[%s1441_s28 + $0x350] sm:$0xff] %v395_v42  ;;  %398 = vst [vmem:[%s1441_s28 + $0x358] sm:$0xff] %v397_v43  ;;  %v399_v44 = vld [vmem:[%s1436_s26 + $0x6c0] sm:$0xff]  ;;  %v401_v45 = vld [vmem:[%s1436_s26 + $0x6c8] sm:$0xff] }
  0x5e   : > { %v403_v46 = vld [vmem:[%s1436_s26 + $0x6e0] sm:$0xff]  ;;  %400 = vst [vmem:[%s1441_s28 + $0x360] sm:$0xff] %v399_v44  ;;  %402 = vst [vmem:[%s1441_s28 + $0x368] sm:$0xff] %v401_v45  ;;  %v405_v47 = vld [vmem:[%s1436_s26 + $0x6e8] sm:$0xff] }
  0x5f   : > { %404 = vst [vmem:[%s1441_s28 + $0x370] sm:$0xff] %v403_v46  ;;  %v407_v48 = vld [vmem:[%s1436_s26 + $0x700] sm:$0xff]  ;;  %v409_v49 = vld [vmem:[%s1436_s26 + $0x708] sm:$0xff]  ;;  %406 = vst [vmem:[%s1441_s28 + $0x378] sm:$0xff] %v405_v47 }
  0x60   : > { %408 = vst [vmem:[%s1441_s28 + $0x380] sm:$0xff] %v407_v48  ;;  %410 = vst [vmem:[%s1441_s28 + $0x388] sm:$0xff] %v409_v49  ;;  %v411_v50 = vld [vmem:[%s1436_s26 + $0x720] sm:$0xff]  ;;  %v413_v51 = vld [vmem:[%s1436_s26 + $0x728] sm:$0xff] }
  0x61   : > { %v415_v52 = vld [vmem:[%s1436_s26 + $0x740] sm:$0xff]  ;;  %412 = vst [vmem:[%s1441_s28 + $0x390] sm:$0xff] %v411_v50  ;;  %414 = vst [vmem:[%s1441_s28 + $0x398] sm:$0xff] %v413_v51  ;;  %v417_v53 = vld [vmem:[%s1436_s26 + $0x748] sm:$0xff] }
  0x62   : > { %416 = vst [vmem:[%s1441_s28 + $0x3a0] sm:$0xff] %v415_v52  ;;  %v419_v54 = vld [vmem:[%s1436_s26 + $0x760] sm:$0xff]  ;;  %v421_v55 = vld [vmem:[%s1436_s26 + $0x768] sm:$0xff]  ;;  %418 = vst [vmem:[%s1441_s28 + $0x3a8] sm:$0xff] %v417_v53 }
  0x63   : > { %420 = vst [vmem:[%s1441_s28 + $0x3b0] sm:$0xff] %v419_v54  ;;  %422 = vst [vmem:[%s1441_s28 + $0x3b8] sm:$0xff] %v421_v55  ;;  %v423_v56 = vld [vmem:[%s1436_s26 + $0x780] sm:$0xff]  ;;  %v425_v57 = vld [vmem:[%s1436_s26 + $0x788] sm:$0xff] }
  0x64   : > { %v427_v58 = vld [vmem:[%s1436_s26 + $0x7a0] sm:$0xff]  ;;  %424 = vst [vmem:[%s1441_s28 + $0x3c0] sm:$0xff] %v423_v56  ;;  %426 = vst [vmem:[%s1441_s28 + $0x3c8] sm:$0xff] %v425_v57  ;;  %v429_v59 = vld [vmem:[%s1436_s26 + $0x7a8] sm:$0xff] }
  0x65   : > { %428 = vst [vmem:[%s1441_s28 + $0x3d0] sm:$0xff] %v427_v58  ;;  %v431_v60 = vld [vmem:[%s1436_s26 + $0x7c0] sm:$0xff]  ;;  %v433_v61 = vld [vmem:[%s1436_s26 + $0x7c8] sm:$0xff]  ;;  %430 = vst [vmem:[%s1441_s28 + $0x3d8] sm:$0xff] %v429_v59 }
  0x66   : > { %432 = vst [vmem:[%s1441_s28 + $0x3e0] sm:$0xff] %v431_v60  ;;  %434 = vst [vmem:[%s1441_s28 + $0x3e8] sm:$0xff] %v433_v61  ;;  %v435_v62 = vld [vmem:[%s1436_s26 + $0x7e0] sm:$0xff]  ;;  %v437_v63 = vld [vmem:[%s1436_s26 + $0x7e8] sm:$0xff] }
  0x67   : > { %436 = vst [vmem:[%s1441_s28 + $0x3f0] sm:$0xff] %v435_v62  ;;  %438 = vst [vmem:[%s1441_s28 + $0x3f8] sm:$0xff] %v437_v63 }
  0x68 PF: > { %p967_p0 = scmp.ge.s32.totalorder %s1312_s21, 1  ;;  %p451_p1 = scmp.lt.s32.totalorder %s1312_s21, 45 }
  0x6a   : > { %p452_p2 = pnand %p967_p0, %p451_p1 }
  0x6b   : > { %s458_s5 = sand.u32 (!%p452_p2), 1, %s1288_s15   ;;  %s1944_s9 = sand.u32 (!%p452_p2), 1, %s1280_s13  }
  0x6c   : > { %455 = sbr.rel (%p452_p2) target bundleno = 451 (0x1c3), region = 51  ;;  %s968_s10 = sshll.u32 (!%p452_p2), %s458_s5, 10 }
  0x6d   : > { %s1702_s11 = sshll.u32 (!%p452_p2), %s1944_s9, 2  ;;  %s970_s22 = sshll.u32 (!%p452_p2), %s1296_s17, 2 }
  0x6e   : > { %s972_s23 = sshll.u32 (!%p452_p2), %s1300_s18, 1  ;;  %p491_p3 = scmp.lt.s32.totalorder (!%p452_p2), %s970_s22, 87 }
  0x6f   : > { %p499_p4 = scmp.lt.s32.totalorder (!%p452_p2), %s972_s23, 3  ;;  %s1717_s9 = scalar_lea.vmem (!%p452_p2), [#allocation3], %s968_s10 }
  0x70   : > { %s489_s1 = scalar_lea.vmem (!%p452_p2), [#allocation4], %s1702_s11  ;;  %p973_p5 = scmp.ne.s32.totalorder (!%p452_p2), %s1296_s17, 0 }
  0x73   : > { %s1967_s22 = smov (!%p491_p3, %s970_s22), 87  ;;  %s1969_s23 = smov (!%p499_p4, %s972_s23), 3 }
  0x74   : > { %s971_s27 = sshll.u32 %s1967_s22, 1  ;;  %s501_s5 = scalar_lea.vmem %s1942_s2, %s1969_s23  ;;  %v1314_v0 = vmov (!%p973_p5), 0.0  }
  0x75   : > { %s1711_s26 = scalar_lea.vmem %s1940_s0, %s971_s27  ;;  %507 = sbr.rel (%p973_p5) target bundleno = 124 (0x7c), region = 59  ;;  %508 = vst [vmem:[#allocation2] sm:$0xf] (!%p973_p5), %v1314_v0 }
  0x7c PF: > { %v512_v1 = vld [vmem:[%s1717_s9 + $0x8] sm:$0xff]  ;;  %v514_v2 = vld [vmem:[%s1717_s9 + $0x18] sm:$0xff]  ;;  %v511_v6 = vld [vmem:[%s1717_s9] sm:$0xff]  ;;  %p974_p6 = scmp.ne.s32.totalorder %s1296_s17, 21 }
  0x7d   : > { %v576_v3 = vld [vmem:[%s1717_s9 + $0x208] sm:$0xff]  ;;  %v982_v4 = vpack.c.bf16 %v514_v2, %v512_v1  ;;  %v578_v5 = vld [vmem:[%s1717_s9 + $0x218] sm:$0xff]  ;;  %v513_v7 = vld [vmem:[%s1717_s9 + $0x10] sm:$0xff] }
  0x7e   : > { %v1046_v8 = vpack.c.bf16 %v578_v5, %v576_v3  ;;  %v984_v9 = vpack.c.bf16 %v513_v7, %v511_v6  ;;  %v575_v10 = vld [vmem:[%s1717_s9 + $0x200] sm:$0xff]  ;;  %v577_v11 = vld [vmem:[%s1717_s9 + $0x210] sm:$0xff]  ;;  %v516_v12 = vld [vmem:[%s1717_s9 + $0x28] sm:$0xff] }
  0x7f   : > { %983 = vmatprep.subr.bf16.mxu1 %v982_v4  ;;  %v1048_v13 = vpack.c.bf16 %v577_v11, %v575_v10  ;;  %v518_v14 = vld [vmem:[%s1717_s9 + $0x38] sm:$0xff]  ;;  %v580_v15 = vld [vmem:[%s1717_s9 + $0x228] sm:$0xff]  ;;  %v515_v19 = vld [vmem:[%s1717_s9 + $0x20] sm:$0xff] }
  0x80   : > { %v582_v16 = vld [vmem:[%s1717_s9 + $0x238] sm:$0xff]  ;;  %1047 = vmatprep.subr.bf16.mxu0 %v1046_v8  ;;  %985 = vmatpush1.bf16.msra.mxu1 %v984_v9  ;;  %v986_v17 = vpack.c.bf16 %v518_v14, %v516_v12  ;;  %v517_v20 = vld [vmem:[%s1717_s9 + $0x30] sm:$0xff]  ;;  %v579_v21 = vld [vmem:[%s1717_s9 + $0x220] sm:$0xff] }
  0x81   : > { %v1050_v18 = vpack.c.bf16 %v582_v16, %v580_v15  ;;  %1049 = vmatpush1.bf16.msra.mxu0 %v1048_v13  ;;  %v988_v22 = vpack.c.bf16 %v517_v20, %v515_v19  ;;  %v581_v23 = vld [vmem:[%s1717_s9 + $0x230] sm:$0xff]  ;;  %v520_v24 = vld [vmem:[%s1717_s9 + $0x48] sm:$0xff]  ;;  %v522_v25 = vld [vmem:[%s1717_s9 + $0x58] sm:$0xff] }
  0x82   : > { %987 = vmatprep.subr.bf16.mxu1 %v986_v17  ;;  %v1052_v26 = vpack.c.bf16 %v581_v23, %v579_v21  ;;  %v990_v27 = vpack.c.bf16 %v522_v25, %v520_v24  ;;  %v584_v28 = vld [vmem:[%s1717_s9 + $0x248] sm:$0xff]  ;;  %v586_v29 = vld [vmem:[%s1717_s9 + $0x258] sm:$0xff]  ;;  %v519_v30 = vld [vmem:[%s1717_s9 + $0x40] sm:$0xff] }
  0x83   : > { %1051 = vmatprep.subr.bf16.mxu0 %v1050_v18  ;;  %v1054_v31 = vpack.c.bf16 %v586_v29, %v584_v28  ;;  %v521_v32 = vld [vmem:[%s1717_s9 + $0x50] sm:$0xff]  ;;  %v583_v33 = vld [vmem:[%s1717_s9 + $0x240] sm:$0xff]  ;;  %v524_v36 = vld [vmem:[%s1717_s9 + $0x68] sm:$0xff] }
  0x84   : > { %v585_v34 = vld [vmem:[%s1717_s9 + $0x250] sm:$0xff]  ;;  %989 = vmatpush1.bf16.msra.mxu1 %v988_v22  ;;  %v992_v35 = vpack.c.bf16 %v521_v32, %v519_v30  ;;  %v526_v37 = vld [vmem:[%s1717_s9 + $0x78] sm:$0xff]  ;;  %v588_v38 = vld [vmem:[%s1717_s9 + $0x268] sm:$0xff] }
  0x85   : > { %1053 = vmatpush1.bf16.msra.mxu0 %v1052_v26  ;;  %991 = vmatprep.subr.bf16.mxu1 %v990_v27  ;;  %v1056_v39 = vpack.c.bf16 %v585_v34, %v583_v33  ;;  %v994_v40 = vpack.c.bf16 %v526_v37, %v524_v36  ;;  %v590_v41 = vld [vmem:[%s1717_s9 + $0x278] sm:$0xff]  ;;  %v523_v42 = vld [vmem:[%s1717_s9 + $0x60] sm:$0xff]  ;;  %v525_v43 = vld [vmem:[%s1717_s9 + $0x70] sm:$0xff] }
  0x86   : > { %1055 = vmatprep.subr.bf16.mxu0 %v1054_v31  ;;  %v1058_v44 = vpack.c.bf16 %v590_v41, %v588_v38  ;;  %v587_v45 = vld [vmem:[%s1717_s9 + $0x260] sm:$0xff]  ;;  %v589_v46 = vld [vmem:[%s1717_s9 + $0x270] sm:$0xff]  ;;  %v528_v47 = vld [vmem:[%s1717_s9 + $0x88] sm:$0xff]  ;;  %v996_v51 = vpack.c.bf16 %v525_v43, %v523_v42 }
  0x87   : > { %v530_v48 = vld [vmem:[%s1717_s9 + $0x98] sm:$0xff]  ;;  %v592_v49 = vld [vmem:[%s1717_s9 + $0x288] sm:$0xff]  ;;  %v1060_v52 = vpack.c.bf16 %v589_v46, %v587_v45  ;;  %v527_v54 = vld [vmem:[%s1717_s9 + $0x80] sm:$0xff] }
  0x88   : > { %v594_v50 = vld [vmem:[%s1717_s9 + $0x298] sm:$0xff]  ;;  %993 = vmatpush1.bf16.msra.mxu1 %v992_v35  ;;  %v998_v53 = vpack.c.bf16 %v530_v48, %v528_v47  ;;  %v529_v55 = vld [vmem:[%s1717_s9 + $0x90] sm:$0xff]  ;;  %v591_v56 = vld [vmem:[%s1717_s9 + $0x280] sm:$0xff]  ;;  %v1315_v47 = vmov 1983009808  }
  0x89   : > { %1057 = vmatpush1.bf16.msra.mxu0 %v1056_v39  ;;  %995 = vmatprep.subr.bf16.mxu1 %v994_v40  ;;  %v1062_v57 = vpack.c.bf16 %v594_v50, %v592_v49  ;;  %v593_v58 = vld [vmem:[%s1717_s9 + $0x290] sm:$0xff]  ;;  %v532_v59 = vld [vmem:[%s1717_s9 + $0xa8] sm:$0xff]  ;;  %v534_v60 = vld [vmem:[%s1717_s9 + $0xb8] sm:$0xff]  ;;  %v1000_v63 = vpack.c.bf16 %v529_v55, %v527_v54  ;;  %v642_v48 = vunpack.c.l.s4 %v1315_v47  ;;  %v644_v49 = vlaneseq }
  0x8a   : > { %1059 = vmatprep.subr.bf16.mxu0 %v1058_v44  ;;  %v596_v61 = vld [vmem:[%s1717_s9 + $0x2a8] sm:$0xff]  ;;  %v598_v62 = vld [vmem:[%s1717_s9 + $0x2b8] sm:$0xff]  ;;  %v1064_v0 = vpack.c.bf16 %v593_v58, %v591_v56  ;;  %v1002_v1 = vpack.c.bf16 %v534_v60, %v532_v59  ;;  %v531_v2 = vld [vmem:[%s1717_s9 + $0xa0] sm:$0xff] }
  0x8b   : > { %v533_v3 = vld [vmem:[%s1717_s9 + $0xb0] sm:$0xff]  ;;  %v595_v4 = vld [vmem:[%s1717_s9 + $0x2a0] sm:$0xff]  ;;  %v1066_v5 = vpack.c.bf16 %v598_v62, %v596_v61  ;;  %v536_v7 = vld [vmem:[%s1717_s9 + $0xc8] sm:$0xff]  ;;  %v643_v62 = vunpack.c.0.s8 %v642_v48 }
  0x8c   : > { %997 = vmatpush1.bf16.msra.mxu1 %v996_v51  ;;  %v597_v6 = vld [vmem:[%s1717_s9 + $0x2b0] sm:$0xff]  ;;  %v538_v8 = vld [vmem:[%s1717_s9 + $0xd8] sm:$0xff]  ;;  %v600_v9 = vld [vmem:[%s1717_s9 + $0x2c8] sm:$0xff]  ;;  %v1004_v11 = vpack.c.bf16 %v533_v3, %v531_v2 }
  0x8d   : > { %1061 = vmatpush1.bf16.msra.mxu0 %v1060_v52  ;;  %999 = vmatprep.subr.bf16.mxu1 %v998_v53  ;;  %v602_v10 = vld [vmem:[%s1717_s9 + $0x2d8] sm:$0xff]  ;;  %v1068_v12 = vpack.c.bf16 %v597_v6, %v595_v4  ;;  %v1006_v13 = vpack.c.bf16 %v538_v8, %v536_v7  ;;  %v535_v14 = vld [vmem:[%s1717_s9 + $0xc0] sm:$0xff]  ;;  %v537_v15 = vld [vmem:[%s1717_s9 + $0xd0] sm:$0xff] }
  0x8e   : > { %1063 = vmatprep.subr.bf16.mxu0 %v1062_v57  ;;  %v599_v16 = vld [vmem:[%s1717_s9 + $0x2c0] sm:$0xff]  ;;  %v1070_v17 = vpack.c.bf16 %v602_v10, %v600_v9  ;;  %v601_v18 = vld [vmem:[%s1717_s9 + $0x2d0] sm:$0xff]  ;;  %v540_v19 = vld [vmem:[%s1717_s9 + $0xe8] sm:$0xff]  ;;  %v1008_v23 = vpack.c.bf16 %v537_v15, %v535_v14 }
  0x8f   : > { %v542_v20 = vld [vmem:[%s1717_s9 + $0xf8] sm:$0xff]  ;;  %v604_v21 = vld [vmem:[%s1717_s9 + $0x2e8] sm:$0xff]  ;;  %v1072_v24 = vpack.c.bf16 %v601_v18, %v599_v16  ;;  %v539_v26 = vld [vmem:[%s1717_s9 + $0xe0] sm:$0xff] }
  0x90   : > { %1001 = vmatpush1.bf16.msra.mxu1 %v1000_v63  ;;  %v606_v22 = vld [vmem:[%s1717_s9 + $0x2f8] sm:$0xff]  ;;  %v1010_v25 = vpack.c.bf16 %v542_v20, %v540_v19  ;;  %v541_v27 = vld [vmem:[%s1717_s9 + $0xf0] sm:$0xff]  ;;  %v603_v28 = vld [vmem:[%s1717_s9 + $0x2e0] sm:$0xff]  ;;  %v1805_v63 = vshrl.u32 %v644_v49, 7 }
  0x91   : > { %1065 = vmatpush1.bf16.msra.mxu0 %v1064_v0  ;;  %1003 = vmatprep.subr.bf16.mxu1 %v1002_v1  ;;  %v1074_v29 = vpack.c.bf16 %v606_v22, %v604_v21  ;;  %v605_v30 = vld [vmem:[%s1717_s9 + $0x2f0] sm:$0xff]  ;;  %v544_v31 = vld [vmem:[%s1717_s9 + $0x108] sm:$0xff]  ;;  %v546_v32 = vld [vmem:[%s1717_s9 + $0x118] sm:$0xff]  ;;  %v1012_v35 = vpack.c.bf16 %v541_v27, %v539_v26 }
  0x92   : > { %1067 = vmatprep.subr.bf16.mxu0 %v1066_v5  ;;  %v608_v33 = vld [vmem:[%s1717_s9 + $0x308] sm:$0xff]  ;;  %v610_v34 = vld [vmem:[%s1717_s9 + $0x318] sm:$0xff]  ;;  %v1076_v36 = vpack.c.bf16 %v605_v30, %v603_v28  ;;  %v1014_v37 = vpack.c.bf16 %v546_v32, %v544_v31  ;;  %v543_v38 = vld [vmem:[%s1717_s9 + $0x100] sm:$0xff] }
  0x93   : > { %v545_v39 = vld [vmem:[%s1717_s9 + $0x110] sm:$0xff]  ;;  %v607_v40 = vld [vmem:[%s1717_s9 + $0x300] sm:$0xff]  ;;  %v1078_v41 = vpack.c.bf16 %v610_v34, %v608_v33  ;;  %v548_v43 = vld [vmem:[%s1717_s9 + $0x128] sm:$0xff] }
  0x94   : > { %1005 = vmatpush1.bf16.msra.mxu1 %v1004_v11  ;;  %v609_v42 = vld [vmem:[%s1717_s9 + $0x310] sm:$0xff]  ;;  %v550_v44 = vld [vmem:[%s1717_s9 + $0x138] sm:$0xff]  ;;  %v612_v45 = vld [vmem:[%s1717_s9 + $0x328] sm:$0xff]  ;;  %v1016_v50 = vpack.c.bf16 %v545_v39, %v543_v38 }
  0x95   : > { %1069 = vmatpush1.bf16.msra.mxu0 %v1068_v12  ;;  %1007 = vmatprep.subr.bf16.mxu1 %v1006_v13  ;;  %v614_v46 = vld [vmem:[%s1717_s9 + $0x338] sm:$0xff]  ;;  %v1080_v51 = vpack.c.bf16 %v609_v42, %v607_v40  ;;  %v1018_v52 = vpack.c.bf16 %v550_v44, %v548_v43  ;;  %v547_v53 = vld [vmem:[%s1717_s9 + $0x120] sm:$0xff]  ;;  %v549_v54 = vld [vmem:[%s1717_s9 + $0x130] sm:$0xff]  ;;  %v1816_v12 = vsub.s32 %v643_v62, %v1805_v63 }
  0x96   : > { %1071 = vmatprep.subr.bf16.mxu0 %v1070_v17  ;;  %v611_v55 = vld [vmem:[%s1717_s9 + $0x320] sm:$0xff]  ;;  %v1082_v56 = vpack.c.bf16 %v614_v46, %v612_v45  ;;  %v613_v57 = vld [vmem:[%s1717_s9 + $0x330] sm:$0xff]  ;;  %v552_v58 = vld [vmem:[%s1717_s9 + $0x148] sm:$0xff]  ;;  %v1020_v0 = vpack.c.bf16 %v549_v54, %v547_v53 }
  0x97   : > { %v554_v59 = vld [vmem:[%s1717_s9 + $0x158] sm:$0xff]  ;;  %v616_v60 = vld [vmem:[%s1717_s9 + $0x348] sm:$0xff]  ;;  %v1084_v1 = vpack.c.bf16 %v613_v57, %v611_v55  ;;  %v551_v3 = vld [vmem:[%s1717_s9 + $0x140] sm:$0xff] }
  0x98   : > { %1009 = vmatpush1.bf16.msra.mxu1 %v1008_v23  ;;  %v618_v61 = vld [vmem:[%s1717_s9 + $0x358] sm:$0xff]  ;;  %v1022_v2 = vpack.c.bf16 %v554_v59, %v552_v58  ;;  %v553_v4 = vld [vmem:[%s1717_s9 + $0x150] sm:$0xff]  ;;  %v615_v5 = vld [vmem:[%s1717_s9 + $0x340] sm:$0xff] }
  0x99   : > { %1073 = vmatpush1.bf16.msra.mxu0 %v1072_v24  ;;  %1011 = vmatprep.subr.bf16.mxu1 %v1010_v25  ;;  %v1086_v6 = vpack.c.bf16 %v618_v61, %v616_v60  ;;  %v617_v7 = vld [vmem:[%s1717_s9 + $0x350] sm:$0xff]  ;;  %v556_v8 = vld [vmem:[%s1717_s9 + $0x168] sm:$0xff]  ;;  %v558_v9 = vld [vmem:[%s1717_s9 + $0x178] sm:$0xff]  ;;  %v1024_v13 = vpack.c.bf16 %v553_v4, %v551_v3 }
  0x9a   : > { %1075 = vmatprep.subr.bf16.mxu0 %v1074_v29  ;;  %v620_v10 = vld [vmem:[%s1717_s9 + $0x368] sm:$0xff]  ;;  %v622_v11 = vld [vmem:[%s1717_s9 + $0x378] sm:$0xff]  ;;  %v555_v14 = vld [vmem:[%s1717_s9 + $0x160] sm:$0xff]  ;;  %v1088_v15 = vpack.c.bf16 %v617_v7, %v615_v5  ;;  %v1026_v16 = vpack.c.bf16 %v558_v9, %v556_v8 }
  0x9b   : > { %v557_v17 = vld [vmem:[%s1717_s9 + $0x170] sm:$0xff]  ;;  %v619_v18 = vld [vmem:[%s1717_s9 + $0x360] sm:$0xff]  ;;  %v1090_v20 = vpack.c.bf16 %v622_v11, %v620_v10  ;;  %v560_v21 = vld [vmem:[%s1717_s9 + $0x188] sm:$0xff] }
  0x9c   : > { %1013 = vmatpush1.bf16.msra.mxu1 %v1012_v35  ;;  %v621_v19 = vld [vmem:[%s1717_s9 + $0x370] sm:$0xff]  ;;  %v562_v22 = vld [vmem:[%s1717_s9 + $0x198] sm:$0xff]  ;;  %v624_v24 = vld [vmem:[%s1717_s9 + $0x388] sm:$0xff]  ;;  %v1028_v28 = vpack.c.bf16 %v557_v17, %v555_v14 }
  0x9d   : > { %1077 = vmatpush1.bf16.msra.mxu0 %v1076_v36  ;;  %1015 = vmatprep.subr.bf16.mxu1 %v1014_v37  ;;  %v510_v23 = vld [vmem:[%s1711_s26] sm:$0xff]  ;;  %v1092_v29 = vpack.c.bf16 %v621_v19, %v619_v18  ;;  %v1030_v30 = vpack.c.bf16 %v562_v22, %v560_v21  ;;  %v561_v32 = vld [vmem:[%s1717_s9 + $0x190] sm:$0xff]  ;;  %v564_v38 = vld [vmem:[%s1717_s9 + $0x1a8] sm:$0xff] }
  0x9e   : > { %1079 = vmatprep.subr.bf16.mxu0 %v1078_v41  ;;  %v626_v25 = vld [vmem:[%s1717_s9 + $0x398] sm:$0xff]  ;;  %v1828_v26 = vrot.slane %v510_v23, %v1816_v12  ;;  %v640_v27 = vcombine.high %v510_v23, %v510_v23  ;;  %v559_v31 = vld [vmem:[%s1717_s9 + $0x180] sm:$0xff]  ;;  %v625_v37 = vld [vmem:[%s1717_s9 + $0x390] sm:$0xff] }
  0x9f   : > { %v623_v33 = vld [vmem:[%s1717_s9 + $0x380] sm:$0xff]  ;;  %v1094_v36 = vpack.c.bf16 %v626_v25, %v624_v24  ;;  %v566_v39 = vld [vmem:[%s1717_s9 + $0x1b8] sm:$0xff]  ;;  %v628_v40 = vld [vmem:[%s1717_s9 + $0x3a8] sm:$0xff]  ;;  %v1032_v43 = vpack.c.bf16 %v561_v32, %v559_v31 }
  0xa0   : > { %1017 = vmatpush1.bf16.msra.mxu1 %v1016_v50  ;;  %v655_v34 = vcombine.high %v1828_v26, %v1828_v26  ;;  %v1836_v35 = vrot.slane %v640_v27, %v1816_v12  ;;  %v630_v41 = vld [vmem:[%s1717_s9 + $0x3b8] sm:$0xff]  ;;  %v1096_v44 = vpack.c.bf16 %v625_v37, %v623_v33  ;;  %v1034_v45 = vpack.c.bf16 %v566_v39, %v564_v38  ;;  %v563_v46 = vld [vmem:[%s1717_s9 + $0x1a0] sm:$0xff]  ;;  %v565_v47 = vld [vmem:[%s1717_s9 + $0x1b0] sm:$0xff] }
  0xa1   : > { %1081 = vmatpush1.bf16.msra.mxu0 %v1080_v51  ;;  %1019 = vmatprep.subr.bf16.mxu1 %v1018_v52  ;;  %v627_v48 = vld [vmem:[%s1717_s9 + $0x3a0] sm:$0xff]  ;;  %v1098_v49 = vpack.c.bf16 %v630_v41, %v628_v40  ;;  %v629_v50 = vld [vmem:[%s1717_s9 + $0x3b0] sm:$0xff]  ;;  %v568_v51 = vld [vmem:[%s1717_s9 + $0x1c8] sm:$0xff]  ;;  %v1036_v55 = vpack.c.bf16 %v565_v47, %v563_v46  ;;  %v829_v27 = vsub.s32 (!%p974_p6), 1, %v1805_v63 }
  0xa2   : > { %1083 = vmatprep.subr.bf16.mxu0 %v1082_v56  ;;  %725 = vmatprep.mubr.f32.mxu1 %v655_v34  ;;  %v656_v42 = vcombine.high %v1836_v35, %v1836_v35  ;;  %v570_v52 = vld [vmem:[%s1717_s9 + $0x1d8] sm:$0xff]  ;;  %v632_v53 = vld [vmem:[%s1717_s9 + $0x3c8] sm:$0xff]  ;;  %v1100_v56 = vpack.c.bf16 %v629_v50, %v627_v48  ;;  %v567_v58 = vld [vmem:[%s1717_s9 + $0x1c0] sm:$0xff] }
  0xa3   : > { %v634_v54 = vld [vmem:[%s1717_s9 + $0x3d8] sm:$0xff]  ;;  %v1038_v57 = vpack.c.bf16 %v570_v52, %v568_v51  ;;  %v569_v59 = vld [vmem:[%s1717_s9 + $0x1d0] sm:$0xff]  ;;  %v631_v60 = vld [vmem:[%s1717_s9 + $0x3c0] sm:$0xff] }
  0xa4   : > { %1021 = vmatpush1.bf16.msra.mxu1 %v1020_v0  ;;  %796 = vmatprep.mubr.f32.mxu0 %v656_v42  ;;  %v1102_v61 = vpack.c.bf16 %v634_v54, %v632_v53  ;;  %v633_v62 = vld [vmem:[%s1717_s9 + $0x3d0] sm:$0xff]  ;;  %v572_v0 = vld [vmem:[%s1717_s9 + $0x1e8] sm:$0xff]  ;;  %v638_v3 = vld [vmem:[%s1717_s9 + $0x3f8] sm:$0xff]  ;;  %v1040_v4 = vpack.c.bf16 %v569_v59, %v567_v58 }
  0xa5   : > { %1085 = vmatpush1.bf16.msra.mxu0 %v1084_v1  ;;  %1023 = vmatprep.subr.bf16.mxu1 %v1022_v2  ;;  %v574_v1 = vld [vmem:[%s1717_s9 + $0x1f8] sm:$0xff]  ;;  %v636_v2 = vld [vmem:[%s1717_s9 + $0x3e8] sm:$0xff]  ;;  %v1104_v5 = vpack.c.bf16 %v633_v62, %v631_v60  ;;  %v571_v7 = vld [vmem:[%s1717_s9 + $0x1e0] sm:$0xff] }
  0xa6   : > { %1087 = vmatprep.subr.bf16.mxu0 %v1086_v6  ;;  %v1042_v6 = vpack.c.bf16 %v574_v1, %v572_v0  ;;  %v573_v8 = vld [vmem:[%s1717_s9 + $0x1f0] sm:$0xff]  ;;  %v1106_v9 = vpack.c.bf16 %v638_v3, %v636_v2  ;;  %v635_v10 = vld [vmem:[%s1717_s9 + $0x3e0] sm:$0xff]  ;;  %v509_v22 = vld [vmem:[#allocation2] sm:$0xf] }
  0xa7   : > { %v637_v11 = vld [vmem:[%s1717_s9 + $0x3f0] sm:$0xff]  ;;  %v821_v25 = vld [vmem:[%s501_s5] sm:$0x3] (!%p974_p6) }
  0xa8   : > { %1025 = vmatpush1.bf16.msra.mxu1 %v1024_v13  ;;  %v1044_v13 = vpack.c.bf16 %v573_v8, %v571_v7  ;;  %v1108_v14 = vpack.c.bf16 %v637_v11, %v635_v10 }
  0xa9   : > { %1089 = vmatpush1.bf16.msra.mxu0 %v1088_v15  ;;  %1027 = vmatprep.subr.bf16.mxu1 %v1026_v16 }
  0xaa   : > { %1091 = vmatprep.subr.bf16.mxu0 %v1090_v20 }
  0xac   : > { %1029 = vmatpush1.bf16.msra.mxu1 %v1028_v28 }
  0xad   : > { %1093 = vmatpush1.bf16.msra.mxu0 %v1092_v29  ;;  %1031 = vmatprep.subr.bf16.mxu1 %v1030_v30  ;;  %v830_v29 = vrot.slane (!%p974_p6), %v821_v25, %v829_v27 }
  0xae   : > { %1095 = vmatprep.subr.bf16.mxu0 %v1094_v36 }
  0xb0   : > { %1033 = vmatpush1.bf16.msra.mxu1 %v1032_v43 }
  0xb1   : > { %1097 = vmatpush1.bf16.msra.mxu0 %v1096_v44  ;;  %1035 = vmatprep.subr.bf16.mxu1 %v1034_v45 }
  0xb2   : > { %1099 = vmatprep.subr.bf16.mxu0 %v1098_v49 }
  0xb4   : > { %1037 = vmatpush1.bf16.msra.mxu1 %v1036_v55 }
  0xb5   : > { %1101 = vmatpush1.bf16.msra.mxu0 %v1100_v56  ;;  %1039 = vmatprep.subr.bf16.mxu1 %v1038_v57 }
  0xb6   : > { %1103 = vmatprep.subr.bf16.mxu0 %v1102_v61 }
  0xb8   : > { %1041 = vmatpush1.bf16.msra.mxu1 %v1040_v4 }
  0xb9   : > { %1105 = vmatpush1.bf16.msra.mxu0 %v1104_v5  ;;  %1043 = vmatprep.subr.bf16.mxu1 %v1042_v6 }
  0xba   : > { %1107 = vmatprep.subr.bf16.mxu0 %v1106_v9 }
  0xbc   : > { %1045 = vmatpush1.bf16.msra.mxu1 %v1044_v13 }
  0xbd   : > { %1109 = vmatpush1.bf16.msra.mxu0 %v1108_v14 }
  0xbf   : > { %726 = vmatmul.mubr.f32.vlgmr.msra.gmra.mrb[0].mxu1 %v1828_v26  ;;  %v825_v26 = vsub.s32 (!%p974_p6), 0, %v1805_v63 }
  0xc0   : > { %797 = vmatmul.mubr.f32.vlgmr.msra.gmra.mrb[0].mxu0 %v1836_v35 }
  0xc1   : > { %v826_v28 = vrot.slane (!%p974_p6), %v821_v25, %v825_v26 }
  0xc3   : > { %v831_v30 = vcombine.low (!%p974_p6), %v826_v28, %v830_v29 }
  0xc5   : > { %v838_v32 = vrot.slane (!%p974_p6), %v831_v30, %v1816_v12 }
 0x192   : > { %v727_v15 = vpop.f32.mrb[0].mxu1 }
 0x193   : > { %v798_v16 = vpop.f32.mrb[0].mxu0  ;;  %v729_v17 = vpop.f32.mrb[1].mxu1 }
 0x194   : > { %v799_v18 = vadd.f32 %v798_v16, %v727_v15  ;;  %v800_v19 = vpop.f32.mrb[1].mxu0 }
 0x195   : > { %v801_v20 = vadd.f32 %v800_v19, %v729_v17 }
 0x197   : > { %v805_v21 = vcombine.low %v799_v18, %v801_v20  ;;  %819 = sbr.rel (%p974_p6) target bundleno = 426 (0x1aa), region = 63 }
 0x199   : > { %v812_v23 = vrot.slane %v805_v21, %v1816_v12 }
 0x19b   : > { %v814_v24 = vadd.f32 %v812_v23, %v509_v22 }
 0x19d   : > { %815 = vst [vmem:[#allocation2] sm:$0xf] %v814_v24 }
 0x1a4   : > { %v820_v31 = vld [vmem:[#allocation2] sm:$0xf] }
 0x1a5   : > { %v840_v33 = vadd.f32 %v838_v32, %v820_v31 }
 0x1a7   : > { %v841_v34 = vmax.f32 %v840_v33, 0.0 }
 0x1a9   : > { %842 = vst [vmem:[%s489_s1] sm:$0xf] %v841_v34 }
 0x1aa PF: > { %s981_s17 = sshll.u32 %s1300_s18, 6  ;;  %s858_s4 = sshll.u32 %s489_s1, 4  ;;  %s859_s4 = int_to_ptr.vmem [resolvable:$true] %s858_s4 }
 0x1ab   : > { %s1883_s27 = scalar_lea.hbm %s1943_s3, %s981_s17  ;;  %s1950_s29 = sand.u32 1, %s1280_s13  }
 0x1ac   : > { %s844_s26 = scalar_lea.sflag [#allocation5], %s1950_s29  ;;  %s1202_s15 = scalar_lea.vmem %s859_s4, 64 }
 0x1ad   : > { %p1203_p8 = scmp.ne.s32.totalorder %s859_s4, %s1202_s15  ;;  %s1316_s28 = smov [#allocation4]  }
 0x1ae   : > { %s1206_s5 = sshll.u32 %s1316_s28, 4  ;;  %s1207_s5 = int_to_ptr.vmem [resolvable:$false] %s1206_s5 }
 0x1af   : > { %p1204_p9 = pnand %p1203_p8, %p1409_p7  ;;  %s1208_s9 = scalar_lea.vmem %s1207_s5, 128 }
 0x1b0   : > { %p1209_p11 = scmp.lt.s32.totalorder %s859_s4, %s1207_s5  ;;  %p1210_p13 = scmp.lt.s32.totalorder %s1208_s9, %s1202_s15 }
 0x1b1   : > { %p1205_p10 = pneg %p1204_p9 }
 0x1b2   : > { %p1211_p0 = por %p1210_p13, %p1209_p11 }
 0x1b4   : > { %p1212_p1 = pnand %p1211_p0, %p1205_p10 }
 0x1b6   : > { %1215 = shalt.err (!%p1212_p1)
}
 0x1b7   : > { %s1216_s1 = scalar_lea.hbm %s1883_s27, 64  ;;  %s1220_s10 = scalar_lea.hbm %s1943_s3, 128 }
 0x1b8   : > { %p1217_p2 = scmp.ne.s32.totalorder %s1883_s27, %s1216_s1  ;;  %p1221_p5 = scmp.lt.u32.totalorder %s1883_s27, %s1943_s3 }
 0x1b9   : > { %p1222_p6 = scmp.lt.u32.totalorder %s1220_s10, %s1216_s1  ;;  %p1224_p9 = scmp.lt.u32.totalorder %s1216_s1, %s1883_s27 }
 0x1ba   : > { %p1218_p3 = pnand %p1217_p2, %p1409_p7 }
 0x1bb   : > { %p1223_p8 = por %p1222_p6, %p1221_p5 }
 0x1bc   : > { %p1219_p4 = pneg %p1218_p3 }
 0x1bd   : > { %p1225_p10 = por %p1224_p9, %p1223_p8 }
 0x1bf   : > { %p1226_p11 = pnand %p1225_p10, %p1219_p4 }
 0x1c1   : > { %1229 = shalt.err (!%p1226_p11)
}
 0x1c2   : > { %1112 = dma.vmem_to_hbm [thread:$0]  (%p1409_p7), %s859_s4, 64, %s1883_s27, %s844_s26  }
 0x1c3 PF: > { %p1118_p13 = scmp.ge.s32.totalorder %s1312_s21, 2  ;;  %s870_s23 = sand.u32 1, %s1276_s12  }
 0x1c4   : > { %s871_s29 = scalar_lea.sflag [#allocation5], %s870_s23 }
 0x1c5   : > { %p1115_p0 = pnand %p1118_p13, %p1417_p12 }
 0x1c7   : > { %1271 = dma.done.wait (!%p1115_p0), %s871_s29, 64  }
 0x1c8   : > { %1273 = vsyncadd (!%p1115_p0), %s871_s29, 4294967232  ;;  %s16_s21 = sadd.s32 1, %s1312_s21   ;;  %s1951_s12 = smov %s1280_s13 }
 0x1c9   : > { %p13_p1 = scmp.ge.s32.totalorder %s16_s21, 46   ;;  %s1952_s13 = smov %s1284_s14 }
 0x1ca   : > { %s1953_s14 = smov %s1422_s7  ;;  %s1954_s15 = smov %s1292_s16 }
 0x1cb   : > { %s1955_s16 = smov %s1425_s8  ;;  %s1956_s17 = smov %s1304_s19 }
 0x1cc   : > { %s1957_s18 = smov %s1308_s20  ;;  %s1958_s19 = smov %s1961_s24 }
 0x1cd   : > { %s1959_s20 = smov %s1965_s25  ;;  %15 = sbr.rel (!%p13_p1) target bundleno = 8 (0x8), region = 109 }
 0x1d4   :  { %876 = vsyncpa [#allocation5], 1 }
 0x1d5   :  { %878 = vsyncpa [#allocation5 + $0x1], 1 }

</bundles_post_ra>
